<compile_context>
chip_gen: v7x
topology: tpu7x:2x2x1
jax: 0.10.0
libtpu: 0.0.40
codegen_flags: <defaults>
</compile_context>

<pallas_src>
import functools

import numpy as np
import jax
import jax.numpy as jnp
from jax.experimental import pallas as pl
from jax.experimental.pallas import tpu as pltpu

BN_EPS = 1e-5


def calculate_kernel_size(input_size, output_size, stride, padding, dilation, output_padding):
    return (output_size - (input_size - 1) * stride + 2 * padding - output_padding - 1) // dilation + 1


# ----------------------------------------------------------------------------
# Host-side constant builders (selection matrices, layout permutations)
# ----------------------------------------------------------------------------
def _sel_conv(batch, l_in, l_out, k, stride, padding):
    """S[j, b*l_in + i, b*l_out + o] = 1 iff i == o*stride - padding + j (in range)."""
    s = np.zeros((k, batch * l_in, batch * l_out), np.float32)
    for b in range(batch):
        for o in range(l_out):
            for j in range(k):
                i = o * stride - padding + j
                if 0 <= i < l_in:
                    s[j, b * l_in + i, b * l_out + o] = 1.0
    return jnp.asarray(s)


def _sel_deconv(batch, l_in, l_out, k, stride, padding):
    """ConvTranspose1d as direct conv over the zero-upsampled, edge-padded input.

    Tap j at output o reads upsampled-padded position p = o + j, which holds input i
    iff p == (k-1-padding) + stride*i.
    """
    edge = k - 1 - padding
    s = np.zeros((k, batch * l_in, batch * l_out), np.float32)
    for b in range(batch):
        for o in range(l_out):
            for j in range(k):
                q = o + j - edge
                if q >= 0 and q % stride == 0:
                    i = q // stride
                    if 0 <= i < l_in:
                        s[j, b * l_in + i, b * l_out + o] = 1.0
    return jnp.asarray(s)


def _flatten_sel(batch, l_last):
    """Sel[l, b*L + l, b] = 1; x @ Sel[l] extracts column group l as a (C, B) block."""
    s = np.zeros((l_last, batch * l_last, batch), np.float32)
    for b in range(batch):
        for l in range(l_last):
            s[l, b * l_last + l, b] = 1.0
    return jnp.asarray(s)


def _unflatten_sel(batch, l0):
    """Q[l, b, b*L0 + l] = 1; sum_l d_l @ Q[l] rebuilds the (C0, B*L0) decoder slab."""
    q = np.zeros((l0, batch, batch * l0), np.float32)
    for b in range(batch):
        for l in range(l0):
            q[l, b, b * l0 + l] = 1.0
    return jnp.asarray(q)


def _conv_w_kouter(w):
    """(Cout, Cin, K) Conv1d weight -> (Cout, K*Cin), k-outer contraction layout."""
    return jnp.transpose(w, (0, 2, 1)).reshape(w.shape[0], -1)


def _deconv_w_kouter(w):
    """(Cin, Cout, K) ConvTranspose1d weight -> equivalent direct-conv weight, k-outer."""
    weq = jnp.transpose(w[:, :, ::-1], (1, 0, 2))            # (Cout, Cin, K), flipped
    return _conv_w_kouter(weq)


# ----------------------------------------------------------------------------
# In-kernel helpers (pure jnp on VMEM-resident values)
# ----------------------------------------------------------------------------
def _bn_train(y, gamma, beta):
    """Single-pass train-mode BatchNorm1d over the B*L axis of a (C, N) slab."""
    inv_n = 1.0 / y.shape[1]
    m = jnp.sum(y, axis=1, keepdims=True) * inv_n
    ms = jnp.sum(y * y, axis=1, keepdims=True) * inv_n
    v = jnp.maximum(ms - m * m, 0.0)                         # guard f32 cancellation
    return (y - m) * jax.lax.rsqrt(v + BN_EPS) * gamma + beta


def _taps_stacked(x, sel_ref, k, identity_tap=None):
    """Build the (k*C, N_out) stacked conv operand from x (C, N_in) via 0/1 matmuls."""
    taps = []
    for j in range(k):
        if j == identity_tap:
            taps.append(x)
        else:
            taps.append(jnp.dot(x, sel_ref[j], preferred_element_type=jnp.float32))
    return jnp.concatenate(taps, axis=0)


def _res_block(x, wstk_ref, w2_ref, sel1_ref, sel2_ref, vec_ref, *, skip_has_bias, final_act):
    """Fused Residual(Up)Block: [conv1|skip] stacked matmul, BN1, ReLU,
    conv2 (k=3,s=1,p=1) stacked matmul, BN2, + identity, final activation."""
    cout = vec_ref.shape[0]
    k1 = sel1_ref.shape[0]
    vec = vec_ref[...]
    b1, g1, be1 = vec[:, 0:1], vec[:, 1:2], vec[:, 2:3]
    b2, g2, be2 = vec[:, 3:4], vec[:, 4:5], vec[:, 5:6]

    # conv1 (+ skip) as one (2*cout, k1*cin) MXU contraction over the stacked taps.
    p1 = _taps_stacked(x, sel1_ref, k1)
    ystk = jnp.dot(wstk_ref[...], p1, preferred_element_type=jnp.float32)   # (2*cout, N)
    y1 = ystk[:cout, :] + b1
    ident = ystk[cout:, :]
    if skip_has_bias:
        ident = ident + vec[:, 6:7]
    h = jnp.maximum(_bn_train(y1, g1, be1), 0.0)

    # conv2: left/right taps via 0/1 shift matrices (boundary zeros built in), one dot.
    p2 = _taps_stacked(h, sel2_ref, 3, identity_tap=1)
    y2 = jnp.dot(w2_ref[...], p2, preferred_element_type=jnp.float32) + b2
    out = _bn_train(y2, g2, be2) + ident
    if final_act == 'relu':
        return jnp.maximum(out, 0.0)
    return jax.nn.sigmoid(out)


# ----------------------------------------------------------------------------
# The single fused forward kernel
# ----------------------------------------------------------------------------
def _fused_vae_kernel(*refs, n_enc, dec_acts):
    stats_ref, recon_ref = refs[-2], refs[-1]
    it = iter(refs[:-2])

    x = next(it)[...]                          # (Cin0, B*L0) input slab
    noise = next(it)[...]                      # (latent, B) reparameterization noise
    latent = noise.shape[0]

    # ---- encoder residual blocks ----
    for _ in range(n_enc):
        wstk, w2, s1, s2, vec = next(it), next(it), next(it), next(it), next(it)
        x = _res_block(x, wstk, w2, s1, s2, vec, skip_has_bias=True, final_act='relu')

    # ---- Flatten -> enc_fc -> ReLU -> fc_mu/fc_logvar -> reparameterize -> dec_fc ----
    flat_sel = next(it)                        # (L_last, B*L_last, B)
    wenc, benc = next(it), next(it)            # (F1, L_last*C_last) (flatten folded in), (F1, 1)
    wmulv, bmulv = next(it), next(it)          # (2*latent, F1), (2*latent, 1)  [mu; logvar]
    wdec, bdec = next(it), next(it)            # (L0*up0, latent) row-permuted, (L0*up0, 1)
    unflat_sel = next(it)                      # (L0, B, B*L0)

    l_last = flat_sel.shape[0]
    # Flatten folded into matmuls: xcat[l*C + c, b] = x[c, b*L_last + l]
    xcat = jnp.concatenate(
        [jnp.dot(x, flat_sel[l], preferred_element_type=jnp.float32) for l in range(l_last)],
        axis=0)
    h = jnp.maximum(
        jnp.dot(wenc[...], xcat, preferred_element_type=jnp.float32) + benc[...], 0.0)
    mulv = jnp.dot(wmulv[...], h, preferred_element_type=jnp.float32) + bmulv[...]
    mu, lv = mulv[:latent, :], mulv[latent:, :]
    z = mu + noise * jnp.exp(0.5 * lv)
    stats_ref[...] = jnp.concatenate([mulv, z], axis=0)      # packed [mu; logvar; z]

    d = jnp.dot(wdec[...], z, preferred_element_type=jnp.float32) + bdec[...]   # (L0*up0, B)
    l0 = unflat_sel.shape[0]
    up0 = d.shape[0] // l0
    # Unflatten folded into matmuls: slab[c, b*L0 + l] = d_perm[l*up0 + c, b]
    x = jnp.dot(d[0:up0, :], unflat_sel[0], preferred_element_type=jnp.float32)
    for l in range(1, l0):
        x = x + jnp.dot(d[l * up0:(l + 1) * up0, :], unflat_sel[l],
                        preferred_element_type=jnp.float32)

    # ---- decoder residual up-blocks (+ the Sequential's trailing ReLU / Sigmoid) ----
    for act in dec_acts:
        wstk, w2, s1, s2, vec = next(it), next(it), next(it), next(it), next(it)
        x = _res_block(x, wstk, w2, s1, s2, vec, skip_has_bias=False, final_act=act)

    recon_ref[...] = x


# ----------------------------------------------------------------------------
# One-time parameter / geometry preparation (hoisted out of the forward)
# ----------------------------------------------------------------------------
def prepare_params(params, cfg, batch):
    ops = []
    # encoder blocks: wstk, w2, sel1, sel2, vec
    for p, (cin, cout, lin, lout) in zip(params['enc_blocks'], cfg['enc_specs']):
        w1 = _conv_w_kouter(p['conv1_w'])                                  # (cout, 3*cin)
        wsk = jnp.zeros((cout, 3 * cin), jnp.float32).at[:, cin:2 * cin].set(
            p['skip_w'].reshape(cout, cin))                                # skip -> k=1 tap cols
        wstk = jnp.concatenate([w1, wsk], axis=0)                          # (2*cout, 3*cin)
        w2 = _conv_w_kouter(p['conv2_w'])                                  # (cout, 3*cout)
        vec = jnp.stack([p['conv1_b'], p['bn1_g'], p['bn1_b'],
                         p['conv2_b'], p['bn2_g'], p['bn2_b'],
                         p['skip_b'], jnp.zeros_like(p['skip_b'])], axis=1)
        sel1 = _sel_conv(batch, lin, lout, 3, 2, 1)
        sel2 = _sel_conv(batch, lout, lout, 3, 1, 1)
        ops += [wstk, w2, sel1, sel2, vec]

    # FC chain
    c_last, l_last = cfg['c_last'], cfg['l_last']
    f1 = params['enc_fc_w'].shape[0]
    wenc = (params['enc_fc_w'].reshape(f1, c_last, l_last)
            .transpose(0, 2, 1).reshape(f1, l_last * c_last))              # flatten folded in
    wmulv = jnp.concatenate([params['fc_mu_w'], params['fc_logvar_w']], axis=0)
    bmulv = jnp.concatenate([params['fc_mu_b'], params['fc_logvar_b']], axis=0)[:, None]
    up0, l0 = cfg['up0'], cfg['dec_dim0']
    perm = np.arange(up0 * l0).reshape(up0, l0).transpose(1, 0).reshape(-1)
    wdec = params['dec_fc_w'][perm, :]                                     # unflatten folded in
    bdec = params['dec_fc_b'][perm][:, None]
    ops += [_flatten_sel(batch, l_last), wenc, params['enc_fc_b'][:, None],
            wmulv, bmulv, wdec, bdec, _unflatten_sel(batch, l0)]

    # decoder blocks: wstk, w2, sel1, sel2, vec
    for p, (cin, cout, k, lin, lout, _act) in zip(params['dec_blocks'], cfg['dec_specs']):
        wstk = jnp.concatenate([_deconv_w_kouter(p['deconv1_w']),
                                _deconv_w_kouter(p['skip_w'])], axis=0)    # (2*cout, k*cin)
        w2 = _conv_w_kouter(p['deconv2_w'])                                # (cout, 3*cout)
        z = jnp.zeros_like(p['deconv1_b'])
        vec = jnp.stack([p['deconv1_b'], p['bn1_g'], p['bn1_b'],
                         p['deconv2_b'], p['bn2_g'], p['bn2_b'], z, z], axis=1)
        sel1 = _sel_deconv(batch, lin, lout, k, 2, 1)
        sel2 = _sel_conv(batch, lout, lout, 3, 1, 1)
        ops += [wstk, w2, sel1, sel2, vec]
    return tuple(ops)


# ----------------------------------------------------------------------------
# Model construction (deterministic synthetic parameters) and forward
# ----------------------------------------------------------------------------
def build_resvae2(key, input_dim, latent_dim, in_channels,
                  down_channels, up_channels, output_channels):
    keys = iter(jax.random.split(key, 256))

    def w_init(shape, scale=0.1):
        return scale * jax.random.normal(next(keys), shape, jnp.float32)

    def b_init(shape):
        return 0.05 * jax.random.normal(next(keys), shape, jnp.float32)

    def g_init(shape):
        return 1.0 + 0.05 * jax.random.normal(next(keys), shape, jnp.float32)

    enc_blocks, enc_specs = [], []
    cur, dim = in_channels, input_dim
    out_decoder_dims = []
    for out_ch in down_channels:
        lin = dim
        dim = dim // 2 if dim % 2 == 0 else dim // 2 + 1
        out_decoder_dims.insert(0, dim)
        enc_blocks.append(dict(
            conv1_w=w_init((out_ch, cur, 3)), conv1_b=b_init((out_ch,)),
            bn1_g=g_init((out_ch,)), bn1_b=b_init((out_ch,)),
            conv2_w=w_init((out_ch, out_ch, 3)), conv2_b=b_init((out_ch,)),
            bn2_g=g_init((out_ch,)), bn2_b=b_init((out_ch,)),
            skip_w=w_init((out_ch, cur, 1)), skip_b=b_init((out_ch,)),
        ))
        enc_specs.append((cur, out_ch, lin, dim))
        cur = out_ch

    flattened = down_channels[-1] * dim
    params = dict(
        enc_blocks=enc_blocks,
        enc_fc_w=w_init((flattened // 2, flattened)), enc_fc_b=b_init((flattened // 2,)),
        fc_mu_w=w_init((latent_dim, flattened // 2)), fc_mu_b=b_init((latent_dim,)),
        fc_logvar_w=w_init((latent_dim, flattened // 2)), fc_logvar_b=b_init((latent_dim,)),
        dec_fc_w=w_init((up_channels[0] * dim, latent_dim)),
        dec_fc_b=b_init((up_channels[0] * dim,)),
    )

    dec_blocks, dec_specs = [], []
    cur, d = up_channels[0], dim
    plan = list(zip(out_decoder_dims[1:], up_channels[1:])) + [(input_dim, output_channels)]
    for i, (out_dim, out_ch) in enumerate(plan):
        k = calculate_kernel_size(d, out_dim, 2, 1, 1, 0)
        act = 'relu' if i < len(plan) - 1 else 'sigmoid'
        dec_blocks.append(dict(
            deconv1_w=w_init((cur, out_ch, k)), deconv1_b=b_init((out_ch,)),
            bn1_g=g_init((out_ch,)), bn1_b=b_init((out_ch,)),
            deconv2_w=w_init((out_ch, out_ch, 3)), deconv2_b=b_init((out_ch,)),
            bn2_g=g_init((out_ch,)), bn2_b=b_init((out_ch,)),
            skip_w=w_init((cur, out_ch, k)),
        ))
        dec_specs.append((cur, out_ch, k, d, out_dim, act))
        cur, d = out_ch, out_dim
    params['dec_blocks'] = dec_blocks

    cfg = dict(enc_specs=enc_specs, dec_specs=dec_specs, latent=latent_dim,
               up0=up_channels[0], dec_dim0=dim, c_last=down_channels[-1], l_last=dim,
               in_channels=in_channels, input_dim=input_dim)
    return params, cfg


def make_forward(cfg, batch):
    n_enc = len(cfg['enc_specs'])
    dec_acts = tuple(spec[5] for spec in cfg['dec_specs'])
    latent = cfg['latent']
    cin0, l_in = cfg['in_channels'], cfg['input_dim']
    cout_last, l_out = cfg['dec_specs'][-1][1], cfg['dec_specs'][-1][4]

    kernel = functools.partial(_fused_vae_kernel, n_enc=n_enc, dec_acts=dec_acts)
    call = pl.pallas_call(
        kernel,
        out_shape=(jax.ShapeDtypeStruct((3 * latent, batch), jnp.float32),
                   jax.ShapeDtypeStruct((cout_last, batch * l_out), jnp.float32)),
        compiler_params=pltpu.CompilerParams(vmem_limit_bytes=32 * 1024 * 1024),
    )

    def fwd(prep, y, eps_noise):
        x = y.astype(jnp.float32)                                       # strat == 'y'
        x_slab = jnp.transpose(x, (1, 0, 2)).reshape(cin0, batch * l_in)
        noise = jnp.transpose(eps_noise.astype(jnp.float32), (1, 0))    # (latent, B)
        stats, recon_slab = call(x_slab, noise, *prep)
        stats = jnp.transpose(stats, (1, 0))                            # (B, 3*latent)
        mu = stats[:, :latent]
        logvar = stats[:, latent:2 * latent]
        z = stats[:, 2 * latent:]
        recon = jnp.transpose(recon_slab.reshape(cout_last, batch, l_out), (1, 0, 2))
        return {'recon': recon, 'mu': mu, 'logvar': logvar, 'z': z}

    return jax.jit(fwd)


# ----------------------------------------------------------------------------
if __name__ == "__main__":
    # Small, forward-consistent shapes: (B=2, in_channels=1, input_dim=16)
    input_dim, latent_dim = 16, 8
    in_channels, output_channels = 1, 1
    down_channels, up_channels = [8, 16, 32], [32, 16, 8]
    batch = 2

    root = jax.random.PRNGKey(0)
    pkey, xkey, ekey = jax.random.split(root, 3)

    params, cfg = build_resvae2(pkey, input_dim, latent_dim, in_channels,
                                down_channels, up_channels, output_channels)
    prep = prepare_params(params, cfg, batch)   # one-time weight/geometry prep
    forward = make_forward(cfg, batch)

    y = jax.random.uniform(xkey, (batch, in_channels, input_dim), jnp.float32)
    eps_noise = jax.random.normal(ekey, (batch, latent_dim), jnp.float32)

    out = jax.block_until_ready(forward(prep, y, eps_noise))

    assert out['recon'].shape == (batch, output_channels, input_dim)
    assert out['mu'].shape == (batch, latent_dim)
    assert out['logvar'].shape == (batch, latent_dim)
    assert out['z'].shape == (batch, latent_dim)
    print("KERNEL_OK")
</pallas_src>

<mosaic_0001>
module attributes {stable_mosaic.version = 11 : i64} {
  func.func @_fused_vae_kernel(%arg0: memref<1x32xf32, #tpu.memory_space<vmem>>, %arg1: memref<8x2xf32, #tpu.memory_space<vmem>>, %arg2: memref<16x3xf32, #tpu.memory_space<vmem>>, %arg3: memref<8x24xf32, #tpu.memory_space<vmem>>, %arg4: memref<3x32x16xf32, #tpu.memory_space<vmem>>, %arg5: memref<3x16x16xf32, #tpu.memory_space<vmem>>, %arg6: memref<8x8xf32, #tpu.memory_space<vmem>>, %arg7: memref<32x24xf32, #tpu.memory_space<vmem>>, %arg8: memref<16x48xf32, #tpu.memory_space<vmem>>, %arg9: memref<3x16x8xf32, #tpu.memory_space<vmem>>, %arg10: memref<3x8x8xf32, #tpu.memory_space<vmem>>, %arg11: memref<16x8xf32, #tpu.memory_space<vmem>>, %arg12: memref<64x48xf32, #tpu.memory_space<vmem>>, %arg13: memref<32x96xf32, #tpu.memory_space<vmem>>, %arg14: memref<3x8x4xf32, #tpu.memory_space<vmem>>, %arg15: memref<3x4x4xf32, #tpu.memory_space<vmem>>, %arg16: memref<32x8xf32, #tpu.memory_space<vmem>>, %arg17: memref<2x4x2xf32, #tpu.memory_space<vmem>>, %arg18: memref<32x64xf32, #tpu.memory_space<vmem>>, %arg19: memref<32x1xf32, #tpu.memory_space<vmem>>, %arg20: memref<16x32xf32, #tpu.memory_space<vmem>>, %arg21: memref<16x1xf32, #tpu.memory_space<vmem>>, %arg22: memref<64x8xf32, #tpu.memory_space<vmem>>, %arg23: memref<64x1xf32, #tpu.memory_space<vmem>>, %arg24: memref<2x2x4xf32, #tpu.memory_space<vmem>>, %arg25: memref<32x128xf32, #tpu.memory_space<vmem>>, %arg26: memref<16x48xf32, #tpu.memory_space<vmem>>, %arg27: memref<4x4x8xf32, #tpu.memory_space<vmem>>, %arg28: memref<3x8x8xf32, #tpu.memory_space<vmem>>, %arg29: memref<16x8xf32, #tpu.memory_space<vmem>>, %arg30: memref<16x64xf32, #tpu.memory_space<vmem>>, %arg31: memref<8x24xf32, #tpu.memory_space<vmem>>, %arg32: memref<4x8x16xf32, #tpu.memory_space<vmem>>, %arg33: memref<3x16x16xf32, #tpu.memory_space<vmem>>, %arg34: memref<8x8xf32, #tpu.memory_space<vmem>>, %arg35: memref<2x32xf32, #tpu.memory_space<vmem>>, %arg36: memref<1x3xf32, #tpu.memory_space<vmem>>, %arg37: memref<4x16x32xf32, #tpu.memory_space<vmem>>, %arg38: memref<3x32x32xf32, #tpu.memory_space<vmem>>, %arg39: memref<1x8xf32, #tpu.memory_space<vmem>>, %arg40: memref<24x2xf32, #tpu.memory_space<vmem>>, %arg41: memref<1x32xf32, #tpu.memory_space<vmem>>) attributes {dimension_semantics = [], scalar_prefetch = 0 : i64, scratch_operands = 0 : i64, tpu.core_type = #tpu.core_type<tc>} {
    %c0 = arith.constant 0 : index
    %c0_0 = arith.constant 0 : index
    %0 = vector.load %arg0[%c0, %c0_0] : memref<1x32xf32, #tpu.memory_space<vmem>>, vector<1x32xf32>
    %c0_1 = arith.constant 0 : index
    %c0_2 = arith.constant 0 : index
    %1 = vector.load %arg1[%c0_1, %c0_2] : memref<8x2xf32, #tpu.memory_space<vmem>>, vector<8x2xf32>
    %c0_3 = arith.constant 0 : index
    %c0_4 = arith.constant 0 : index
    %2 = vector.load %arg6[%c0_3, %c0_4] : memref<8x8xf32, #tpu.memory_space<vmem>>, vector<8x8xf32>
    %3 = vector.extract_strided_slice %2 {offsets = [0, 0], sizes = [8, 1], strides = [1, 1]} : vector<8x8xf32> to vector<8x1xf32>
    %4 = vector.extract_strided_slice %2 {offsets = [0, 1], sizes = [8, 1], strides = [1, 1]} : vector<8x8xf32> to vector<8x1xf32>
    %5 = vector.extract_strided_slice %2 {offsets = [0, 2], sizes = [8, 1], strides = [1, 1]} : vector<8x8xf32> to vector<8x1xf32>
    %6 = vector.extract_strided_slice %2 {offsets = [0, 3], sizes = [8, 1], strides = [1, 1]} : vector<8x8xf32> to vector<8x1xf32>
    %7 = vector.extract_strided_slice %2 {offsets = [0, 4], sizes = [8, 1], strides = [1, 1]} : vector<8x8xf32> to vector<8x1xf32>
    %8 = vector.extract_strided_slice %2 {offsets = [0, 5], sizes = [8, 1], strides = [1, 1]} : vector<8x8xf32> to vector<8x1xf32>
    %c0_5 = arith.constant 0 : index
    %c0_6 = arith.constant 0 : index
    %c0_7 = arith.constant 0 : index
    %9 = vector.load %arg4[%c0_5, %c0_6, %c0_7] : memref<3x32x16xf32, #tpu.memory_space<vmem>>, vector<1x32x16xf32>
    %10 = vector.shape_cast %9 : vector<1x32x16xf32> to vector<32x16xf32>
    %cst = arith.constant dense<0.000000e+00> : vector<1x16xf32>
    %11 = tpu.matmul %0, %10, %cst {dimension_numbers = #tpu.dot_dimension_numbers<[1], [0], [0], [1], [0, 0, 1, 1], [], []>} : vector<1x32xf32>, vector<32x16xf32>, vector<1x16xf32> -> vector<1x16xf32>
    %c1 = arith.constant 1 : index
    %c0_8 = arith.constant 0 : index
    %c0_9 = arith.constant 0 : index
    %12 = vector.load %arg4[%c1, %c0_8, %c0_9] : memref<3x32x16xf32, #tpu.memory_space<vmem>>, vector<1x32x16xf32>
    %13 = vector.shape_cast %12 : vector<1x32x16xf32> to vector<32x16xf32>
    %cst_10 = arith.constant dense<0.000000e+00> : vector<1x16xf32>
    %14 = tpu.matmul %0, %13, %cst_10 {dimension_numbers = #tpu.dot_dimension_numbers<[1], [0], [0], [1], [0, 0, 1, 1], [], []>} : vector<1x32xf32>, vector<32x16xf32>, vector<1x16xf32> -> vector<1x16xf32>
    %c2 = arith.constant 2 : index
    %c0_11 = arith.constant 0 : index
    %c0_12 = arith.constant 0 : index
    %15 = vector.load %arg4[%c2, %c0_11, %c0_12] : memref<3x32x16xf32, #tpu.memory_space<vmem>>, vector<1x32x16xf32>
    %16 = vector.shape_cast %15 : vector<1x32x16xf32> to vector<32x16xf32>
    %cst_13 = arith.constant dense<0.000000e+00> : vector<1x16xf32>
    %17 = tpu.matmul %0, %16, %cst_13 {dimension_numbers = #tpu.dot_dimension_numbers<[1], [0], [0], [1], [0, 0, 1, 1], [], []>} : vector<1x32xf32>, vector<32x16xf32>, vector<1x16xf32> -> vector<1x16xf32>
    %18 = tpu.concatenate %11, %14, %17 in 0 : vector<1x16xf32>, vector<1x16xf32>, vector<1x16xf32> -> vector<3x16xf32>
    %c0_14 = arith.constant 0 : index
    %c0_15 = arith.constant 0 : index
    %19 = vector.load %arg2[%c0_14, %c0_15] : memref<16x3xf32, #tpu.memory_space<vmem>>, vector<16x3xf32>
    %cst_16 = arith.constant dense<0.000000e+00> : vector<16x16xf32>
    %20 = tpu.matmul %19, %18, %cst_16 {dimension_numbers = #tpu.dot_dimension_numbers<[1], [0], [0], [1], [0, 0, 1, 1], [], []>} : vector<16x3xf32>, vector<3x16xf32>, vector<16x16xf32> -> vector<16x16xf32>
    %21 = vector.extract_strided_slice %20 {offsets = [0, 0], sizes = [8, 16], strides = [1, 1]} : vector<16x16xf32> to vector<8x16xf32>
    %22 = vector.broadcast %3 : vector<8x1xf32> to vector<8x16xf32>
    %23 = arith.addf %21, %22 : vector<8x16xf32>
    %24 = vector.extract_strided_slice %20 {offsets = [8, 0], sizes = [8, 16], strides = [1, 1]} : vector<16x16xf32> to vector<8x16xf32>
    %25 = vector.extract_strided_slice %2 {offsets = [0, 6], sizes = [8, 1], strides = [1, 1]} : vector<8x8xf32> to vector<8x1xf32>
    %26 = vector.broadcast %25 : vector<8x1xf32> to vector<8x16xf32>
    %27 = arith.addf %24, %26 : vector<8x16xf32>
    %cst_17 = arith.constant dense<0.000000e+00> : vector<8xf32>
    %28 = vector.multi_reduction <add>, %23, %cst_17 [1] : vector<8x16xf32> to vector<8xf32>
    %29 = vector.shape_cast %28 : vector<8xf32> to vector<8x1xf32>
    %cst_18 = arith.constant 6.250000e-02 : f32
    %30 = vector.broadcast %cst_18 : f32 to vector<8x1xf32>
    %31 = arith.mulf %29, %30 : vector<8x1xf32>
    %32 = arith.mulf %23, %23 : vector<8x16xf32>
    %cst_19 = arith.constant dense<0.000000e+00> : vector<8xf32>
    %33 = vector.multi_reduction <add>, %32, %cst_19 [1] : vector<8x16xf32> to vector<8xf32>
    %34 = vector.shape_cast %33 : vector<8xf32> to vector<8x1xf32>
    %cst_20 = arith.constant 6.250000e-02 : f32
    %35 = vector.broadcast %cst_20 : f32 to vector<8x1xf32>
    %36 = arith.mulf %34, %35 : vector<8x1xf32>
    %37 = arith.mulf %31, %31 : vector<8x1xf32>
    %38 = arith.subf %36, %37 : vector<8x1xf32>
    %cst_21 = arith.constant 0.000000e+00 : f32
    %39 = vector.broadcast %cst_21 : f32 to vector<8x1xf32>
    %40 = arith.maximumf %38, %39 : vector<8x1xf32>
    %41 = vector.broadcast %31 : vector<8x1xf32> to vector<8x16xf32>
    %42 = arith.subf %23, %41 : vector<8x16xf32>
    %cst_22 = arith.constant 9.99999974E-6 : f32
    %43 = vector.broadcast %cst_22 : f32 to vector<8x1xf32>
    %44 = arith.addf %40, %43 : vector<8x1xf32>
    %45 = math.rsqrt %44 : vector<8x1xf32>
    %46 = vector.broadcast %45 : vector<8x1xf32> to vector<8x16xf32>
    %47 = arith.mulf %42, %46 : vector<8x16xf32>
    %48 = vector.broadcast %4 : vector<8x1xf32> to vector<8x16xf32>
    %49 = arith.mulf %47, %48 : vector<8x16xf32>
    %50 = vector.broadcast %5 : vector<8x1xf32> to vector<8x16xf32>
    %51 = arith.addf %49, %50 : vector<8x16xf32>
    %cst_23 = arith.constant 0.000000e+00 : f32
    %52 = vector.broadcast %cst_23 : f32 to vector<8x16xf32>
    %53 = arith.maximumf %51, %52 : vector<8x16xf32>
    %c0_24 = arith.constant 0 : index
    %c0_25 = arith.constant 0 : index
    %c0_26 = arith.constant 0 : index
    %54 = vector.load %arg5[%c0_24, %c0_25, %c0_26] : memref<3x16x16xf32, #tpu.memory_space<vmem>>, vector<1x16x16xf32>
    %55 = vector.shape_cast %54 : vector<1x16x16xf32> to vector<16x16xf32>
    %cst_27 = arith.constant dense<0.000000e+00> : vector<8x16xf32>
    %56 = tpu.matmul %53, %55, %cst_27 {dimension_numbers = #tpu.dot_dimension_numbers<[1], [0], [0], [1], [0, 0, 1, 1], [], []>} : vector<8x16xf32>, vector<16x16xf32>, vector<8x16xf32> -> vector<8x16xf32>
    %c2_28 = arith.constant 2 : index
    %c0_29 = arith.constant 0 : index
    %c0_30 = arith.constant 0 : index
    %57 = vector.load %arg5[%c2_28, %c0_29, %c0_30] : memref<3x16x16xf32, #tpu.memory_space<vmem>>, vector<1x16x16xf32>
    %58 = vector.shape_cast %57 : vector<1x16x16xf32> to vector<16x16xf32>
    %cst_31 = arith.constant dense<0.000000e+00> : vector<8x16xf32>
    %59 = tpu.matmul %53, %58, %cst_31 {dimension_numbers = #tpu.dot_dimension_numbers<[1], [0], [0], [1], [0, 0, 1, 1], [], []>} : vector<8x16xf32>, vector<16x16xf32>, vector<8x16xf32> -> vector<8x16xf32>
    %60 = tpu.concatenate %56, %53, %59 in 0 : vector<8x16xf32>, vector<8x16xf32>, vector<8x16xf32> -> vector<24x16xf32>
    %c0_32 = arith.constant 0 : index
    %c0_33 = arith.constant 0 : index
    %61 = vector.load %arg3[%c0_32, %c0_33] : memref<8x24xf32, #tpu.memory_space<vmem>>, vector<8x24xf32>
    %cst_34 = arith.constant dense<0.000000e+00> : vector<8x16xf32>
    %62 = tpu.matmul %61, %60, %cst_34 {dimension_numbers = #tpu.dot_dimension_numbers<[1], [0], [0], [1], [0, 0, 1, 1], [], []>} : vector<8x24xf32>, vector<24x16xf32>, vector<8x16xf32> -> vector<8x16xf32>
    %63 = vector.broadcast %6 : vector<8x1xf32> to vector<8x16xf32>
    %64 = arith.addf %62, %63 : vector<8x16xf32>
    %cst_35 = arith.constant dense<0.000000e+00> : vector<8xf32>
    %65 = vector.multi_reduction <add>, %64, %cst_35 [1] : vector<8x16xf32> to vector<8xf32>
    %66 = vector.shape_cast %65 : vector<8xf32> to vector<8x1xf32>
    %cst_36 = arith.constant 6.250000e-02 : f32
    %67 = vector.broadcast %cst_36 : f32 to vector<8x1xf32>
    %68 = arith.mulf %66, %67 : vector<8x1xf32>
    %69 = arith.mulf %64, %64 : vector<8x16xf32>
    %cst_37 = arith.constant dense<0.000000e+00> : vector<8xf32>
    %70 = vector.multi_reduction <add>, %69, %cst_37 [1] : vector<8x16xf32> to vector<8xf32>
    %71 = vector.shape_cast %70 : vector<8xf32> to vector<8x1xf32>
    %cst_38 = arith.constant 6.250000e-02 : f32
    %72 = vector.broadcast %cst_38 : f32 to vector<8x1xf32>
    %73 = arith.mulf %71, %72 : vector<8x1xf32>
    %74 = arith.mulf %68, %68 : vector<8x1xf32>
    %75 = arith.subf %73, %74 : vector<8x1xf32>
    %cst_39 = arith.constant 0.000000e+00 : f32
    %76 = vector.broadcast %cst_39 : f32 to vector<8x1xf32>
    %77 = arith.maximumf %75, %76 : vector<8x1xf32>
    %78 = vector.broadcast %68 : vector<8x1xf32> to vector<8x16xf32>
    %79 = arith.subf %64, %78 : vector<8x16xf32>
    %cst_40 = arith.constant 9.99999974E-6 : f32
    %80 = vector.broadcast %cst_40 : f32 to vector<8x1xf32>
    %81 = arith.addf %77, %80 : vector<8x1xf32>
    %82 = math.rsqrt %81 : vector<8x1xf32>
    %83 = vector.broadcast %82 : vector<8x1xf32> to vector<8x16xf32>
    %84 = arith.mulf %79, %83 : vector<8x16xf32>
    %85 = vector.broadcast %7 : vector<8x1xf32> to vector<8x16xf32>
    %86 = arith.mulf %84, %85 : vector<8x16xf32>
    %87 = vector.broadcast %8 : vector<8x1xf32> to vector<8x16xf32>
    %88 = arith.addf %86, %87 : vector<8x16xf32>
    %89 = arith.addf %88, %27 : vector<8x16xf32>
    %cst_41 = arith.constant 0.000000e+00 : f32
    %90 = vector.broadcast %cst_41 : f32 to vector<8x16xf32>
    %91 = arith.maximumf %89, %90 : vector<8x16xf32>
    %c0_42 = arith.constant 0 : index
    %c0_43 = arith.constant 0 : index
    %92 = vector.load %arg11[%c0_42, %c0_43] : memref<16x8xf32, #tpu.memory_space<vmem>>, vector<16x8xf32>
    %93 = vector.extract_strided_slice %92 {offsets = [0, 0], sizes = [16, 1], strides = [1, 1]} : vector<16x8xf32> to vector<16x1xf32>
    %94 = vector.extract_strided_slice %92 {offsets = [0, 1], sizes = [16, 1], strides = [1, 1]} : vector<16x8xf32> to vector<16x1xf32>
    %95 = vector.extract_strided_slice %92 {offsets = [0, 2], sizes = [16, 1], strides = [1, 1]} : vector<16x8xf32> to vector<16x1xf32>
    %96 = vector.extract_strided_slice %92 {offsets = [0, 3], sizes = [16, 1], strides = [1, 1]} : vector<16x8xf32> to vector<16x1xf32>
    %97 = vector.extract_strided_slice %92 {offsets = [0, 4], sizes = [16, 1], strides = [1, 1]} : vector<16x8xf32> to vector<16x1xf32>
    %98 = vector.extract_strided_slice %92 {offsets = [0, 5], sizes = [16, 1], strides = [1, 1]} : vector<16x8xf32> to vector<16x1xf32>
    %c0_44 = arith.constant 0 : index
    %c0_45 = arith.constant 0 : index
    %c0_46 = arith.constant 0 : index
    %99 = vector.load %arg9[%c0_44, %c0_45, %c0_46] : memref<3x16x8xf32, #tpu.memory_space<vmem>>, vector<1x16x8xf32>
    %100 = vector.shape_cast %99 : vector<1x16x8xf32> to vector<16x8xf32>
    %cst_47 = arith.constant dense<0.000000e+00> : vector<8x8xf32>
    %101 = tpu.matmul %91, %100, %cst_47 {dimension_numbers = #tpu.dot_dimension_numbers<[1], [0], [0], [1], [0, 0, 1, 1], [], []>} : vector<8x16xf32>, vector<16x8xf32>, vector<8x8xf32> -> vector<8x8xf32>
    %c1_48 = arith.constant 1 : index
    %c0_49 = arith.constant 0 : index
    %c0_50 = arith.constant 0 : index
    %102 = vector.load %arg9[%c1_48, %c0_49, %c0_50] : memref<3x16x8xf32, #tpu.memory_space<vmem>>, vector<1x16x8xf32>
    %103 = vector.shape_cast %102 : vector<1x16x8xf32> to vector<16x8xf32>
    %cst_51 = arith.constant dense<0.000000e+00> : vector<8x8xf32>
    %104 = tpu.matmul %91, %103, %cst_51 {dimension_numbers = #tpu.dot_dimension_numbers<[1], [0], [0], [1], [0, 0, 1, 1], [], []>} : vector<8x16xf32>, vector<16x8xf32>, vector<8x8xf32> -> vector<8x8xf32>
    %c2_52 = arith.constant 2 : index
    %c0_53 = arith.constant 0 : index
    %c0_54 = arith.constant 0 : index
    %105 = vector.load %arg9[%c2_52, %c0_53, %c0_54] : memref<3x16x8xf32, #tpu.memory_space<vmem>>, vector<1x16x8xf32>
    %106 = vector.shape_cast %105 : vector<1x16x8xf32> to vector<16x8xf32>
    %cst_55 = arith.constant dense<0.000000e+00> : vector<8x8xf32>
    %107 = tpu.matmul %91, %106, %cst_55 {dimension_numbers = #tpu.dot_dimension_numbers<[1], [0], [0], [1], [0, 0, 1, 1], [], []>} : vector<8x16xf32>, vector<16x8xf32>, vector<8x8xf32> -> vector<8x8xf32>
    %108 = tpu.concatenate %101, %104, %107 in 0 : vector<8x8xf32>, vector<8x8xf32>, vector<8x8xf32> -> vector<24x8xf32>
    %c0_56 = arith.constant 0 : index
    %c0_57 = arith.constant 0 : index
    %109 = vector.load %arg7[%c0_56, %c0_57] : memref<32x24xf32, #tpu.memory_space<vmem>>, vector<32x24xf32>
    %cst_58 = arith.constant dense<0.000000e+00> : vector<32x8xf32>
    %110 = tpu.matmul %109, %108, %cst_58 {dimension_numbers = #tpu.dot_dimension_numbers<[1], [0], [0], [1], [0, 0, 1, 1], [], []>} : vector<32x24xf32>, vector<24x8xf32>, vector<32x8xf32> -> vector<32x8xf32>
    %111 = vector.extract_strided_slice %110 {offsets = [0, 0], sizes = [16, 8], strides = [1, 1]} : vector<32x8xf32> to vector<16x8xf32>
    %112 = vector.broadcast %93 : vector<16x1xf32> to vector<16x8xf32>
    %113 = arith.addf %111, %112 : vector<16x8xf32>
    %114 = vector.extract_strided_slice %110 {offsets = [16, 0], sizes = [16, 8], strides = [1, 1]} : vector<32x8xf32> to vector<16x8xf32>
    %115 = vector.extract_strided_slice %92 {offsets = [0, 6], sizes = [16, 1], strides = [1, 1]} : vector<16x8xf32> to vector<16x1xf32>
    %116 = vector.broadcast %115 : vector<16x1xf32> to vector<16x8xf32>
    %117 = arith.addf %114, %116 : vector<16x8xf32>
    %cst_59 = arith.constant dense<0.000000e+00> : vector<16xf32>
    %118 = vector.multi_reduction <add>, %113, %cst_59 [1] : vector<16x8xf32> to vector<16xf32>
    %119 = vector.shape_cast %118 : vector<16xf32> to vector<16x1xf32>
    %cst_60 = arith.constant 1.250000e-01 : f32
    %120 = vector.broadcast %cst_60 : f32 to vector<16x1xf32>
    %121 = arith.mulf %119, %120 : vector<16x1xf32>
    %122 = arith.mulf %113, %113 : vector<16x8xf32>
    %cst_61 = arith.constant dense<0.000000e+00> : vector<16xf32>
    %123 = vector.multi_reduction <add>, %122, %cst_61 [1] : vector<16x8xf32> to vector<16xf32>
    %124 = vector.shape_cast %123 : vector<16xf32> to vector<16x1xf32>
    %cst_62 = arith.constant 1.250000e-01 : f32
    %125 = vector.broadcast %cst_62 : f32 to vector<16x1xf32>
    %126 = arith.mulf %124, %125 : vector<16x1xf32>
    %127 = arith.mulf %121, %121 : vector<16x1xf32>
    %128 = arith.subf %126, %127 : vector<16x1xf32>
    %cst_63 = arith.constant 0.000000e+00 : f32
    %129 = vector.broadcast %cst_63 : f32 to vector<16x1xf32>
    %130 = arith.maximumf %128, %129 : vector<16x1xf32>
    %131 = vector.broadcast %121 : vector<16x1xf32> to vector<16x8xf32>
    %132 = arith.subf %113, %131 : vector<16x8xf32>
    %cst_64 = arith.constant 9.99999974E-6 : f32
    %133 = vector.broadcast %cst_64 : f32 to vector<16x1xf32>
    %134 = arith.addf %130, %133 : vector<16x1xf32>
    %135 = math.rsqrt %134 : vector<16x1xf32>
    %136 = vector.broadcast %135 : vector<16x1xf32> to vector<16x8xf32>
    %137 = arith.mulf %132, %136 : vector<16x8xf32>
    %138 = vector.broadcast %94 : vector<16x1xf32> to vector<16x8xf32>
    %139 = arith.mulf %137, %138 : vector<16x8xf32>
    %140 = vector.broadcast %95 : vector<16x1xf32> to vector<16x8xf32>
    %141 = arith.addf %139, %140 : vector<16x8xf32>
    %cst_65 = arith.constant 0.000000e+00 : f32
    %142 = vector.broadcast %cst_65 : f32 to vector<16x8xf32>
    %143 = arith.maximumf %141, %142 : vector<16x8xf32>
    %c0_66 = arith.constant 0 : index
    %c0_67 = arith.constant 0 : index
    %c0_68 = arith.constant 0 : index
    %144 = vector.load %arg10[%c0_66, %c0_67, %c0_68] : memref<3x8x8xf32, #tpu.memory_space<vmem>>, vector<1x8x8xf32>
    %145 = vector.shape_cast %144 : vector<1x8x8xf32> to vector<8x8xf32>
    %cst_69 = arith.constant dense<0.000000e+00> : vector<16x8xf32>
    %146 = tpu.matmul %143, %145, %cst_69 {dimension_numbers = #tpu.dot_dimension_numbers<[1], [0], [0], [1], [0, 0, 1, 1], [], []>} : vector<16x8xf32>, vector<8x8xf32>, vector<16x8xf32> -> vector<16x8xf32>
    %c2_70 = arith.constant 2 : index
    %c0_71 = arith.constant 0 : index
    %c0_72 = arith.constant 0 : index
    %147 = vector.load %arg10[%c2_70, %c0_71, %c0_72] : memref<3x8x8xf32, #tpu.memory_space<vmem>>, vector<1x8x8xf32>
    %148 = vector.shape_cast %147 : vector<1x8x8xf32> to vector<8x8xf32>
    %cst_73 = arith.constant dense<0.000000e+00> : vector<16x8xf32>
    %149 = tpu.matmul %143, %148, %cst_73 {dimension_numbers = #tpu.dot_dimension_numbers<[1], [0], [0], [1], [0, 0, 1, 1], [], []>} : vector<16x8xf32>, vector<8x8xf32>, vector<16x8xf32> -> vector<16x8xf32>
    %150 = tpu.concatenate %146, %143, %149 in 0 : vector<16x8xf32>, vector<16x8xf32>, vector<16x8xf32> -> vector<48x8xf32>
    %c0_74 = arith.constant 0 : index
    %c0_75 = arith.constant 0 : index
    %151 = vector.load %arg8[%c0_74, %c0_75] : memref<16x48xf32, #tpu.memory_space<vmem>>, vector<16x48xf32>
    %cst_76 = arith.constant dense<0.000000e+00> : vector<16x8xf32>
    %152 = tpu.matmul %151, %150, %cst_76 {dimension_numbers = #tpu.dot_dimension_numbers<[1], [0], [0], [1], [0, 0, 1, 1], [], []>} : vector<16x48xf32>, vector<48x8xf32>, vector<16x8xf32> -> vector<16x8xf32>
    %153 = vector.broadcast %96 : vector<16x1xf32> to vector<16x8xf32>
    %154 = arith.addf %152, %153 : vector<16x8xf32>
    %cst_77 = arith.constant dense<0.000000e+00> : vector<16xf32>
    %155 = vector.multi_reduction <add>, %154, %cst_77 [1] : vector<16x8xf32> to vector<16xf32>
    %156 = vector.shape_cast %155 : vector<16xf32> to vector<16x1xf32>
    %cst_78 = arith.constant 1.250000e-01 : f32
    %157 = vector.broadcast %cst_78 : f32 to vector<16x1xf32>
    %158 = arith.mulf %156, %157 : vector<16x1xf32>
    %159 = arith.mulf %154, %154 : vector<16x8xf32>
    %cst_79 = arith.constant dense<0.000000e+00> : vector<16xf32>
    %160 = vector.multi_reduction <add>, %159, %cst_79 [1] : vector<16x8xf32> to vector<16xf32>
    %161 = vector.shape_cast %160 : vector<16xf32> to vector<16x1xf32>
    %cst_80 = arith.constant 1.250000e-01 : f32
    %162 = vector.broadcast %cst_80 : f32 to vector<16x1xf32>
    %163 = arith.mulf %161, %162 : vector<16x1xf32>
    %164 = arith.mulf %158, %158 : vector<16x1xf32>
    %165 = arith.subf %163, %164 : vector<16x1xf32>
    %cst_81 = arith.constant 0.000000e+00 : f32
    %166 = vector.broadcast %cst_81 : f32 to vector<16x1xf32>
    %167 = arith.maximumf %165, %166 : vector<16x1xf32>
    %168 = vector.broadcast %158 : vector<16x1xf32> to vector<16x8xf32>
    %169 = arith.subf %154, %168 : vector<16x8xf32>
    %cst_82 = arith.constant 9.99999974E-6 : f32
    %170 = vector.broadcast %cst_82 : f32 to vector<16x1xf32>
    %171 = arith.addf %167, %170 : vector<16x1xf32>
    %172 = math.rsqrt %171 : vector<16x1xf32>
    %173 = vector.broadcast %172 : vector<16x1xf32> to vector<16x8xf32>
    %174 = arith.mulf %169, %173 : vector<16x8xf32>
    %175 = vector.broadcast %97 : vector<16x1xf32> to vector<16x8xf32>
    %176 = arith.mulf %174, %175 : vector<16x8xf32>
    %177 = vector.broadcast %98 : vector<16x1xf32> to vector<16x8xf32>
    %178 = arith.addf %176, %177 : vector<16x8xf32>
    %179 = arith.addf %178, %117 : vector<16x8xf32>
    %cst_83 = arith.constant 0.000000e+00 : f32
    %180 = vector.broadcast %cst_83 : f32 to vector<16x8xf32>
    %181 = arith.maximumf %179, %180 : vector<16x8xf32>
    %c0_84 = arith.constant 0 : index
    %c0_85 = arith.constant 0 : index
    %182 = vector.load %arg16[%c0_84, %c0_85] : memref<32x8xf32, #tpu.memory_space<vmem>>, vector<32x8xf32>
    %183 = vector.extract_strided_slice %182 {offsets = [0, 0], sizes = [32, 1], strides = [1, 1]} : vector<32x8xf32> to vector<32x1xf32>
    %184 = vector.extract_strided_slice %182 {offsets = [0, 1], sizes = [32, 1], strides = [1, 1]} : vector<32x8xf32> to vector<32x1xf32>
    %185 = vector.extract_strided_slice %182 {offsets = [0, 2], sizes = [32, 1], strides = [1, 1]} : vector<32x8xf32> to vector<32x1xf32>
    %186 = vector.extract_strided_slice %182 {offsets = [0, 3], sizes = [32, 1], strides = [1, 1]} : vector<32x8xf32> to vector<32x1xf32>
    %187 = vector.extract_strided_slice %182 {offsets = [0, 4], sizes = [32, 1], strides = [1, 1]} : vector<32x8xf32> to vector<32x1xf32>
    %188 = vector.extract_strided_slice %182 {offsets = [0, 5], sizes = [32, 1], strides = [1, 1]} : vector<32x8xf32> to vector<32x1xf32>
    %c0_86 = arith.constant 0 : index
    %c0_87 = arith.constant 0 : index
    %c0_88 = arith.constant 0 : index
    %189 = vector.load %arg14[%c0_86, %c0_87, %c0_88] : memref<3x8x4xf32, #tpu.memory_space<vmem>>, vector<1x8x4xf32>
    %190 = vector.shape_cast %189 : vector<1x8x4xf32> to vector<8x4xf32>
    %cst_89 = arith.constant dense<0.000000e+00> : vector<16x4xf32>
    %191 = tpu.matmul %181, %190, %cst_89 {dimension_numbers = #tpu.dot_dimension_numbers<[1], [0], [0], [1], [0, 0, 1, 1], [], []>} : vector<16x8xf32>, vector<8x4xf32>, vector<16x4xf32> -> vector<16x4xf32>
    %c1_90 = arith.constant 1 : index
    %c0_91 = arith.constant 0 : index
    %c0_92 = arith.constant 0 : index
    %192 = vector.load %arg14[%c1_90, %c0_91, %c0_92] : memref<3x8x4xf32, #tpu.memory_space<vmem>>, vector<1x8x4xf32>
    %193 = vector.shape_cast %192 : vector<1x8x4xf32> to vector<8x4xf32>
    %cst_93 = arith.constant dense<0.000000e+00> : vector<16x4xf32>
    %194 = tpu.matmul %181, %193, %cst_93 {dimension_numbers = #tpu.dot_dimension_numbers<[1], [0], [0], [1], [0, 0, 1, 1], [], []>} : vector<16x8xf32>, vector<8x4xf32>, vector<16x4xf32> -> vector<16x4xf32>
    %c2_94 = arith.constant 2 : index
    %c0_95 = arith.constant 0 : index
    %c0_96 = arith.constant 0 : index
    %195 = vector.load %arg14[%c2_94, %c0_95, %c0_96] : memref<3x8x4xf32, #tpu.memory_space<vmem>>, vector<1x8x4xf32>
    %196 = vector.shape_cast %195 : vector<1x8x4xf32> to vector<8x4xf32>
    %cst_97 = arith.constant dense<0.000000e+00> : vector<16x4xf32>
    %197 = tpu.matmul %181, %196, %cst_97 {dimension_numbers = #tpu.dot_dimension_numbers<[1], [0], [0], [1], [0, 0, 1, 1], [], []>} : vector<16x8xf32>, vector<8x4xf32>, vector<16x4xf32> -> vector<16x4xf32>
    %198 = tpu.concatenate %191, %194, %197 in 0 : vector<16x4xf32>, vector<16x4xf32>, vector<16x4xf32> -> vector<48x4xf32>
    %c0_98 = arith.constant 0 : index
    %c0_99 = arith.constant 0 : index
    %199 = vector.load %arg12[%c0_98, %c0_99] : memref<64x48xf32, #tpu.memory_space<vmem>>, vector<64x48xf32>
    %cst_100 = arith.constant dense<0.000000e+00> : vector<64x4xf32>
    %200 = tpu.matmul %199, %198, %cst_100 {dimension_numbers = #tpu.dot_dimension_numbers<[1], [0], [0], [1], [0, 0, 1, 1], [], []>} : vector<64x48xf32>, vector<48x4xf32>, vector<64x4xf32> -> vector<64x4xf32>
    %201 = vector.extract_strided_slice %200 {offsets = [0, 0], sizes = [32, 4], strides = [1, 1]} : vector<64x4xf32> to vector<32x4xf32>
    %202 = vector.broadcast %183 : vector<32x1xf32> to vector<32x4xf32>
    %203 = arith.addf %201, %202 : vector<32x4xf32>
    %204 = vector.extract_strided_slice %200 {offsets = [32, 0], sizes = [32, 4], strides = [1, 1]} : vector<64x4xf32> to vector<32x4xf32>
    %205 = vector.extract_strided_slice %182 {offsets = [0, 6], sizes = [32, 1], strides = [1, 1]} : vector<32x8xf32> to vector<32x1xf32>
    %206 = vector.broadcast %205 : vector<32x1xf32> to vector<32x4xf32>
    %207 = arith.addf %204, %206 : vector<32x4xf32>
    %cst_101 = arith.constant dense<0.000000e+00> : vector<32xf32>
    %208 = vector.multi_reduction <add>, %203, %cst_101 [1] : vector<32x4xf32> to vector<32xf32>
    %209 = vector.shape_cast %208 : vector<32xf32> to vector<32x1xf32>
    %cst_102 = arith.constant 2.500000e-01 : f32
    %210 = vector.broadcast %cst_102 : f32 to vector<32x1xf32>
    %211 = arith.mulf %209, %210 : vector<32x1xf32>
    %212 = arith.mulf %203, %203 : vector<32x4xf32>
    %cst_103 = arith.constant dense<0.000000e+00> : vector<32xf32>
    %213 = vector.multi_reduction <add>, %212, %cst_103 [1] : vector<32x4xf32> to vector<32xf32>
    %214 = vector.shape_cast %213 : vector<32xf32> to vector<32x1xf32>
    %cst_104 = arith.constant 2.500000e-01 : f32
    %215 = vector.broadcast %cst_104 : f32 to vector<32x1xf32>
    %216 = arith.mulf %214, %215 : vector<32x1xf32>
    %217 = arith.mulf %211, %211 : vector<32x1xf32>
    %218 = arith.subf %216, %217 : vector<32x1xf32>
    %cst_105 = arith.constant 0.000000e+00 : f32
    %219 = vector.broadcast %cst_105 : f32 to vector<32x1xf32>
    %220 = arith.maximumf %218, %219 : vector<32x1xf32>
    %221 = vector.broadcast %211 : vector<32x1xf32> to vector<32x4xf32>
    %222 = arith.subf %203, %221 : vector<32x4xf32>
    %cst_106 = arith.constant 9.99999974E-6 : f32
    %223 = vector.broadcast %cst_106 : f32 to vector<32x1xf32>
    %224 = arith.addf %220, %223 : vector<32x1xf32>
    %225 = math.rsqrt %224 : vector<32x1xf32>
    %226 = vector.broadcast %225 : vector<32x1xf32> to vector<32x4xf32>
    %227 = arith.mulf %222, %226 : vector<32x4xf32>
    %228 = vector.broadcast %184 : vector<32x1xf32> to vector<32x4xf32>
    %229 = arith.mulf %227, %228 : vector<32x4xf32>
    %230 = vector.broadcast %185 : vector<32x1xf32> to vector<32x4xf32>
    %231 = arith.addf %229, %230 : vector<32x4xf32>
    %cst_107 = arith.constant 0.000000e+00 : f32
    %232 = vector.broadcast %cst_107 : f32 to vector<32x4xf32>
    %233 = arith.maximumf %231, %232 : vector<32x4xf32>
    %c0_108 = arith.constant 0 : index
    %c0_109 = arith.constant 0 : index
    %c0_110 = arith.constant 0 : index
    %234 = vector.load %arg15[%c0_108, %c0_109, %c0_110] : memref<3x4x4xf32, #tpu.memory_space<vmem>>, vector<1x4x4xf32>
    %235 = vector.shape_cast %234 : vector<1x4x4xf32> to vector<4x4xf32>
    %cst_111 = arith.constant dense<0.000000e+00> : vector<32x4xf32>
    %236 = tpu.matmul %233, %235, %cst_111 {dimension_numbers = #tpu.dot_dimension_numbers<[1], [0], [0], [1], [0, 0, 1, 1], [], []>} : vector<32x4xf32>, vector<4x4xf32>, vector<32x4xf32> -> vector<32x4xf32>
    %c2_112 = arith.constant 2 : index
    %c0_113 = arith.constant 0 : index
    %c0_114 = arith.constant 0 : index
    %237 = vector.load %arg15[%c2_112, %c0_113, %c0_114] : memref<3x4x4xf32, #tpu.memory_space<vmem>>, vector<1x4x4xf32>
    %238 = vector.shape_cast %237 : vector<1x4x4xf32> to vector<4x4xf32>
    %cst_115 = arith.constant dense<0.000000e+00> : vector<32x4xf32>
    %239 = tpu.matmul %233, %238, %cst_115 {dimension_numbers = #tpu.dot_dimension_numbers<[1], [0], [0], [1], [0, 0, 1, 1], [], []>} : vector<32x4xf32>, vector<4x4xf32>, vector<32x4xf32> -> vector<32x4xf32>
    %240 = tpu.concatenate %236, %233, %239 in 0 : vector<32x4xf32>, vector<32x4xf32>, vector<32x4xf32> -> vector<96x4xf32>
    %c0_116 = arith.constant 0 : index
    %c0_117 = arith.constant 0 : index
    %241 = vector.load %arg13[%c0_116, %c0_117] : memref<32x96xf32, #tpu.memory_space<vmem>>, vector<32x96xf32>
    %cst_118 = arith.constant dense<0.000000e+00> : vector<32x4xf32>
    %242 = tpu.matmul %241, %240, %cst_118 {dimension_numbers = #tpu.dot_dimension_numbers<[1], [0], [0], [1], [0, 0, 1, 1], [], []>} : vector<32x96xf32>, vector<96x4xf32>, vector<32x4xf32> -> vector<32x4xf32>
    %243 = vector.broadcast %186 : vector<32x1xf32> to vector<32x4xf32>
    %244 = arith.addf %242, %243 : vector<32x4xf32>
    %cst_119 = arith.constant dense<0.000000e+00> : vector<32xf32>
    %245 = vector.multi_reduction <add>, %244, %cst_119 [1] : vector<32x4xf32> to vector<32xf32>
    %246 = vector.shape_cast %245 : vector<32xf32> to vector<32x1xf32>
    %cst_120 = arith.constant 2.500000e-01 : f32
    %247 = vector.broadcast %cst_120 : f32 to vector<32x1xf32>
    %248 = arith.mulf %246, %247 : vector<32x1xf32>
    %249 = arith.mulf %244, %244 : vector<32x4xf32>
    %cst_121 = arith.constant dense<0.000000e+00> : vector<32xf32>
    %250 = vector.multi_reduction <add>, %249, %cst_121 [1] : vector<32x4xf32> to vector<32xf32>
    %251 = vector.shape_cast %250 : vector<32xf32> to vector<32x1xf32>
    %cst_122 = arith.constant 2.500000e-01 : f32
    %252 = vector.broadcast %cst_122 : f32 to vector<32x1xf32>
    %253 = arith.mulf %251, %252 : vector<32x1xf32>
    %254 = arith.mulf %248, %248 : vector<32x1xf32>
    %255 = arith.subf %253, %254 : vector<32x1xf32>
    %cst_123 = arith.constant 0.000000e+00 : f32
    %256 = vector.broadcast %cst_123 : f32 to vector<32x1xf32>
    %257 = arith.maximumf %255, %256 : vector<32x1xf32>
    %258 = vector.broadcast %248 : vector<32x1xf32> to vector<32x4xf32>
    %259 = arith.subf %244, %258 : vector<32x4xf32>
    %cst_124 = arith.constant 9.99999974E-6 : f32
    %260 = vector.broadcast %cst_124 : f32 to vector<32x1xf32>
    %261 = arith.addf %257, %260 : vector<32x1xf32>
    %262 = math.rsqrt %261 : vector<32x1xf32>
    %263 = vector.broadcast %262 : vector<32x1xf32> to vector<32x4xf32>
    %264 = arith.mulf %259, %263 : vector<32x4xf32>
    %265 = vector.broadcast %187 : vector<32x1xf32> to vector<32x4xf32>
    %266 = arith.mulf %264, %265 : vector<32x4xf32>
    %267 = vector.broadcast %188 : vector<32x1xf32> to vector<32x4xf32>
    %268 = arith.addf %266, %267 : vector<32x4xf32>
    %269 = arith.addf %268, %207 : vector<32x4xf32>
    %cst_125 = arith.constant 0.000000e+00 : f32
    %270 = vector.broadcast %cst_125 : f32 to vector<32x4xf32>
    %271 = arith.maximumf %269, %270 : vector<32x4xf32>
    %c0_126 = arith.constant 0 : index
    %c0_127 = arith.constant 0 : index
    %c0_128 = arith.constant 0 : index
    %272 = vector.load %arg17[%c0_126, %c0_127, %c0_128] : memref<2x4x2xf32, #tpu.memory_space<vmem>>, vector<1x4x2xf32>
    %273 = vector.shape_cast %272 : vector<1x4x2xf32> to vector<4x2xf32>
    %cst_129 = arith.constant dense<0.000000e+00> : vector<32x2xf32>
    %274 = tpu.matmul %271, %273, %cst_129 {dimension_numbers = #tpu.dot_dimension_numbers<[1], [0], [0], [1], [0, 0, 1, 1], [], []>} : vector<32x4xf32>, vector<4x2xf32>, vector<32x2xf32> -> vector<32x2xf32>
    %c1_130 = arith.constant 1 : index
    %c0_131 = arith.constant 0 : index
    %c0_132 = arith.constant 0 : index
    %275 = vector.load %arg17[%c1_130, %c0_131, %c0_132] : memref<2x4x2xf32, #tpu.memory_space<vmem>>, vector<1x4x2xf32>
    %276 = vector.shape_cast %275 : vector<1x4x2xf32> to vector<4x2xf32>
    %cst_133 = arith.constant dense<0.000000e+00> : vector<32x2xf32>
    %277 = tpu.matmul %271, %276, %cst_133 {dimension_numbers = #tpu.dot_dimension_numbers<[1], [0], [0], [1], [0, 0, 1, 1], [], []>} : vector<32x4xf32>, vector<4x2xf32>, vector<32x2xf32> -> vector<32x2xf32>
    %278 = tpu.concatenate %274, %277 in 0 : vector<32x2xf32>, vector<32x2xf32> -> vector<64x2xf32>
    %c0_134 = arith.constant 0 : index
    %c0_135 = arith.constant 0 : index
    %279 = vector.load %arg18[%c0_134, %c0_135] : memref<32x64xf32, #tpu.memory_space<vmem>>, vector<32x64xf32>
    %cst_136 = arith.constant dense<0.000000e+00> : vector<32x2xf32>
    %280 = tpu.matmul %279, %278, %cst_136 {dimension_numbers = #tpu.dot_dimension_numbers<[1], [0], [0], [1], [0, 0, 1, 1], [], []>} : vector<32x64xf32>, vector<64x2xf32>, vector<32x2xf32> -> vector<32x2xf32>
    %c0_137 = arith.constant 0 : index
    %c0_138 = arith.constant 0 : index
    %281 = vector.load %arg19[%c0_137, %c0_138] : memref<32x1xf32, #tpu.memory_space<vmem>>, vector<32x1xf32>
    %282 = vector.broadcast %281 : vector<32x1xf32> to vector<32x2xf32>
    %283 = arith.addf %280, %282 : vector<32x2xf32>
    %cst_139 = arith.constant 0.000000e+00 : f32
    %284 = vector.broadcast %cst_139 : f32 to vector<32x2xf32>
    %285 = arith.maximumf %283, %284 : vector<32x2xf32>
    %c0_140 = arith.constant 0 : index
    %c0_141 = arith.constant 0 : index
    %286 = vector.load %arg20[%c0_140, %c0_141] : memref<16x32xf32, #tpu.memory_space<vmem>>, vector<16x32xf32>
    %cst_142 = arith.constant dense<0.000000e+00> : vector<16x2xf32>
    %287 = tpu.matmul %286, %285, %cst_142 {dimension_numbers = #tpu.dot_dimension_numbers<[1], [0], [0], [1], [0, 0, 1, 1], [], []>} : vector<16x32xf32>, vector<32x2xf32>, vector<16x2xf32> -> vector<16x2xf32>
    %c0_143 = arith.constant 0 : index
    %c0_144 = arith.constant 0 : index
    %288 = vector.load %arg21[%c0_143, %c0_144] : memref<16x1xf32, #tpu.memory_space<vmem>>, vector<16x1xf32>
    %289 = vector.broadcast %288 : vector<16x1xf32> to vector<16x2xf32>
    %290 = arith.addf %287, %289 : vector<16x2xf32>
    %291 = vector.extract_strided_slice %290 {offsets = [0, 0], sizes = [8, 2], strides = [1, 1]} : vector<16x2xf32> to vector<8x2xf32>
    %292 = vector.extract_strided_slice %290 {offsets = [8, 0], sizes = [8, 2], strides = [1, 1]} : vector<16x2xf32> to vector<8x2xf32>
    %cst_145 = arith.constant 5.000000e-01 : f32
    %293 = vector.broadcast %cst_145 : f32 to vector<8x2xf32>
    %294 = arith.mulf %293, %292 : vector<8x2xf32>
    %295 = math.exp %294 : vector<8x2xf32>
    %296 = arith.mulf %1, %295 : vector<8x2xf32>
    %297 = arith.addf %291, %296 : vector<8x2xf32>
    %298 = tpu.concatenate %290, %297 in 0 : vector<16x2xf32>, vector<8x2xf32> -> vector<24x2xf32>
    %c0_146 = arith.constant 0 : index
    %c0_147 = arith.constant 0 : index
    %299 = vector.load %arg40[%c0_146, %c0_147] : memref<24x2xf32, #tpu.memory_space<vmem>>, vector<24x2xf32>
    tpu.vector_store %arg40[%c0_146, %c0_147], %298 {strides = array<i32>} : memref<24x2xf32, #tpu.memory_space<vmem>>, vector<24x2xf32>,
    %c0_148 = arith.constant 0 : index
    %c0_149 = arith.constant 0 : index
    %300 = vector.load %arg22[%c0_148, %c0_149] : memref<64x8xf32, #tpu.memory_space<vmem>>, vector<64x8xf32>
    %cst_150 = arith.constant dense<0.000000e+00> : vector<64x2xf32>
    %301 = tpu.matmul %300, %297, %cst_150 {dimension_numbers = #tpu.dot_dimension_numbers<[1], [0], [0], [1], [0, 0, 1, 1], [], []>} : vector<64x8xf32>, vector<8x2xf32>, vector<64x2xf32> -> vector<64x2xf32>
    %c0_151 = arith.constant 0 : index
    %c0_152 = arith.constant 0 : index
    %302 = vector.load %arg23[%c0_151, %c0_152] : memref<64x1xf32, #tpu.memory_space<vmem>>, vector<64x1xf32>
    %303 = vector.broadcast %302 : vector<64x1xf32> to vector<64x2xf32>
    %304 = arith.addf %301, %303 : vector<64x2xf32>
    %305 = vector.extract_strided_slice %304 {offsets = [0, 0], sizes = [32, 2], strides = [1, 1]} : vector<64x2xf32> to vector<32x2xf32>
    %c0_153 = arith.constant 0 : index
    %c0_154 = arith.constant 0 : index
    %c0_155 = arith.constant 0 : index
    %306 = vector.load %arg24[%c0_153, %c0_154, %c0_155] : memref<2x2x4xf32, #tpu.memory_space<vmem>>, vector<1x2x4xf32>
    %307 = vector.shape_cast %306 : vector<1x2x4xf32> to vector<2x4xf32>
    %cst_156 = arith.constant dense<0.000000e+00> : vector<32x4xf32>
    %308 = tpu.matmul %305, %307, %cst_156 {dimension_numbers = #tpu.dot_dimension_numbers<[1], [0], [0], [1], [0, 0, 1, 1], [], []>} : vector<32x2xf32>, vector<2x4xf32>, vector<32x4xf32> -> vector<32x4xf32>
    %309 = vector.extract_strided_slice %304 {offsets = [32, 0], sizes = [32, 2], strides = [1, 1]} : vector<64x2xf32> to vector<32x2xf32>
    %c1_157 = arith.constant 1 : index
    %c0_158 = arith.constant 0 : index
    %c0_159 = arith.constant 0 : index
    %310 = vector.load %arg24[%c1_157, %c0_158, %c0_159] : memref<2x2x4xf32, #tpu.memory_space<vmem>>, vector<1x2x4xf32>
    %311 = vector.shape_cast %310 : vector<1x2x4xf32> to vector<2x4xf32>
    %cst_160 = arith.constant dense<0.000000e+00> : vector<32x4xf32>
    %312 = tpu.matmul %309, %311, %cst_160 {dimension_numbers = #tpu.dot_dimension_numbers<[1], [0], [0], [1], [0, 0, 1, 1], [], []>} : vector<32x2xf32>, vector<2x4xf32>, vector<32x4xf32> -> vector<32x4xf32>
    %313 = arith.addf %308, %312 : vector<32x4xf32>
    %c0_161 = arith.constant 0 : index
    %c0_162 = arith.constant 0 : index
    %314 = vector.load %arg29[%c0_161, %c0_162] : memref<16x8xf32, #tpu.memory_space<vmem>>, vector<16x8xf32>
    %315 = vector.extract_strided_slice %314 {offsets = [0, 0], sizes = [16, 1], strides = [1, 1]} : vector<16x8xf32> to vector<16x1xf32>
    %316 = vector.extract_strided_slice %314 {offsets = [0, 1], sizes = [16, 1], strides = [1, 1]} : vector<16x8xf32> to vector<16x1xf32>
    %317 = vector.extract_strided_slice %314 {offsets = [0, 2], sizes = [16, 1], strides = [1, 1]} : vector<16x8xf32> to vector<16x1xf32>
    %318 = vector.extract_strided_slice %314 {offsets = [0, 3], sizes = [16, 1], strides = [1, 1]} : vector<16x8xf32> to vector<16x1xf32>
    %319 = vector.extract_strided_slice %314 {offsets = [0, 4], sizes = [16, 1], strides = [1, 1]} : vector<16x8xf32> to vector<16x1xf32>
    %320 = vector.extract_strided_slice %314 {offsets = [0, 5], sizes = [16, 1], strides = [1, 1]} : vector<16x8xf32> to vector<16x1xf32>
    %c0_163 = arith.constant 0 : index
    %c0_164 = arith.constant 0 : index
    %c0_165 = arith.constant 0 : index
    %321 = vector.load %arg27[%c0_163, %c0_164, %c0_165] : memref<4x4x8xf32, #tpu.memory_space<vmem>>, vector<1x4x8xf32>
    %322 = vector.shape_cast %321 : vector<1x4x8xf32> to vector<4x8xf32>
    %cst_166 = arith.constant dense<0.000000e+00> : vector<32x8xf32>
    %323 = tpu.matmul %313, %322, %cst_166 {dimension_numbers = #tpu.dot_dimension_numbers<[1], [0], [0], [1], [0, 0, 1, 1], [], []>} : vector<32x4xf32>, vector<4x8xf32>, vector<32x8xf32> -> vector<32x8xf32>
    %c1_167 = arith.constant 1 : index
    %c0_168 = arith.constant 0 : index
    %c0_169 = arith.constant 0 : index
    %324 = vector.load %arg27[%c1_167, %c0_168, %c0_169] : memref<4x4x8xf32, #tpu.memory_space<vmem>>, vector<1x4x8xf32>
    %325 = vector.shape_cast %324 : vector<1x4x8xf32> to vector<4x8xf32>
    %cst_170 = arith.constant dense<0.000000e+00> : vector<32x8xf32>
    %326 = tpu.matmul %313, %325, %cst_170 {dimension_numbers = #tpu.dot_dimension_numbers<[1], [0], [0], [1], [0, 0, 1, 1], [], []>} : vector<32x4xf32>, vector<4x8xf32>, vector<32x8xf32> -> vector<32x8xf32>
    %c2_171 = arith.constant 2 : index
    %c0_172 = arith.constant 0 : index
    %c0_173 = arith.constant 0 : index
    %327 = vector.load %arg27[%c2_171, %c0_172, %c0_173] : memref<4x4x8xf32, #tpu.memory_space<vmem>>, vector<1x4x8xf32>
    %328 = vector.shape_cast %327 : vector<1x4x8xf32> to vector<4x8xf32>
    %cst_174 = arith.constant dense<0.000000e+00> : vector<32x8xf32>
    %329 = tpu.matmul %313, %328, %cst_174 {dimension_numbers = #tpu.dot_dimension_numbers<[1], [0], [0], [1], [0, 0, 1, 1], [], []>} : vector<32x4xf32>, vector<4x8xf32>, vector<32x8xf32> -> vector<32x8xf32>
    %c3 = arith.constant 3 : index
    %c0_175 = arith.constant 0 : index
    %c0_176 = arith.constant 0 : index
    %330 = vector.load %arg27[%c3, %c0_175, %c0_176] : memref<4x4x8xf32, #tpu.memory_space<vmem>>, vector<1x4x8xf32>
    %331 = vector.shape_cast %330 : vector<1x4x8xf32> to vector<4x8xf32>
    %cst_177 = arith.constant dense<0.000000e+00> : vector<32x8xf32>
    %332 = tpu.matmul %313, %331, %cst_177 {dimension_numbers = #tpu.dot_dimension_numbers<[1], [0], [0], [1], [0, 0, 1, 1], [], []>} : vector<32x4xf32>, vector<4x8xf32>, vector<32x8xf32> -> vector<32x8xf32>
    %333 = tpu.concatenate %323, %326, %329, %332 in 0 : vector<32x8xf32>, vector<32x8xf32>, vector<32x8xf32>, vector<32x8xf32> -> vector<128x8xf32>
    %c0_178 = arith.constant 0 : index
    %c0_179 = arith.constant 0 : index
    %334 = vector.load %arg25[%c0_178, %c0_179] : memref<32x128xf32, #tpu.memory_space<vmem>>, vector<32x128xf32>
    %cst_180 = arith.constant dense<0.000000e+00> : vector<32x8xf32>
    %335 = tpu.matmul %334, %333, %cst_180 {dimension_numbers = #tpu.dot_dimension_numbers<[1], [0], [0], [1], [0, 0, 1, 1], [], []>} : vector<32x128xf32>, vector<128x8xf32>, vector<32x8xf32> -> vector<32x8xf32>
    %336 = vector.extract_strided_slice %335 {offsets = [0, 0], sizes = [16, 8], strides = [1, 1]} : vector<32x8xf32> to vector<16x8xf32>
    %337 = vector.broadcast %315 : vector<16x1xf32> to vector<16x8xf32>
    %338 = arith.addf %336, %337 : vector<16x8xf32>
    %339 = vector.extract_strided_slice %335 {offsets = [16, 0], sizes = [16, 8], strides = [1, 1]} : vector<32x8xf32> to vector<16x8xf32>
    %cst_181 = arith.constant dense<0.000000e+00> : vector<16xf32>
    %340 = vector.multi_reduction <add>, %338, %cst_181 [1] : vector<16x8xf32> to vector<16xf32>
    %341 = vector.shape_cast %340 : vector<16xf32> to vector<16x1xf32>
    %cst_182 = arith.constant 1.250000e-01 : f32
    %342 = vector.broadcast %cst_182 : f32 to vector<16x1xf32>
    %343 = arith.mulf %341, %342 : vector<16x1xf32>
    %344 = arith.mulf %338, %338 : vector<16x8xf32>
    %cst_183 = arith.constant dense<0.000000e+00> : vector<16xf32>
    %345 = vector.multi_reduction <add>, %344, %cst_183 [1] : vector<16x8xf32> to vector<16xf32>
    %346 = vector.shape_cast %345 : vector<16xf32> to vector<16x1xf32>
    %cst_184 = arith.constant 1.250000e-01 : f32
    %347 = vector.broadcast %cst_184 : f32 to vector<16x1xf32>
    %348 = arith.mulf %346, %347 : vector<16x1xf32>
    %349 = arith.mulf %343, %343 : vector<16x1xf32>
    %350 = arith.subf %348, %349 : vector<16x1xf32>
    %cst_185 = arith.constant 0.000000e+00 : f32
    %351 = vector.broadcast %cst_185 : f32 to vector<16x1xf32>
    %352 = arith.maximumf %350, %351 : vector<16x1xf32>
    %353 = vector.broadcast %343 : vector<16x1xf32> to vector<16x8xf32>
    %354 = arith.subf %338, %353 : vector<16x8xf32>
    %cst_186 = arith.constant 9.99999974E-6 : f32
    %355 = vector.broadcast %cst_186 : f32 to vector<16x1xf32>
    %356 = arith.addf %352, %355 : vector<16x1xf32>
    %357 = math.rsqrt %356 : vector<16x1xf32>
    %358 = vector.broadcast %357 : vector<16x1xf32> to vector<16x8xf32>
    %359 = arith.mulf %354, %358 : vector<16x8xf32>
    %360 = vector.broadcast %316 : vector<16x1xf32> to vector<16x8xf32>
    %361 = arith.mulf %359, %360 : vector<16x8xf32>
    %362 = vector.broadcast %317 : vector<16x1xf32> to vector<16x8xf32>
    %363 = arith.addf %361, %362 : vector<16x8xf32>
    %cst_187 = arith.constant 0.000000e+00 : f32
    %364 = vector.broadcast %cst_187 : f32 to vector<16x8xf32>
    %365 = arith.maximumf %363, %364 : vector<16x8xf32>
    %c0_188 = arith.constant 0 : index
    %c0_189 = arith.constant 0 : index
    %c0_190 = arith.constant 0 : index
    %366 = vector.load %arg28[%c0_188, %c0_189, %c0_190] : memref<3x8x8xf32, #tpu.memory_space<vmem>>, vector<1x8x8xf32>
    %367 = vector.shape_cast %366 : vector<1x8x8xf32> to vector<8x8xf32>
    %cst_191 = arith.constant dense<0.000000e+00> : vector<16x8xf32>
    %368 = tpu.matmul %365, %367, %cst_191 {dimension_numbers = #tpu.dot_dimension_numbers<[1], [0], [0], [1], [0, 0, 1, 1], [], []>} : vector<16x8xf32>, vector<8x8xf32>, vector<16x8xf32> -> vector<16x8xf32>
    %c2_192 = arith.constant 2 : index
    %c0_193 = arith.constant 0 : index
    %c0_194 = arith.constant 0 : index
    %369 = vector.load %arg28[%c2_192, %c0_193, %c0_194] : memref<3x8x8xf32, #tpu.memory_space<vmem>>, vector<1x8x8xf32>
    %370 = vector.shape_cast %369 : vector<1x8x8xf32> to vector<8x8xf32>
    %cst_195 = arith.constant dense<0.000000e+00> : vector<16x8xf32>
    %371 = tpu.matmul %365, %370, %cst_195 {dimension_numbers = #tpu.dot_dimension_numbers<[1], [0], [0], [1], [0, 0, 1, 1], [], []>} : vector<16x8xf32>, vector<8x8xf32>, vector<16x8xf32> -> vector<16x8xf32>
    %372 = tpu.concatenate %368, %365, %371 in 0 : vector<16x8xf32>, vector<16x8xf32>, vector<16x8xf32> -> vector<48x8xf32>
    %c0_196 = arith.constant 0 : index
    %c0_197 = arith.constant 0 : index
    %373 = vector.load %arg26[%c0_196, %c0_197] : memref<16x48xf32, #tpu.memory_space<vmem>>, vector<16x48xf32>
    %cst_198 = arith.constant dense<0.000000e+00> : vector<16x8xf32>
    %374 = tpu.matmul %373, %372, %cst_198 {dimension_numbers = #tpu.dot_dimension_numbers<[1], [0], [0], [1], [0, 0, 1, 1], [], []>} : vector<16x48xf32>, vector<48x8xf32>, vector<16x8xf32> -> vector<16x8xf32>
    %375 = vector.broadcast %318 : vector<16x1xf32> to vector<16x8xf32>
    %376 = arith.addf %374, %375 : vector<16x8xf32>
    %cst_199 = arith.constant dense<0.000000e+00> : vector<16xf32>
    %377 = vector.multi_reduction <add>, %376, %cst_199 [1] : vector<16x8xf32> to vector<16xf32>
    %378 = vector.shape_cast %377 : vector<16xf32> to vector<16x1xf32>
    %cst_200 = arith.constant 1.250000e-01 : f32
    %379 = vector.broadcast %cst_200 : f32 to vector<16x1xf32>
    %380 = arith.mulf %378, %379 : vector<16x1xf32>
    %381 = arith.mulf %376, %376 : vector<16x8xf32>
    %cst_201 = arith.constant dense<0.000000e+00> : vector<16xf32>
    %382 = vector.multi_reduction <add>, %381, %cst_201 [1] : vector<16x8xf32> to vector<16xf32>
    %383 = vector.shape_cast %382 : vector<16xf32> to vector<16x1xf32>
    %cst_202 = arith.constant 1.250000e-01 : f32
    %384 = vector.broadcast %cst_202 : f32 to vector<16x1xf32>
    %385 = arith.mulf %383, %384 : vector<16x1xf32>
    %386 = arith.mulf %380, %380 : vector<16x1xf32>
    %387 = arith.subf %385, %386 : vector<16x1xf32>
    %cst_203 = arith.constant 0.000000e+00 : f32
    %388 = vector.broadcast %cst_203 : f32 to vector<16x1xf32>
    %389 = arith.maximumf %387, %388 : vector<16x1xf32>
    %390 = vector.broadcast %380 : vector<16x1xf32> to vector<16x8xf32>
    %391 = arith.subf %376, %390 : vector<16x8xf32>
    %cst_204 = arith.constant 9.99999974E-6 : f32
    %392 = vector.broadcast %cst_204 : f32 to vector<16x1xf32>
    %393 = arith.addf %389, %392 : vector<16x1xf32>
    %394 = math.rsqrt %393 : vector<16x1xf32>
    %395 = vector.broadcast %394 : vector<16x1xf32> to vector<16x8xf32>
    %396 = arith.mulf %391, %395 : vector<16x8xf32>
    %397 = vector.broadcast %319 : vector<16x1xf32> to vector<16x8xf32>
    %398 = arith.mulf %396, %397 : vector<16x8xf32>
    %399 = vector.broadcast %320 : vector<16x1xf32> to vector<16x8xf32>
    %400 = arith.addf %398, %399 : vector<16x8xf32>
    %401 = arith.addf %400, %339 : vector<16x8xf32>
    %cst_205 = arith.constant 0.000000e+00 : f32
    %402 = vector.broadcast %cst_205 : f32 to vector<16x8xf32>
    %403 = arith.maximumf %401, %402 : vector<16x8xf32>
    %c0_206 = arith.constant 0 : index
    %c0_207 = arith.constant 0 : index
    %404 = vector.load %arg34[%c0_206, %c0_207] : memref<8x8xf32, #tpu.memory_space<vmem>>, vector<8x8xf32>
    %405 = vector.extract_strided_slice %404 {offsets = [0, 0], sizes = [8, 1], strides = [1, 1]} : vector<8x8xf32> to vector<8x1xf32>
    %406 = vector.extract_strided_slice %404 {offsets = [0, 1], sizes = [8, 1], strides = [1, 1]} : vector<8x8xf32> to vector<8x1xf32>
    %407 = vector.extract_strided_slice %404 {offsets = [0, 2], sizes = [8, 1], strides = [1, 1]} : vector<8x8xf32> to vector<8x1xf32>
    %408 = vector.extract_strided_slice %404 {offsets = [0, 3], sizes = [8, 1], strides = [1, 1]} : vector<8x8xf32> to vector<8x1xf32>
    %409 = vector.extract_strided_slice %404 {offsets = [0, 4], sizes = [8, 1], strides = [1, 1]} : vector<8x8xf32> to vector<8x1xf32>
    %410 = vector.extract_strided_slice %404 {offsets = [0, 5], sizes = [8, 1], strides = [1, 1]} : vector<8x8xf32> to vector<8x1xf32>
    %c0_208 = arith.constant 0 : index
    %c0_209 = arith.constant 0 : index
    %c0_210 = arith.constant 0 : index
    %411 = vector.load %arg32[%c0_208, %c0_209, %c0_210] : memref<4x8x16xf32, #tpu.memory_space<vmem>>, vector<1x8x16xf32>
    %412 = vector.shape_cast %411 : vector<1x8x16xf32> to vector<8x16xf32>
    %cst_211 = arith.constant dense<0.000000e+00> : vector<16x16xf32>
    %413 = tpu.matmul %403, %412, %cst_211 {dimension_numbers = #tpu.dot_dimension_numbers<[1], [0], [0], [1], [0, 0, 1, 1], [], []>} : vector<16x8xf32>, vector<8x16xf32>, vector<16x16xf32> -> vector<16x16xf32>
    %c1_212 = arith.constant 1 : index
    %c0_213 = arith.constant 0 : index
    %c0_214 = arith.constant 0 : index
    %414 = vector.load %arg32[%c1_212, %c0_213, %c0_214] : memref<4x8x16xf32, #tpu.memory_space<vmem>>, vector<1x8x16xf32>
    %415 = vector.shape_cast %414 : vector<1x8x16xf32> to vector<8x16xf32>
    %cst_215 = arith.constant dense<0.000000e+00> : vector<16x16xf32>
    %416 = tpu.matmul %403, %415, %cst_215 {dimension_numbers = #tpu.dot_dimension_numbers<[1], [0], [0], [1], [0, 0, 1, 1], [], []>} : vector<16x8xf32>, vector<8x16xf32>, vector<16x16xf32> -> vector<16x16xf32>
    %c2_216 = arith.constant 2 : index
    %c0_217 = arith.constant 0 : index
    %c0_218 = arith.constant 0 : index
    %417 = vector.load %arg32[%c2_216, %c0_217, %c0_218] : memref<4x8x16xf32, #tpu.memory_space<vmem>>, vector<1x8x16xf32>
    %418 = vector.shape_cast %417 : vector<1x8x16xf32> to vector<8x16xf32>
    %cst_219 = arith.constant dense<0.000000e+00> : vector<16x16xf32>
    %419 = tpu.matmul %403, %418, %cst_219 {dimension_numbers = #tpu.dot_dimension_numbers<[1], [0], [0], [1], [0, 0, 1, 1], [], []>} : vector<16x8xf32>, vector<8x16xf32>, vector<16x16xf32> -> vector<16x16xf32>
    %c3_220 = arith.constant 3 : index
    %c0_221 = arith.constant 0 : index
    %c0_222 = arith.constant 0 : index
    %420 = vector.load %arg32[%c3_220, %c0_221, %c0_222] : memref<4x8x16xf32, #tpu.memory_space<vmem>>, vector<1x8x16xf32>
    %421 = vector.shape_cast %420 : vector<1x8x16xf32> to vector<8x16xf32>
    %cst_223 = arith.constant dense<0.000000e+00> : vector<16x16xf32>
    %422 = tpu.matmul %403, %421, %cst_223 {dimension_numbers = #tpu.dot_dimension_numbers<[1], [0], [0], [1], [0, 0, 1, 1], [], []>} : vector<16x8xf32>, vector<8x16xf32>, vector<16x16xf32> -> vector<16x16xf32>
    %423 = tpu.concatenate %413, %416, %419, %422 in 0 : vector<16x16xf32>, vector<16x16xf32>, vector<16x16xf32>, vector<16x16xf32> -> vector<64x16xf32>
    %c0_224 = arith.constant 0 : index
    %c0_225 = arith.constant 0 : index
    %424 = vector.load %arg30[%c0_224, %c0_225] : memref<16x64xf32, #tpu.memory_space<vmem>>, vector<16x64xf32>
    %cst_226 = arith.constant dense<0.000000e+00> : vector<16x16xf32>
    %425 = tpu.matmul %424, %423, %cst_226 {dimension_numbers = #tpu.dot_dimension_numbers<[1], [0], [0], [1], [0, 0, 1, 1], [], []>} : vector<16x64xf32>, vector<64x16xf32>, vector<16x16xf32> -> vector<16x16xf32>
    %426 = vector.extract_strided_slice %425 {offsets = [0, 0], sizes = [8, 16], strides = [1, 1]} : vector<16x16xf32> to vector<8x16xf32>
    %427 = vector.broadcast %405 : vector<8x1xf32> to vector<8x16xf32>
    %428 = arith.addf %426, %427 : vector<8x16xf32>
    %429 = vector.extract_strided_slice %425 {offsets = [8, 0], sizes = [8, 16], strides = [1, 1]} : vector<16x16xf32> to vector<8x16xf32>
    %cst_227 = arith.constant dense<0.000000e+00> : vector<8xf32>
    %430 = vector.multi_reduction <add>, %428, %cst_227 [1] : vector<8x16xf32> to vector<8xf32>
    %431 = vector.shape_cast %430 : vector<8xf32> to vector<8x1xf32>
    %cst_228 = arith.constant 6.250000e-02 : f32
    %432 = vector.broadcast %cst_228 : f32 to vector<8x1xf32>
    %433 = arith.mulf %431, %432 : vector<8x1xf32>
    %434 = arith.mulf %428, %428 : vector<8x16xf32>
    %cst_229 = arith.constant dense<0.000000e+00> : vector<8xf32>
    %435 = vector.multi_reduction <add>, %434, %cst_229 [1] : vector<8x16xf32> to vector<8xf32>
    %436 = vector.shape_cast %435 : vector<8xf32> to vector<8x1xf32>
    %cst_230 = arith.constant 6.250000e-02 : f32
    %437 = vector.broadcast %cst_230 : f32 to vector<8x1xf32>
    %438 = arith.mulf %436, %437 : vector<8x1xf32>
    %439 = arith.mulf %433, %433 : vector<8x1xf32>
    %440 = arith.subf %438, %439 : vector<8x1xf32>
    %cst_231 = arith.constant 0.000000e+00 : f32
    %441 = vector.broadcast %cst_231 : f32 to vector<8x1xf32>
    %442 = arith.maximumf %440, %441 : vector<8x1xf32>
    %443 = vector.broadcast %433 : vector<8x1xf32> to vector<8x16xf32>
    %444 = arith.subf %428, %443 : vector<8x16xf32>
    %cst_232 = arith.constant 9.99999974E-6 : f32
    %445 = vector.broadcast %cst_232 : f32 to vector<8x1xf32>
    %446 = arith.addf %442, %445 : vector<8x1xf32>
    %447 = math.rsqrt %446 : vector<8x1xf32>
    %448 = vector.broadcast %447 : vector<8x1xf32> to vector<8x16xf32>
    %449 = arith.mulf %444, %448 : vector<8x16xf32>
    %450 = vector.broadcast %406 : vector<8x1xf32> to vector<8x16xf32>
    %451 = arith.mulf %449, %450 : vector<8x16xf32>
    %452 = vector.broadcast %407 : vector<8x1xf32> to vector<8x16xf32>
    %453 = arith.addf %451, %452 : vector<8x16xf32>
    %cst_233 = arith.constant 0.000000e+00 : f32
    %454 = vector.broadcast %cst_233 : f32 to vector<8x16xf32>
    %455 = arith.maximumf %453, %454 : vector<8x16xf32>
    %c0_234 = arith.constant 0 : index
    %c0_235 = arith.constant 0 : index
    %c0_236 = arith.constant 0 : index
    %456 = vector.load %arg33[%c0_234, %c0_235, %c0_236] : memref<3x16x16xf32, #tpu.memory_space<vmem>>, vector<1x16x16xf32>
    %457 = vector.shape_cast %456 : vector<1x16x16xf32> to vector<16x16xf32>
    %cst_237 = arith.constant dense<0.000000e+00> : vector<8x16xf32>
    %458 = tpu.matmul %455, %457, %cst_237 {dimension_numbers = #tpu.dot_dimension_numbers<[1], [0], [0], [1], [0, 0, 1, 1], [], []>} : vector<8x16xf32>, vector<16x16xf32>, vector<8x16xf32> -> vector<8x16xf32>
    %c2_238 = arith.constant 2 : index
    %c0_239 = arith.constant 0 : index
    %c0_240 = arith.constant 0 : index
    %459 = vector.load %arg33[%c2_238, %c0_239, %c0_240] : memref<3x16x16xf32, #tpu.memory_space<vmem>>, vector<1x16x16xf32>
    %460 = vector.shape_cast %459 : vector<1x16x16xf32> to vector<16x16xf32>
    %cst_241 = arith.constant dense<0.000000e+00> : vector<8x16xf32>
    %461 = tpu.matmul %455, %460, %cst_241 {dimension_numbers = #tpu.dot_dimension_numbers<[1], [0], [0], [1], [0, 0, 1, 1], [], []>} : vector<8x16xf32>, vector<16x16xf32>, vector<8x16xf32> -> vector<8x16xf32>
    %462 = tpu.concatenate %458, %455, %461 in 0 : vector<8x16xf32>, vector<8x16xf32>, vector<8x16xf32> -> vector<24x16xf32>
    %c0_242 = arith.constant 0 : index
    %c0_243 = arith.constant 0 : index
    %463 = vector.load %arg31[%c0_242, %c0_243] : memref<8x24xf32, #tpu.memory_space<vmem>>, vector<8x24xf32>
    %cst_244 = arith.constant dense<0.000000e+00> : vector<8x16xf32>
    %464 = tpu.matmul %463, %462, %cst_244 {dimension_numbers = #tpu.dot_dimension_numbers<[1], [0], [0], [1], [0, 0, 1, 1], [], []>} : vector<8x24xf32>, vector<24x16xf32>, vector<8x16xf32> -> vector<8x16xf32>
    %465 = vector.broadcast %408 : vector<8x1xf32> to vector<8x16xf32>
    %466 = arith.addf %464, %465 : vector<8x16xf32>
    %cst_245 = arith.constant dense<0.000000e+00> : vector<8xf32>
    %467 = vector.multi_reduction <add>, %466, %cst_245 [1] : vector<8x16xf32> to vector<8xf32>
    %468 = vector.shape_cast %467 : vector<8xf32> to vector<8x1xf32>
    %cst_246 = arith.constant 6.250000e-02 : f32
    %469 = vector.broadcast %cst_246 : f32 to vector<8x1xf32>
    %470 = arith.mulf %468, %469 : vector<8x1xf32>
    %471 = arith.mulf %466, %466 : vector<8x16xf32>
    %cst_247 = arith.constant dense<0.000000e+00> : vector<8xf32>
    %472 = vector.multi_reduction <add>, %471, %cst_247 [1] : vector<8x16xf32> to vector<8xf32>
    %473 = vector.shape_cast %472 : vector<8xf32> to vector<8x1xf32>
    %cst_248 = arith.constant 6.250000e-02 : f32
    %474 = vector.broadcast %cst_248 : f32 to vector<8x1xf32>
    %475 = arith.mulf %473, %474 : vector<8x1xf32>
    %476 = arith.mulf %470, %470 : vector<8x1xf32>
    %477 = arith.subf %475, %476 : vector<8x1xf32>
    %cst_249 = arith.constant 0.000000e+00 : f32
    %478 = vector.broadcast %cst_249 : f32 to vector<8x1xf32>
    %479 = arith.maximumf %477, %478 : vector<8x1xf32>
    %480 = vector.broadcast %470 : vector<8x1xf32> to vector<8x16xf32>
    %481 = arith.subf %466, %480 : vector<8x16xf32>
    %cst_250 = arith.constant 9.99999974E-6 : f32
    %482 = vector.broadcast %cst_250 : f32 to vector<8x1xf32>
    %483 = arith.addf %479, %482 : vector<8x1xf32>
    %484 = math.rsqrt %483 : vector<8x1xf32>
    %485 = vector.broadcast %484 : vector<8x1xf32> to vector<8x16xf32>
    %486 = arith.mulf %481, %485 : vector<8x16xf32>
    %487 = vector.broadcast %409 : vector<8x1xf32> to vector<8x16xf32>
    %488 = arith.mulf %486, %487 : vector<8x16xf32>
    %489 = vector.broadcast %410 : vector<8x1xf32> to vector<8x16xf32>
    %490 = arith.addf %488, %489 : vector<8x16xf32>
    %491 = arith.addf %490, %429 : vector<8x16xf32>
    %cst_251 = arith.constant 0.000000e+00 : f32
    %492 = vector.broadcast %cst_251 : f32 to vector<8x16xf32>
    %493 = arith.maximumf %491, %492 : vector<8x16xf32>
    %c0_252 = arith.constant 0 : index
    %c0_253 = arith.constant 0 : index
    %494 = vector.load %arg39[%c0_252, %c0_253] : memref<1x8xf32, #tpu.memory_space<vmem>>, vector<1x8xf32>
    %495 = vector.extract_strided_slice %494 {offsets = [0, 0], sizes = [1, 1], strides = [1, 1]} : vector<1x8xf32> to vector<1x1xf32>
    %496 = vector.extract_strided_slice %494 {offsets = [0, 1], sizes = [1, 1], strides = [1, 1]} : vector<1x8xf32> to vector<1x1xf32>
    %497 = vector.extract_strided_slice %494 {offsets = [0, 2], sizes = [1, 1], strides = [1, 1]} : vector<1x8xf32> to vector<1x1xf32>
    %498 = vector.extract_strided_slice %494 {offsets = [0, 3], sizes = [1, 1], strides = [1, 1]} : vector<1x8xf32> to vector<1x1xf32>
    %499 = vector.extract_strided_slice %494 {offsets = [0, 4], sizes = [1, 1], strides = [1, 1]} : vector<1x8xf32> to vector<1x1xf32>
    %500 = vector.extract_strided_slice %494 {offsets = [0, 5], sizes = [1, 1], strides = [1, 1]} : vector<1x8xf32> to vector<1x1xf32>
    %c0_254 = arith.constant 0 : index
    %c0_255 = arith.constant 0 : index
    %c0_256 = arith.constant 0 : index
    %501 = vector.load %arg37[%c0_254, %c0_255, %c0_256] : memref<4x16x32xf32, #tpu.memory_space<vmem>>, vector<1x16x32xf32>
    %502 = vector.shape_cast %501 : vector<1x16x32xf32> to vector<16x32xf32>
    %cst_257 = arith.constant dense<0.000000e+00> : vector<8x32xf32>
    %503 = tpu.matmul %493, %502, %cst_257 {dimension_numbers = #tpu.dot_dimension_numbers<[1], [0], [0], [1], [0, 0, 1, 1], [], []>} : vector<8x16xf32>, vector<16x32xf32>, vector<8x32xf32> -> vector<8x32xf32>
    %c1_258 = arith.constant 1 : index
    %c0_259 = arith.constant 0 : index
    %c0_260 = arith.constant 0 : index
    %504 = vector.load %arg37[%c1_258, %c0_259, %c0_260] : memref<4x16x32xf32, #tpu.memory_space<vmem>>, vector<1x16x32xf32>
    %505 = vector.shape_cast %504 : vector<1x16x32xf32> to vector<16x32xf32>
    %cst_261 = arith.constant dense<0.000000e+00> : vector<8x32xf32>
    %506 = tpu.matmul %493, %505, %cst_261 {dimension_numbers = #tpu.dot_dimension_numbers<[1], [0], [0], [1], [0, 0, 1, 1], [], []>} : vector<8x16xf32>, vector<16x32xf32>, vector<8x32xf32> -> vector<8x32xf32>
    %c2_262 = arith.constant 2 : index
    %c0_263 = arith.constant 0 : index
    %c0_264 = arith.constant 0 : index
    %507 = vector.load %arg37[%c2_262, %c0_263, %c0_264] : memref<4x16x32xf32, #tpu.memory_space<vmem>>, vector<1x16x32xf32>
    %508 = vector.shape_cast %507 : vector<1x16x32xf32> to vector<16x32xf32>
    %cst_265 = arith.constant dense<0.000000e+00> : vector<8x32xf32>
    %509 = tpu.matmul %493, %508, %cst_265 {dimension_numbers = #tpu.dot_dimension_numbers<[1], [0], [0], [1], [0, 0, 1, 1], [], []>} : vector<8x16xf32>, vector<16x32xf32>, vector<8x32xf32> -> vector<8x32xf32>
    %c3_266 = arith.constant 3 : index
    %c0_267 = arith.constant 0 : index
    %c0_268 = arith.constant 0 : index
    %510 = vector.load %arg37[%c3_266, %c0_267, %c0_268] : memref<4x16x32xf32, #tpu.memory_space<vmem>>, vector<1x16x32xf32>
    %511 = vector.shape_cast %510 : vector<1x16x32xf32> to vector<16x32xf32>
    %cst_269 = arith.constant dense<0.000000e+00> : vector<8x32xf32>
    %512 = tpu.matmul %493, %511, %cst_269 {dimension_numbers = #tpu.dot_dimension_numbers<[1], [0], [0], [1], [0, 0, 1, 1], [], []>} : vector<8x16xf32>, vector<16x32xf32>, vector<8x32xf32> -> vector<8x32xf32>
    %513 = tpu.concatenate %503, %506, %509, %512 in 0 : vector<8x32xf32>, vector<8x32xf32>, vector<8x32xf32>, vector<8x32xf32> -> vector<32x32xf32>
    %c0_270 = arith.constant 0 : index
    %c0_271 = arith.constant 0 : index
    %514 = vector.load %arg35[%c0_270, %c0_271] : memref<2x32xf32, #tpu.memory_space<vmem>>, vector<2x32xf32>
    %cst_272 = arith.constant dense<0.000000e+00> : vector<2x32xf32>
    %515 = tpu.matmul %514, %513, %cst_272 {dimension_numbers = #tpu.dot_dimension_numbers<[1], [0], [0], [1], [0, 0, 1, 1], [], []>} : vector<2x32xf32>, vector<32x32xf32>, vector<2x32xf32> -> vector<2x32xf32>
    %516 = vector.extract_strided_slice %515 {offsets = [0, 0], sizes = [1, 32], strides = [1, 1]} : vector<2x32xf32> to vector<1x32xf32>
    %517 = vector.broadcast %495 : vector<1x1xf32> to vector<1x32xf32>
    %518 = arith.addf %516, %517 : vector<1x32xf32>
    %519 = vector.extract_strided_slice %515 {offsets = [1, 0], sizes = [1, 32], strides = [1, 1]} : vector<2x32xf32> to vector<1x32xf32>
    %cst_273 = arith.constant dense<0.000000e+00> : vector<1xf32>
    %520 = vector.multi_reduction <add>, %518, %cst_273 [1] : vector<1x32xf32> to vector<1xf32>
    %521 = vector.shape_cast %520 : vector<1xf32> to vector<1x1xf32>
    %cst_274 = arith.constant 3.125000e-02 : f32
    %522 = vector.broadcast %cst_274 : f32 to vector<1x1xf32>
    %523 = arith.mulf %521, %522 : vector<1x1xf32>
    %524 = arith.mulf %518, %518 : vector<1x32xf32>
    %cst_275 = arith.constant dense<0.000000e+00> : vector<1xf32>
    %525 = vector.multi_reduction <add>, %524, %cst_275 [1] : vector<1x32xf32> to vector<1xf32>
    %526 = vector.shape_cast %525 : vector<1xf32> to vector<1x1xf32>
    %cst_276 = arith.constant 3.125000e-02 : f32
    %527 = vector.broadcast %cst_276 : f32 to vector<1x1xf32>
    %528 = arith.mulf %526, %527 : vector<1x1xf32>
    %529 = arith.mulf %523, %523 : vector<1x1xf32>
    %530 = arith.subf %528, %529 : vector<1x1xf32>
    %cst_277 = arith.constant 0.000000e+00 : f32
    %531 = vector.broadcast %cst_277 : f32 to vector<1x1xf32>
    %532 = arith.maximumf %530, %531 : vector<1x1xf32>
    %533 = vector.broadcast %523 : vector<1x1xf32> to vector<1x32xf32>
    %534 = arith.subf %518, %533 : vector<1x32xf32>
    %cst_278 = arith.constant 9.99999974E-6 : f32
    %535 = vector.broadcast %cst_278 : f32 to vector<1x1xf32>
    %536 = arith.addf %532, %535 : vector<1x1xf32>
    %537 = math.rsqrt %536 : vector<1x1xf32>
    %538 = vector.broadcast %537 : vector<1x1xf32> to vector<1x32xf32>
    %539 = arith.mulf %534, %538 : vector<1x32xf32>
    %540 = vector.broadcast %496 : vector<1x1xf32> to vector<1x32xf32>
    %541 = arith.mulf %539, %540 : vector<1x32xf32>
    %542 = vector.broadcast %497 : vector<1x1xf32> to vector<1x32xf32>
    %543 = arith.addf %541, %542 : vector<1x32xf32>
    %cst_279 = arith.constant 0.000000e+00 : f32
    %544 = vector.broadcast %cst_279 : f32 to vector<1x32xf32>
    %545 = arith.maximumf %543, %544 : vector<1x32xf32>
    %c0_280 = arith.constant 0 : index
    %c0_281 = arith.constant 0 : index
    %c0_282 = arith.constant 0 : index
    %546 = vector.load %arg38[%c0_280, %c0_281, %c0_282] : memref<3x32x32xf32, #tpu.memory_space<vmem>>, vector<1x32x32xf32>
    %547 = vector.shape_cast %546 : vector<1x32x32xf32> to vector<32x32xf32>
    %cst_283 = arith.constant dense<0.000000e+00> : vector<1x32xf32>
    %548 = tpu.matmul %545, %547, %cst_283 {dimension_numbers = #tpu.dot_dimension_numbers<[1], [0], [0], [1], [0, 0, 1, 1], [], []>} : vector<1x32xf32>, vector<32x32xf32>, vector<1x32xf32> -> vector<1x32xf32>
    %c2_284 = arith.constant 2 : index
    %c0_285 = arith.constant 0 : index
    %c0_286 = arith.constant 0 : index
    %549 = vector.load %arg38[%c2_284, %c0_285, %c0_286] : memref<3x32x32xf32, #tpu.memory_space<vmem>>, vector<1x32x32xf32>
    %550 = vector.shape_cast %549 : vector<1x32x32xf32> to vector<32x32xf32>
    %cst_287 = arith.constant dense<0.000000e+00> : vector<1x32xf32>
    %551 = tpu.matmul %545, %550, %cst_287 {dimension_numbers = #tpu.dot_dimension_numbers<[1], [0], [0], [1], [0, 0, 1, 1], [], []>} : vector<1x32xf32>, vector<32x32xf32>, vector<1x32xf32> -> vector<1x32xf32>
    %552 = tpu.concatenate %548, %545, %551 in 0 : vector<1x32xf32>, vector<1x32xf32>, vector<1x32xf32> -> vector<3x32xf32>
    %c0_288 = arith.constant 0 : index
    %c0_289 = arith.constant 0 : index
    %553 = vector.load %arg36[%c0_288, %c0_289] : memref<1x3xf32, #tpu.memory_space<vmem>>, vector<1x3xf32>
    %cst_290 = arith.constant dense<0.000000e+00> : vector<1x32xf32>
    %554 = tpu.matmul %553, %552, %cst_290 {dimension_numbers = #tpu.dot_dimension_numbers<[1], [0], [0], [1], [0, 0, 1, 1], [], []>} : vector<1x3xf32>, vector<3x32xf32>, vector<1x32xf32> -> vector<1x32xf32>
    %555 = vector.broadcast %498 : vector<1x1xf32> to vector<1x32xf32>
    %556 = arith.addf %554, %555 : vector<1x32xf32>
    %cst_291 = arith.constant dense<0.000000e+00> : vector<1xf32>
    %557 = vector.multi_reduction <add>, %556, %cst_291 [1] : vector<1x32xf32> to vector<1xf32>
    %558 = vector.shape_cast %557 : vector<1xf32> to vector<1x1xf32>
    %cst_292 = arith.constant 3.125000e-02 : f32
    %559 = vector.broadcast %cst_292 : f32 to vector<1x1xf32>
    %560 = arith.mulf %558, %559 : vector<1x1xf32>
    %561 = arith.mulf %556, %556 : vector<1x32xf32>
    %cst_293 = arith.constant dense<0.000000e+00> : vector<1xf32>
    %562 = vector.multi_reduction <add>, %561, %cst_293 [1] : vector<1x32xf32> to vector<1xf32>
    %563 = vector.shape_cast %562 : vector<1xf32> to vector<1x1xf32>
    %cst_294 = arith.constant 3.125000e-02 : f32
    %564 = vector.broadcast %cst_294 : f32 to vector<1x1xf32>
    %565 = arith.mulf %563, %564 : vector<1x1xf32>
    %566 = arith.mulf %560, %560 : vector<1x1xf32>
    %567 = arith.subf %565, %566 : vector<1x1xf32>
    %cst_295 = arith.constant 0.000000e+00 : f32
    %568 = vector.broadcast %cst_295 : f32 to vector<1x1xf32>
    %569 = arith.maximumf %567, %568 : vector<1x1xf32>
    %570 = vector.broadcast %560 : vector<1x1xf32> to vector<1x32xf32>
    %571 = arith.subf %556, %570 : vector<1x32xf32>
    %cst_296 = arith.constant 9.99999974E-6 : f32
    %572 = vector.broadcast %cst_296 : f32 to vector<1x1xf32>
    %573 = arith.addf %569, %572 : vector<1x1xf32>
    %574 = math.rsqrt %573 : vector<1x1xf32>
    %575 = vector.broadcast %574 : vector<1x1xf32> to vector<1x32xf32>
    %576 = arith.mulf %571, %575 : vector<1x32xf32>
    %577 = vector.broadcast %499 : vector<1x1xf32> to vector<1x32xf32>
    %578 = arith.mulf %576, %577 : vector<1x32xf32>
    %579 = vector.broadcast %500 : vector<1x1xf32> to vector<1x32xf32>
    %580 = arith.addf %578, %579 : vector<1x32xf32>
    %581 = arith.addf %580, %519 : vector<1x32xf32>
    %582 = arith.negf %581 : vector<1x32xf32>
    %583 = math.exp %582 : vector<1x32xf32>
    %cst_297 = arith.constant 1.000000e+00 : f32
    %584 = vector.broadcast %cst_297 : f32 to vector<1x32xf32>
    %585 = arith.addf %584, %583 : vector<1x32xf32>
    %586 = arith.divf %584, %585 : vector<1x32xf32>
    %c0_298 = arith.constant 0 : index
    %c0_299 = arith.constant 0 : index
    %587 = vector.load %arg41[%c0_298, %c0_299] : memref<1x32xf32, #tpu.memory_space<vmem>>, vector<1x32xf32>
    tpu.vector_store %arg41[%c0_298, %c0_299], %586 {strides = array<i32>} : memref<1x32xf32, #tpu.memory_space<vmem>>, vector<1x32xf32>,
    return
  }
}

</mosaic_0001>

<bundles_post_ra>
// kernel: fwd.1
= control target key start
LH: loop header
LB: loop body
LE: loop exit
PB: predicated region body
PF: predicated region fallthrough
CT: control target
= control target key end

     0   :  { %v6858_v0 = vmov 0.0|0.0   ;;  %s6859_s3 = smov 4   ;;  %vm6860_vm0 = vmmov 0   ;;  %v6861_v1 = vmov 0.0   ;;  %vm176_vm1 = vcmask 261120   ;;  %s6862_s10 = smov 2   ;;  %s7618_s0 = inlined_call_operand.smem [shape: u32[42], index: -1, kind: input, shape index: {}] }
   0x1   :  { %6483 = vmatprep.subr.bf16.mxu0 %v6858_v0  ;;  %6489 = vmatprep.subr.bf16.mxu1 %v6858_v0  ;;  %s6919_s6 = sld [smem:[%s7618_s0 + %s6859_s3]]   ;;  %vm412_vm2 = vcmask 23552   ;;  %v6863_v22 = vmov 0   ;;  %s6864_s14 = smov 6   ;;  %v6865_v23 = vmov 1   ;;  %vm406_vm3 = vcmask 1040384  }
   0x2   :  { %5985 = vmatprep.mubr.msk.f32.mxu0 %vm6860_vm0, %v6861_v1  ;;  %5996 = vmatprep.mubr.msk.f32.mxu1 %vm6860_vm0, %v6861_v1  ;;  %s1_s9 = sld [smem:[%s7618_s0]]   ;;  %vm408_vm4 = vcmask 1041408   ;;  %vm419_vm5 = vcmask 1042432   ;;  %v6866_v36 = vmov 2   ;;  %vm509_vm6 = vcmask 130048   ;;  %s6867_s18 = smov 5  }
   0x3   :  { %s5496_s13 = sld [smem:[%s7618_s0 + %s6862_s10]]   ;;  %6749 = vset.pattern.permute.xlu0 %v6863_v22  ;;  %6750 = vset.pattern.permute.xlu1 %v6865_v23  ;;  %s6869_s22 = smov 3   ;;  %vm690_vm7 = vcmask 195584   ;;  %vm1138_vm8 = vcmask 64512   ;;  %vm1362_vm9 = vcmask 392192   ;;  %vm1921_vm10 = vcmask 31744  }
   0x4   :  { %s5500_s17 = sld [smem:[%s7618_s0 + %s6864_s14]]   ;;  %s6873_s26 = smov 9   ;;  %vm2043_vm11 = vcmask 1043456   ;;  %vm2242_vm12 = vcmask 785408   ;;  %vm2671_vm13 = vcmask 523264   ;;  %vm2873_vm14 = vcmask 15360  }
   0x5   :  { %s5499_s21 = sld [smem:[%s7618_s0 + %s6867_s18]]   ;;  %s6874_s30 = smov 7   ;;  %vm5162_vm15 = vcmask 253952  }
   0x6   :  { %s5497_s25 = sld [smem:[%s7618_s0 + %s6869_s22]]   ;;  %s6875_s4 = smov 11  }
   0x7   :  { %v172_v2 = vld [vmem:[%s6919_s6] sm:$0xff]  ;;  %v173_v3 = vld [vmem:[%s6919_s6 + $0x8] sm:$0xff]  ;;  %v174_v7 = vld [vmem:[%s6919_s6 + $0x10] sm:$0xff]  ;;  %s5503_s29 = sld [smem:[%s7618_s0 + %s6873_s26]]   ;;  %s6876_s8 = smov 10  }
   0x8   :  { %v5537_v4 = vld [vmem:[%s6919_s6 + $0x20] sm:$0xff]  ;;  %v6484_v5 = vpack.c.bf16 %v173_v3, %v172_v2  ;;  %v5538_v6 = vld [vmem:[%s6919_s6 + $0x28] sm:$0xff]  ;;  %v175_v8 = vld [vmem:[%s6919_s6 + $0x18] sm:$0xff]  ;;  %s7023_s3 = sld [smem:[%s7618_s0 + %s6874_s30]]   ;;  %s6877_s12 = smov 8  }
   0x9   :  { %v6490_v9 = vpack.c.bf16 %v5538_v6, %v5537_v4  ;;  %v5539_v10 = vld [vmem:[%s6919_s6 + $0x30] sm:$0xff]  ;;  %v5540_v11 = vld [vmem:[%s6919_s6 + $0x38] sm:$0xff]  ;;  %v6487_v12 = vpack.c.bf16 %v175_v8, %v174_v7  ;;  %v5542_v14 = vld [vmem:[%s6919_s6 + $0x40] sm:$0xff]  ;;  %v6868_v4 = vmov 3   ;;  %s5505_s7 = sld [smem:[%s7618_s0 + %s6875_s4]]   ;;  %s6878_s16 = smov 14  }
   0xa   :  { %6485 = vmatpush3.bf16.msra.mxu0 %v6484_v5  ;;  %v6493_v13 = vpack.c.bf16 %v5540_v11, %v5539_v10  ;;  %v5543_v15 = vld [vmem:[%s6919_s6 + $0x48] sm:$0xff]  ;;  %v169_v16 = vld [vmem:[%s1_s9] sm:$0x1]  ;;  %v5544_v18 = vld [vmem:[%s6919_s6 + $0x50] sm:$0xff]  ;;  %v6870_v11 = vmov 6   ;;  %s5504_s11 = sld [smem:[%s7618_s0 + %s6876_s8]]   ;;  %s6879_s20 = smov 12  }
   0xb   :  { %6491 = vmatpush3.bf16.msra.mxu1 %v6490_v9  ;;  %6486 = vmatprep.subr.bf16.mxu0 %v6858_v0  ;;  %v6496_v17 = vpack.c.bf16 %v5543_v15, %v5542_v14  ;;  %v5545_v19 = vld [vmem:[%s6919_s6 + $0x58] sm:$0xff]  ;;  %v410_v21 = vld [vmem:[%s5496_s13] sm:$0xff]  ;;  %v411_v35 = vld [vmem:[%s5496_s13 + $0x8] sm:$0xff]  ;;  %s5502_s15 = sld [smem:[%s7618_s0 + %s6877_s12]]   ;;  %s6880_s24 = smov 16  }
   0xc   :  { %6492 = vmatprep.subr.bf16.mxu1 %v6858_v0  ;;  %v6499_v20 = vpack.c.bf16 %v5545_v19, %v5544_v18  ;;  %v6961_v24 = vld [vmem:[%s5500_s17] sm:$0xff]  ;;  %v538_v45 = vld [vmem:[%s5499_s21 + $0x8] sm:$0xff]  ;;  %s7086_s19 = sld [smem:[%s7618_s0 + %s6878_s16]]   ;;  %s6881_s28 = smov 15  }
   0xd   :  { %500 = vperm.xlu0 %6749, %v6961_v24   ;;  %527 = vperm.xlu1 %6750, %v6961_v24   ;;  %v537_v44 = vld [vmem:[%s5499_s21] sm:$0xff]  ;;  %v5552_v48 = vld [vmem:[%s5499_s21 + $0x28] sm:$0xff]  ;;  %s7100_s23 = sld [smem:[%s7618_s0 + %s6879_s20]]   ;;  %s6882_s2 = smov 13  }
   0xe   :  { %6488 = vmatpush3.bf16.msra.mxu0 %v6487_v12  ;;  %v5551_v46 = vld [vmem:[%s5499_s21 + $0x20] sm:$0xff]  ;;  %v6502_v47 = vpack.c.bf16 %v538_v45, %v537_v44  ;;  %v6871_v12 = vmov 4   ;;  %s5510_s27 = sld [smem:[%s7618_s0 + %s6880_s24]]   ;;  %s6883_s6 = smov 17  }
   0xf   :  { %6494 = vmatpush3.bf16.msra.mxu1 %v6493_v13  ;;  %6495 = vmatprep.subr.bf16.mxu0 %v6858_v0  ;;  %v6505_v49 = vpack.c.bf16 %v5552_v48, %v5551_v46  ;;  %v685_v10 = vld [vmem:[%s5497_s25] sm:$0xff]  ;;  %s5509_s1 = sld [smem:[%s7618_s0 + %s6881_s28]]   ;;  %s6884_s10 = smov 18  }
  0x10   :  { %v5559_v48 = vld [vmem:[%s5503_s29 + $0x20] sm:$0xff]  ;;  %s7222_s5 = sld [smem:[%s7618_s0 + %s6882_s2]]   ;;  %s6885_s14 = smov 19  }
  0x11   :  { %5986 = vmatmul.mubr.msk.f32.vlgmr.msra.gmra.mrb[0].mxu0 %vm176_vm1, %v169_v16  ;;  %6751 = vset.pattern.permute.xlu1 %v6866_v36  ;;  %s5511_s9 = sld [smem:[%s7618_s0 + %s6883_s6]]   ;;  %s6886_s18 = smov 21  }
  0x12   :  { %5997 = vmatmul.mubr.msk.f32.vlgmr.msra.gmra.mrb[0].mxu1 %vm176_vm1, %v169_v16  ;;  %6497 = vmatpush3.bf16.msra.mxu0 %v6496_v17  ;;  %s7308_s13 = sld [smem:[%s7618_s0 + %s6884_s10]]   ;;  %s6887_s22 = smov 23  }
  0x13   :  { %6498 = vmatprep.subr.bf16.mxu0 %v6858_v0  ;;  %6007 = vmatprep.mubr.msk.f32.mxu0 %vm6860_vm0, %v6861_v1  ;;  %s5513_s17 = sld [smem:[%s7618_s0 + %s6885_s14]]   ;;  %s6888_s26 = smov 29  }
  0x14   :  { %6012 = vmatprep.mubr.msk.f32.mxu1 %vm412_vm2, %v410_v21  ;;  %6753 = vset.pattern.permute.xlu0 %v6871_v12  ;;  %v794_v21 = vld [vmem:[%s5503_s29] sm:$0xff]  ;;  %s5515_s21 = sld [smem:[%s7618_s0 + %s6886_s18]]   ;;  %s6889_s30 = smov 20  }
  0x15   :  { %s5517_s25 = sld [smem:[%s7618_s0 + %s6887_s22]]   ;;  %s6890_s4 = smov 22  }
  0x16   :  { %6500 = vmatpush3.bf16.msra.mxu0 %v6499_v20  ;;  %v6872_v20 = vmov 5   ;;  %s6891_s8 = smov 40   ;;  %s6892_s12 = smov 1  }
  0x17   :  { %6504 = vmatprep.subr.bf16.mxu0 %v6858_v0  ;;  %s6893_s16 = smov 24   ;;  %s6894_s20 = smov 27  }
  0x18   :  { %s6895_s24 = smov 25   ;;  %s6896_s28 = smov 28  }
  0x19   :  { %6008 = vmatmul.mubr.msk.f32.vlgmr.msra.gmra.mrb[2].mxu0 %vm176_vm1, %v169_v16  ;;  %s6897_s2 = smov 26   ;;  %s6898_s6 = smov 32  }
  0x1a   :  { %6026 = vmatprep.mubr.msk.f32.mxu0 %vm6860_vm0, %v6861_v1  ;;  %6506 = vmatpush3.bf16.msra.mxu0 %v6505_v49  ;;  %v5560_v49 = vld [vmem:[%s5503_s29 + $0x28] sm:$0xff]  ;;  %s6899_s10 = smov 30   ;;  %s6900_s14 = smov 34  }
  0x1b   :  { %6510 = vmatprep.subr.bf16.mxu0 %v6858_v0  ;;  %s6901_s18 = smov 33   ;;  %s6902_s22 = smov 31  }
  0x8c   :  { %v501_v37 = vpop.permute.xlu0 %500  ;;  %v528_v50 = vpop.permute.xlu1 %527 }
  0xe4   :  { %v246_v25 = vpop.f32.mrb[0].mxu0 }
  0xe5   :  { %v321_v26 = vpop.f32.mrb[0].mxu1  ;;  %v5987_v27 = vpop.f32.mrb[1].mxu0 }
  0xe6   :  { %v401_v28 = vrot.slane %v321_v26, 7  ;;  %v5998_v29 = vpop.f32.mrb[1].mxu1  ;;  %v5556_v26 = vld [vmem:[%s5503_s29 + $0x10] sm:$0xff] }
  0xe8   :  { %v407_v30 = vsel %vm406_vm3, %v246_v25, %v401_v28  ;;  %v795_v25 = vld [vmem:[%s5503_s29 + $0x8] sm:$0xff]  ;;  %v5557_v28 = vld [vmem:[%s5503_s29 + $0x18] sm:$0xff]  ;;  %s5523_s29 = sld [smem:[%s7618_s0 + %s6888_s26]]   ;;  %s6903_s26 = smov 37  }
  0xe9   :  { %v6511_v27 = vpack.c.bf16 %v795_v25, %v794_v21  ;;  %v6514_v29 = vpack.c.bf16 %v5557_v28, %v5556_v26 }
  0xec   :  { %v396_v31 = vpop.f32.mrb[2].mxu0 }
  0xed   :  { %v404_v32 = vrot.slane %v396_v31, 6  ;;  %v6009_v33 = vpop.f32.mrb[3].mxu0 }
  0xef   :  { %v409_v34 = vsel %vm408_vm4, %v407_v30, %v404_v32 }
  0xf0   :  { %6010 = vmatprep.subr.msk.mxu1 %vm419_vm5, %v409_v34 }
  0xf1   :  { %6011 = vmatpush3.msk.msra.mxu1 %vm419_vm5, %v409_v34 }
  0xf2   :  { %6013 = vmatmul.mubr.msk.f32.vlgmr.msra.gmra.mrb[2].mxu1 %vm412_vm2, %v411_v35  ;;  %6501 = vmatprep.subr.bf16.mxu1 %v6858_v0 }
  0xf3   :  { %6019 = vmatprep.mubr.msk.f32.mxu1 %vm6860_vm0, %v6861_v1  ;;  %6503 = vmatpush3.bf16.msra.mxu1 %v6502_v47 }
  0xf4   :  { %6507 = vmatprep.subr.bf16.mxu1 %v6858_v0 }
 0x1c5   :  { %v6974_v38 = vpop.f32.mrb[2].mxu1 }
 0x1c6   :  { %v489_v39 = vpop.f32.mrb[3].mxu1 }
 0x1c7   :  { %v503_v40 = vadd.f32 %v501_v37, %v489_v39 }
 0x1c9   :  { %v510_v41 = vsel %vm509_vm6, %v503_v40, 0.0  ;;  %v514_v42 = vmul.f32 %v503_v40, %v503_v40 }
 0x1ca   :  { %511 = vadd.xlane.f32.xlu0 %v510_v41 }
 0x1cb   :  { %v515_v43 = vsel %vm509_vm6, %v514_v42, 0.0 }
 0x1cc   :  { %516 = vadd.xlane.f32.xlu1 %v515_v43 }
 0x1dd   :  { %532 = vperm.xlu1 %6751, %v6961_v24  }
 0x1e1   :  { %6752 = vset.pattern.permute.xlu1 %v6868_v4 }
 0x1e2   :  { %687 = vperm.xlu1 %6752, %v6961_v24  }
 0x1e6   :  { %6754 = vset.pattern.permute.xlu1 %v6870_v11 }
 0x257   :  { %v512_v51 = vpop.xlane.xlu0 %511 }
 0x258   :  { %v513_v52 = vmul.f32 0.0625, %v512_v51  ;;  %v6517_v51 = vpack.c.bf16 %v5560_v49, %v5559_v48 }
 0x259   :  { %v517_v53 = vpop.xlane.xlu1 %516 }
 0x25a   :  { %v519_v54 = vmul.f32 %v513_v52, %v513_v52  ;;  %v518_v55 = vmul.f32 0.0625, %v517_v53  ;;  %v522_v59 = vsub.f32 %v503_v40, %v513_v52  ;;  %v7030_v53 = vld [vmem:[%s5505_s7 + $0x8] sm:$0xff] }
 0x25c   :  { %v520_v56 = vsub.f32 %v518_v55, %v519_v54  ;;  %v792_v54 = vld [vmem:[%s5505_s7] sm:$0xff]  ;;  %s7346_s7 = sld [smem:[%s7618_s0 + %s6890_s4]]   ;;  %s6905_s4 = smov 35  }
 0x25d   :  { %v533_v62 = vpop.permute.xlu1 %532 }
 0x25e   :  { %v521_v57 = vmax.f32 %v520_v56, 0.0 }
 0x260   :  { %v523_v58 = vadd.f32 1e-05, %v521_v57 }
 0x261   :  { %v688_v13 = vpop.permute.xlu1 %687 }
 0x262   :  { %6808 = vrsqrt.f32 %v523_v58 }
 0x26c   :  { %v6809_v60 = vpop.eup %6808 }
 0x26d   :  { %v525_v61 = vmul.f32 %v6809_v60, %v522_v59 }
 0x26f   :  { %v530_v63 = vmul.f32 %v528_v50, %v525_v61 }
 0x271   :  { %v535_v2 = vadd.f32 %v533_v62, %v530_v63  ;;  %v1016_v62 = vld [vmem:[%s7023_s3 + $0x8] sm:$0xff] }
 0x273   :  { %v536_v3 = vmax.f32 %v535_v2, 0.0 }
 0x275   :  { %6020 = vmatmul.mubr.msk.f32.vlgmr.msra.gmra.mrb[4].mxu1 %vm509_vm6, %v536_v3  ;;  %6027 = vmatmul.mubr.msk.f32.vlgmr.msra.gmra.mrb[4].mxu0 %vm509_vm6, %v536_v3 }
 0x276   :  { %6035 = vmatprep.mubr.msk.f32.mxu1 %vm6860_vm0, %v6861_v1  ;;  %6042 = vmatprep.mubr.msk.f32.mxu0 %vm6860_vm0, %v6861_v1 }
 0x277   :  { %6512 = vmatpush3.bf16.msra.mxu0 %v6511_v27 }
 0x278   :  { %6516 = vmatprep.subr.bf16.mxu0 %v6858_v0 }
 0x348   :  { %v608_v5 = vpop.f32.mrb[4].mxu1  ;;  %v681_v6 = vpop.f32.mrb[4].mxu0 }
 0x349   :  { %v6508_v7 = vpack.c.bf16 %v536_v3, %v608_v5  ;;  %v6021_v8 = vpop.f32.mrb[5].mxu1  ;;  %v6028_v9 = vpop.f32.mrb[5].mxu0 }
 0x34b   :  { %6509 = vmatpush3.bf16.msra.mxu1 %v6508_v7 }
 0x34c   :  { %6033 = vmatprep.subr.mxu1 %v6861_v1 }
 0x34f   :  { %6034 = vmatpush3.msra.mxu1 %v681_v6 }
 0x350   :  { %6036 = vmatmul.mubr.msk.f32.vlgmr.msra.gmra.mrb[6].mxu1 %vm690_vm7, %v685_v10  ;;  %6513 = vmatprep.subr.bf16.mxu1 %v6858_v0 }
 0x351   :  { %6049 = vmatprep.mubr.msk.f32.mxu1 %vm6860_vm0, %v6861_v1  ;;  %6515 = vmatpush3.bf16.msra.mxu1 %v6514_v29 }
 0x423   :  { %v760_v14 = vpop.f32.mrb[6].mxu1 }
 0x424   :  { %v761_v15 = vadd.f32 %v760_v14, %v688_v13  ;;  %v6037_v16 = vpop.f32.mrb[7].mxu1 }
 0x425   :  { %v1193_v16 = vld [vmem:[%s5504_s11] sm:$0xff] }
 0x426   :  { %v764_v17 = vsel %vm509_vm6, %v761_v15, 0.0  ;;  %v768_v18 = vmul.f32 %v761_v15, %v761_v15 }
 0x427   :  { %765 = vadd.xlane.f32.xlu1 %v764_v17  ;;  %v5568_v17 = vld [vmem:[%s5504_s11 + $0x10] sm:$0xff]  ;;  %s5534_s11 = sld [smem:[%s7618_s0 + %s6891_s8]]   ;;  %s6906_s8 = smov 38  }
 0x428   :  { %v769_v19 = vsel %vm509_vm6, %v768_v18, 0.0 }
 0x429   :  { %770 = vadd.xlane.f32.xlu0 %v769_v19 }
 0x438   :  { %505 = vperm.xlu1 %6754, %v6961_v24  }
 0x43c   :  { %6755 = vset.pattern.permute.xlu1 %v6872_v20 }
 0x43d   :  { %786 = vperm.xlu1 %6755, %v6961_v24  }
 0x43f   :  { %781 = vperm.xlu0 %6753, %v6961_v24  }
 0x441   :  { %6757 = vset.pattern.permute.xlu1 %v6863_v22 }
 0x442   :  { %1123 = vperm.xlu1 %6757, %v7030_v53  }
 0x443   :  { %6756 = vset.pattern.permute.xlu0 %v6863_v22 }
 0x444   :  { %1118 = vperm.xlu0 %6756, %v792_v54  }
 0x446   :  { %6758 = vset.pattern.permute.xlu1 %v6865_v23 }
 0x447   :  { %1172 = vperm.xlu1 %6758, %v792_v54  }
 0x448   :  { %6759 = vset.pattern.permute.xlu0 %v6865_v23 }
 0x44b   :  { %6760 = vset.pattern.permute.xlu1 %v6866_v36 }
 0x4b4   :  { %v766_v24 = vpop.xlane.xlu1 %765 }
 0x4b5   :  { %v767_v30 = vmul.f32 0.0625, %v766_v24 }
 0x4b6   :  { %v771_v31 = vpop.xlane.xlu0 %770 }
 0x4b7   :  { %v773_v32 = vmul.f32 %v767_v30, %v767_v30  ;;  %v772_v33 = vmul.f32 0.0625, %v771_v31  ;;  %v776_v40 = vsub.f32 %v761_v15, %v767_v30 }
 0x4b8   :  { %v506_v39 = vpop.permute.xlu1 %505 }
 0x4b9   :  { %v774_v34 = vsub.f32 %v772_v33, %v773_v32  ;;  %v508_v46 = vadd.f32 %v6974_v38, %v506_v39  ;;  %v1015_v38 = vld [vmem:[%s7023_s3] sm:$0xff] }
 0x4bb   :  { %v775_v35 = vmax.f32 %v774_v34, 0.0 }
 0x4bc   :  { %v787_v44 = vpop.permute.xlu1 %786 }
 0x4bd   :  { %v777_v37 = vadd.f32 1e-05, %v775_v35 }
 0x4be   :  { %v782_v42 = vpop.permute.xlu0 %781 }
 0x4bf   :  { %6810 = vrsqrt.f32 %v777_v37 }
 0x4c1   :  { %v1124_v63 = vpop.permute.xlu1 %1123 }
 0x4c3   :  { %v1119_v2 = vpop.permute.xlu0 %1118 }
 0x4c6   :  { %v1173_v18 = vpop.permute.xlu1 %1172 }
 0x4c9   :  { %v6811_v41 = vpop.eup %6810 }
 0x4ca   :  { %v779_v43 = vmul.f32 %v6811_v41, %v776_v40 }
 0x4cc   :  { %v784_v45 = vmul.f32 %v782_v42, %v779_v43 }
 0x4ce   :  { %v789_v47 = vadd.f32 %v787_v44, %v784_v45 }
 0x4d0   :  { %v790_v50 = vadd.f32 %v789_v47, %v508_v46 }
 0x4d2   :  { %v791_v52 = vmax.f32 %v790_v50, 0.0 }
 0x4d4   :  { %6043 = vmatmul.mubr.msk.f32.vlgmr.msra.gmra.mrb[6].mxu0 %vm509_vm6, %v791_v52  ;;  %6050 = vmatmul.mubr.msk.f32.vlgmr.msra.gmra.mrb[8].mxu1 %vm509_vm6, %v791_v52 }
 0x4d5   :  { %6518 = vmatpush3.bf16.msra.mxu0 %v6517_v51  ;;  %6056 = vmatprep.mubr.msk.f32.mxu0 %vm6860_vm0, %v6861_v1 }
 0x4d6   :  { %6065 = vmatprep.mubr.msk.f32.mxu1 %vm690_vm7, %v1015_v38  ;;  %6071 = vmatprep.subr.mxu0 %v1193_v16 }
 0x4d8   :  { %6057 = vmatmul.mubr.msk.f32.vlgmr.msra.gmra.mrb[8].mxu0 %vm509_vm6, %v791_v52 }
 0x4d9   :  { %6072 = vmatpush3.msra.mxu0 %v1193_v16 }
 0x4da   :  { %6076 = vmatprep.subr.mxu0 %v5568_v17 }
 0x5a7   :  { %v865_v55 = vpop.f32.mrb[6].mxu0  ;;  %v938_v56 = vpop.f32.mrb[8].mxu1 }
 0x5a8   :  { %v6519_v57 = vpack.c.bf16 %v938_v56, %v865_v55  ;;  %v6044_v58 = vpop.f32.mrb[7].mxu0  ;;  %v6051_v59 = vpop.f32.mrb[9].mxu1  ;;  %v1017_v56 = vld [vmem:[%s7023_s3 + $0x10] sm:$0xff] }
 0x5a9   :  { %v1352_v58 = vld [vmem:[%s5502_s15] sm:$0xff] }
 0x5aa   :  { %6520 = vmatprep.subr.bf16.mxu1 %v6519_v57 }
 0x5ab   :  { %v1011_v60 = vpop.f32.mrb[8].mxu0  ;;  %6522 = vmatpush3.bf16.msra.mxu1 %v6519_v57  ;;  %v1018_v57 = vld [vmem:[%s7023_s3 + $0x18] sm:$0xff]  ;;  %s5514_s3 = sld [smem:[%s7618_s0 + %s6889_s30]]   ;;  %s6904_s30 = smov 39  }
 0x5ac   :  { %v6058_v61 = vpop.f32.mrb[9].mxu0  ;;  %6063 = vmatprep.subr.mxu1 %v1011_v60 }
 0x5af   :  { %6064 = vmatpush3.msra.mxu1 %v1011_v60 }
 0x5b0   :  { %6066 = vmatmul.mubr.msk.f32.vlgmr.msra.gmra.mrb[10].mxu1 %vm690_vm7, %v1016_v62 }
 0x5b1   :  { %6068 = vmatprep.mubr.msk.f32.mxu1 %vm690_vm7, %v1017_v56 }
 0x5b4   :  { %6069 = vmatmul.mubr.msk.f32.gmra.mrb[12].mxu1 %vm690_vm7, %v1018_v57 }
 0x5b5   :  { %6093 = vmatprep.mubr.msk.f32.mxu1 %vm1362_vm9, %v1352_v58 }
 0x683   :  { %v6067_v3 = vpop.f32.mrb[10].mxu1 }
 0x684   :  { %v1127_v5 = vadd.f32 %v6067_v3, %v1124_v63  ;;  %v1097_v6 = vpop.f32.mrb[11].mxu1  ;;  %v1353_v3 = vld [vmem:[%s5502_s15 + $0x8] sm:$0xff]  ;;  %s5495_s15 = sld [smem:[%s7618_s0 + %s6892_s12]]   ;;  %s6907_s12 = smov 36  }
 0x685   :  { %v7038_v7 = vadd.f32 %v1119_v2, %v1097_v6 }
 0x686   :  { %v1142_v8 = vsel %vm1138_vm8, %v1127_v5, 0.0  ;;  %v1148_v9 = vmul.f32 %v1127_v5, %v1127_v5 }
 0x687   :  { %1143 = vadd.xlane.f32.xlu0 %v1142_v8  ;;  %v1139_v10 = vsel %vm1138_vm8, %v7038_v7, 0.0  ;;  %v1147_v14 = vmul.f32 %v7038_v7, %v7038_v7 }
 0x688   :  { %1140 = vadd.xlane.f32.xlu1 %v1139_v10  ;;  %v1152_v13 = vsel %vm1138_vm8, %v1148_v9, 0.0 }
 0x689   :  { %v1149_v15 = vsel %vm1138_vm8, %v1147_v14, 0.0 }
 0x68b   :  { %1153 = vadd.xlane.f32.xlu0 %v1152_v13 }
 0x68f   :  { %1150 = vadd.xlane.f32.xlu0 %v1149_v15 }
 0x699   :  { %1182 = vperm.xlu1 %6760, %v792_v54  }
 0x69d   :  { %1186 = vperm.xlu1 %6760, %v7030_v53  }
 0x6a1   :  { %6761 = vset.pattern.permute.xlu1 %v6868_v4 }
 0x6a2   :  { %1355 = vperm.xlu1 %6761, %v792_v54  }
 0x6a5   :  { %1176 = vperm.xlu0 %6759, %v7030_v53  }
 0x6a6   :  { %1359 = vperm.xlu1 %6761, %v7030_v53  }
 0x6a9   :  { %6763 = vset.pattern.permute.xlu0 %v6871_v12 }
 0x6aa   :  { %6762 = vset.pattern.permute.xlu1 %v6871_v12 }
 0x6ab   :  { %1477 = vperm.xlu1 %6762, %v792_v54  }
 0x6af   :  { %6764 = vset.pattern.permute.xlu1 %v6870_v11 }
 0x6b0   :  { %1129 = vperm.xlu1 %6764, %v792_v54  }
 0x6b4   :  { %6765 = vset.pattern.permute.xlu1 %v6872_v20 }
 0x6b5   :  { %1487 = vperm.xlu1 %6765, %v792_v54  }
 0x6b9   :  { %6766 = vset.pattern.permute.xlu1 %v6870_v11 }
 0x6ba   :  { %1133 = vperm.xlu1 %6766, %v7030_v53  }
 0x6be   :  { %6767 = vset.pattern.permute.xlu1 %v6872_v20 }
 0x714   :  { %v1144_v19 = vpop.xlane.xlu0 %1143 }
 0x715   :  { %v1146_v21 = vmul.f32 0.125, %v1144_v19  ;;  %v1141_v25 = vpop.xlane.xlu1 %1140 }
 0x716   :  { %v1145_v28 = vmul.f32 0.125, %v1141_v25  ;;  %v1504_v25 = vld [vmem:[%s7086_s19] sm:$0xff] }
 0x717   :  { %v1158_v27 = vmul.f32 %v1146_v21, %v1146_v21  ;;  %v1164_v41 = vsub.f32 %v1127_v5, %v1146_v21  ;;  %v6070_v5 = vpop.f32.mrb[12].mxu1 }
 0x718   :  { %v1154_v26 = vpop.xlane.xlu0 %1153  ;;  %v1157_v31 = vmul.f32 %v1145_v28, %v1145_v28  ;;  %v1163_v45 = vsub.f32 %v7038_v7, %v1145_v28  ;;  %v1107_v6 = vpop.f32.mrb[13].mxu1 }
 0x719   :  { %v1156_v29 = vmul.f32 0.125, %v1154_v26  ;;  %v1183_v40 = vpop.permute.xlu1 %1182  ;;  %v5575_v26 = vld [vmem:[%s7086_s19 + $0x8] sm:$0xff] }
 0x71b   :  { %v1160_v24 = vsub.f32 %v1156_v29, %v1158_v27 }
 0x71c   :  { %v1151_v30 = vpop.xlane.xlu0 %1150 }
 0x71d   :  { %v1162_v32 = vmax.f32 %v1160_v24, 0.0  ;;  %v1155_v33 = vmul.f32 0.125, %v1151_v30  ;;  %v1187_v48 = vpop.permute.xlu1 %1186 }
 0x71f   :  { %v1166_v34 = vadd.f32 1e-05, %v1162_v32  ;;  %v1159_v35 = vsub.f32 %v1155_v33, %v1157_v31 }
 0x721   :  { %6812 = vrsqrt.f32 %v1166_v34  ;;  %v1161_v37 = vmax.f32 %v1159_v35, 0.0  ;;  %v1356_v7 = vpop.permute.xlu1 %1355 }
 0x723   :  { %v1165_v39 = vadd.f32 1e-05, %v1161_v37 }
 0x724   :  { %v1177_v43 = vpop.permute.xlu0 %1176 }
 0x725   :  { %6814 = vrsqrt.f32 %v1165_v39  ;;  %v1360_v8 = vpop.permute.xlu1 %1359 }
 0x72a   :  { %v1478_v27 = vpop.permute.xlu1 %1477 }
 0x72b   :  { %v6813_v42 = vpop.eup %6812 }
 0x72c   :  { %v1170_v44 = vmul.f32 %v6813_v42, %v1164_v41 }
 0x72e   :  { %v1180_v46 = vmul.f32 %v1177_v43, %v1170_v44 }
 0x72f   :  { %v6815_v47 = vpop.eup %6814  ;;  %v1130_v28 = vpop.permute.xlu1 %1129 }
 0x730   :  { %v1169_v49 = vmul.f32 %v6815_v47, %v1163_v45  ;;  %v1190_v51 = vadd.f32 %v1187_v48, %v1180_v46 }
 0x732   :  { %v1179_v50 = vmul.f32 %v1173_v18, %v1169_v49  ;;  %v1192_v54 = vmax.f32 %v1190_v51, 0.0 }
 0x734   :  { %v1189_v52 = vadd.f32 %v1183_v40, %v1179_v50 }
 0x736   :  { %v1191_v38 = vmax.f32 %v1189_v52, 0.0 }
 0x738   :  { %6073 = vmatprep.mubr.msk.f32.mxu0 %vm1138_vm8, %v1191_v38  ;;  %v6527_v55 = vpack.c.bf16 %v1192_v54, %v1191_v38 }
 0x739   :  { %6074 = vmatmul.mubr.msk.f32.vlgmr.msra.gmra.mrb[10].mxu0 %vm1138_vm8, %v1192_v54 }
 0x73a   :  { %6078 = vmatprep.mubr.msk.f32.mxu0 %vm1138_vm8, %v1191_v38  ;;  %6077 = vmatpush3.msra.mxu0 %v5568_v17 }
 0x73b   :  { %6096 = vmatprep.subr.mxu0 %v1504_v25 }
 0x73d   :  { %6079 = vmatmul.mubr.msk.f32.vlgmr.msra.gmra.mrb[12].mxu0 %vm1138_vm8, %v1192_v54 }
 0x73e   :  { %6097 = vmatpush3.msra.mxu0 %v1504_v25  ;;  %v1741_v25 = vld [vmem:[%s7100_s23 + $0x8] sm:$0xff] }
 0x73f   :  { %6101 = vmatprep.subr.mxu0 %v5575_v26 }
 0x80c   :  { %v6075_v59 = vpop.f32.mrb[10].mxu0 }
 0x80d   :  { %v1266_v60 = vpop.f32.mrb[11].mxu0 }
 0x80e   :  { %v6523_v61 = vpack.c.bf16 %v6075_v59, %v1266_v60  ;;  %v1136_v59 = vadd.f32 %v1130_v28, %v1107_v6  ;;  %v7107_v6 = vld [vmem:[%s5510_s27] sm:$0xff] }
 0x810   :  { %v6080_v62 = vpop.f32.mrb[12].mxu0  ;;  %6524 = vmatprep.subr.bf16.mxu1 %v6523_v61 }
 0x811   :  { %v1343_v63 = vpop.f32.mrb[13].mxu0  ;;  %6526 = vmatpush3.bf16.msra.mxu1 %v6523_v61 }
 0x812   :  { %v6531_v2 = vpack.c.bf16 %v6080_v62, %v1343_v63  ;;  %6528 = vmatprep.subr.bf16.mxu1 %v6527_v55 }
 0x815   :  { %6530 = vmatpush3.bf16.msra.mxu1 %v6527_v55 }
 0x816   :  { %6532 = vmatprep.subr.bf16.mxu1 %v6531_v2 }
 0x819   :  { %6534 = vmatpush3.bf16.msra.mxu1 %v6531_v2 }
 0x81c   :  { %6094 = vmatmul.mubr.msk.f32.vlgmr.msra.gmra.mrb[14].mxu1 %vm1362_vm9, %v1353_v3  ;;  %v5578_v3 = vld [vmem:[%s7086_s19 + $0x10] sm:$0xff]  ;;  %s5518_s19 = sld [smem:[%s7618_s0 + %s6893_s16]]   ;;  %s6908_s16 = smov 41  }
 0x8ef   :  { %v6095_v9 = vpop.f32.mrb[14].mxu1 }
 0x8f0   :  { %v1441_v10 = vadd.f32 %v6095_v9, %v1360_v8  ;;  %v1435_v13 = vpop.f32.mrb[15].mxu1  ;;  %v7113_v8 = vld [vmem:[%s5510_s27 + $0x10] sm:$0xff]  ;;  %v7116_v9 = vld [vmem:[%s5510_s27 + $0x18] sm:$0xff] }
 0x8f1   :  { %v1436_v14 = vadd.f32 %v1435_v13, %v1356_v7  ;;  %v7110_v7 = vld [vmem:[%s5510_s27 + $0x8] sm:$0xff]  ;;  %s7424_s27 = sld [smem:[%s7618_s0 + %s6895_s24]]  }
 0x8f2   :  { %v1447_v15 = vsel %vm1138_vm8, %v1441_v10, 0.0  ;;  %v1453_v17 = vmul.f32 %v1441_v10, %v1441_v10 }
 0x8f3   :  { %1448 = vadd.xlane.f32.xlu0 %v1447_v15  ;;  %v1444_v16 = vsel %vm1138_vm8, %v1436_v14, 0.0  ;;  %v1452_v19 = vmul.f32 %v1436_v14, %v1436_v14 }
 0x8f4   :  { %1445 = vadd.xlane.f32.xlu1 %v1444_v16  ;;  %v1457_v18 = vsel %vm1138_vm8, %v1453_v17, 0.0 }
 0x8f5   :  { %v1454_v21 = vsel %vm1138_vm8, %v1452_v19, 0.0 }
 0x8f8   :  { %1458 = vadd.xlane.f32.xlu1 %v1457_v18 }
 0x8fc   :  { %1455 = vadd.xlane.f32.xlu1 %v1454_v21 }
 0x909   :  { %1481 = vperm.xlu0 %6763, %v7030_v53  }
 0x90d   :  { %1491 = vperm.xlu1 %6767, %v7030_v53   ;;  %6769 = vset.pattern.permute.xlu0 %v6865_v23  ;;  %v1488_v53 = vpop.permute.xlu1 %1487 }
 0x911   :  { %6768 = vset.pattern.permute.xlu1 %v6863_v22  ;;  %v1134_v29 = vpop.permute.xlu1 %1133 }
 0x912   :  { %v1137_v58 = vadd.f32 %v6070_v5, %v1134_v29  ;;  %v1740_v5 = vld [vmem:[%s7100_s23] sm:$0xff]  ;;  %1879 = vperm.xlu1 %6768, %v7107_v6  }
 0x913   :  { %6123 = vmatprep.mubr.msk.f32.mxu1 %vm1362_vm9, %v1740_v5 }
 0x916   :  { %1884 = vperm.xlu1 %6768, %v7110_v7  }
 0x91a   :  { %1889 = vperm.xlu1 %6768, %v7113_v8  }
 0x91e   :  { %1894 = vperm.xlu1 %6768, %v7116_v9  }
 0x922   :  { %6770 = vset.pattern.permute.xlu1 %v6865_v23 }
 0x980   :  { %v1449_v24 = vpop.xlane.xlu0 %1448 }
 0x981   :  { %v1446_v30 = vpop.xlane.xlu1 %1445  ;;  %v1451_v31 = vmul.f32 0.125, %v1449_v24 }
 0x982   :  { %v1450_v34 = vmul.f32 0.125, %v1446_v30 }
 0x983   :  { %v1463_v33 = vmul.f32 %v1451_v31, %v1451_v31  ;;  %v1469_v47 = vsub.f32 %v1441_v10, %v1451_v31 }
 0x984   :  { %v1462_v40 = vmul.f32 %v1450_v34, %v1450_v34  ;;  %v1468_v51 = vsub.f32 %v1436_v14, %v1450_v34 }
 0x985   :  { %v1459_v32 = vpop.xlane.xlu1 %1458 }
 0x986   :  { %v1461_v35 = vmul.f32 0.125, %v1459_v32 }
 0x988   :  { %v1465_v37 = vsub.f32 %v1461_v35, %v1463_v33  ;;  %v1482_v49 = vpop.permute.xlu0 %1481 }
 0x989   :  { %v1456_v39 = vpop.xlane.xlu1 %1455 }
 0x98a   :  { %v1467_v41 = vmax.f32 %v1465_v37, 0.0  ;;  %v1460_v42 = vmul.f32 0.125, %v1456_v39 }
 0x98c   :  { %v1471_v43 = vadd.f32 1e-05, %v1467_v41  ;;  %v1464_v44 = vsub.f32 %v1460_v42, %v1462_v40 }
 0x98d   :  { %v1492_v38 = vpop.permute.xlu1 %1491 }
 0x98e   :  { %6816 = vrsqrt.f32 %v1471_v43  ;;  %v1466_v45 = vmax.f32 %v1464_v44, 0.0 }
 0x990   :  { %v1470_v46 = vadd.f32 1e-05, %v1466_v45 }
 0x991   :  { %v1880_v28 = vpop.permute.xlu1 %1879 }
 0x992   :  { %6818 = vrsqrt.f32 %v1470_v46 }
 0x998   :  { %v6817_v48 = vpop.eup %6816 }
 0x999   :  { %v1475_v50 = vmul.f32 %v6817_v48, %v1469_v47 }
 0x99b   :  { %v1485_v52 = vmul.f32 %v1482_v49, %v1475_v50 }
 0x99c   :  { %v6819_v54 = vpop.eup %6818 }
 0x99d   :  { %v1474_v55 = vmul.f32 %v6819_v54, %v1468_v51  ;;  %v1495_v56 = vadd.f32 %v1492_v38, %v1485_v52  ;;  %v2030_v52 = vld [vmem:[%s5509_s1] sm:$0xf]  ;;  %v7177_v38 = vld [vmem:[%s5509_s1 + $0x8] sm:$0xf]  ;;  %s5522_s1 = sld [smem:[%s7618_s0 + %s6896_s28]]  }
 0x99f   :  { %v1484_v57 = vmul.f32 %v1478_v27, %v1474_v55  ;;  %v1497_v61 = vadd.f32 %v1495_v56, %v1137_v58  ;;  %v1743_v27 = vld [vmem:[%s7100_s23 + $0x18] sm:$0xff] }
 0x9a1   :  { %v1494_v60 = vadd.f32 %v1488_v53, %v1484_v57  ;;  %v1499_v2 = vmax.f32 %v1497_v61, 0.0  ;;  %v1885_v53 = vpop.permute.xlu1 %1884 }
 0x9a3   :  { %v1496_v62 = vadd.f32 %v1494_v60, %v1136_v59 }
 0x9a5   :  { %v1498_v63 = vmax.f32 %v1496_v62, 0.0  ;;  %v1890_v29 = vpop.permute.xlu1 %1889 }
 0x9a7   :  { %6098 = vmatprep.mubr.msk.f32.mxu0 %vm1138_vm8, %v1498_v63 }
 0x9a8   :  { %6099 = vmatmul.mubr.msk.f32.vlgmr.msra.gmra.mrb[14].mxu0 %vm1138_vm8, %v1499_v2 }
 0x9a9   :  { %6103 = vmatprep.mubr.msk.f32.mxu0 %vm1138_vm8, %v1498_v63  ;;  %6102 = vmatpush3.msra.mxu0 %v5575_v26  ;;  %v1742_v26 = vld [vmem:[%s7100_s23 + $0x10] sm:$0xff]  ;;  %v1895_v34 = vpop.permute.xlu1 %1894 }
 0x9aa   :  { %6106 = vmatprep.subr.mxu0 %v5578_v3 }
 0x9ac   :  { %6104 = vmatmul.mubr.msk.f32.vlgmr.msra.gmra.mrb[16].mxu0 %vm1138_vm8, %v1499_v2 }
 0x9ad   :  { %6108 = vmatprep.mubr.msk.f32.mxu0 %vm1138_vm8, %v1498_v63  ;;  %6107 = vmatpush3.msra.mxu0 %v5578_v3 }
 0x9ae   :  { %6135 = vmatprep.subr.msk.mxu0 %vm2043_vm11, %v2030_v52 }
 0x9b0   :  { %6109 = vmatmul.mubr.msk.f32.vlgmr.msra.gmra.mrb[18].mxu0 %vm1138_vm8, %v1499_v2 }
 0x9b1   :  { %6136 = vmatpush3.msk.msra.mxu0 %vm2043_vm11, %v2030_v52 }
 0x9b2   :  { %6143 = vmatprep.subr.msk.mxu0 %vm2043_vm11, %v7177_v38 }
 0xa7b   :  { %v6100_v10 = vpop.f32.mrb[14].mxu0 }
 0xa7c   :  { %v1577_v13 = vpop.f32.mrb[15].mxu0 }
 0xa7d   :  { %v6535_v14 = vpack.c.bf16 %v6100_v10, %v1577_v13 }
 0xa7f   :  { %v6105_v15 = vpop.f32.mrb[16].mxu0  ;;  %6536 = vmatprep.subr.bf16.mxu1 %v6535_v14 }
 0xa80   :  { %v1654_v16 = vpop.f32.mrb[17].mxu0  ;;  %6538 = vmatpush3.bf16.msra.mxu1 %v6535_v14 }
 0xa81   :  { %v6539_v17 = vpack.c.bf16 %v6105_v15, %v1654_v16 }
 0xa83   :  { %v6110_v18 = vpop.f32.mrb[18].mxu0  ;;  %6540 = vmatprep.subr.bf16.mxu1 %v6539_v17 }
 0xa84   :  { %v1731_v19 = vpop.f32.mrb[19].mxu0  ;;  %6542 = vmatpush3.bf16.msra.mxu1 %v6539_v17 }
 0xa85   :  { %v6543_v21 = vpack.c.bf16 %v6110_v18, %v1731_v19 }
 0xa87   :  { %6544 = vmatprep.subr.bf16.mxu1 %v6543_v21 }
 0xa88   :  { %6546 = vmatpush3.bf16.msra.mxu1 %v6543_v21 }
 0xa8b   :  { %6124 = vmatmul.mubr.msk.f32.vlgmr.msra.gmra.mrb[16].mxu1 %vm1362_vm9, %v1741_v25 }
 0xa8c   :  { %6126 = vmatprep.mubr.msk.f32.mxu1 %vm1362_vm9, %v1742_v26 }
 0xa8f   :  { %6127 = vmatmul.mubr.msk.f32.gmra.mrb[18].mxu1 %vm1362_vm9, %v1743_v27 }
 0xb5e   :  { %v6125_v24 = vpop.f32.mrb[16].mxu1 }
 0xb5f   :  { %v7126_v30 = vadd.f32 %v6125_v24, %v1885_v53  ;;  %v1838_v31 = vpop.f32.mrb[17].mxu1 }
 0xb60   :  { %v7128_v32 = vadd.f32 %v1880_v28, %v1838_v31 }
 0xb61   :  { %v1925_v33 = vsel %vm1921_vm10, %v7126_v30, 0.0  ;;  %v1939_v39 = vmul.f32 %v7126_v30, %v7126_v30 }
 0xb62   :  { %v6128_v35 = vpop.f32.mrb[18].mxu1  ;;  %1926 = vadd.xlane.f32.xlu1 %v1925_v33  ;;  %v1922_v37 = vsel %vm1921_vm10, %v7128_v32, 0.0  ;;  %v1938_v45 = vmul.f32 %v7128_v32, %v7128_v32 }
 0xb63   :  { %v7136_v40 = vadd.f32 %v6128_v35, %v1895_v34  ;;  %v1848_v41 = vpop.f32.mrb[19].mxu1  ;;  %1923 = vadd.xlane.f32.xlu0 %v1922_v37  ;;  %v1945_v44 = vsel %vm1921_vm10, %v1939_v39, 0.0 }
 0xb64   :  { %v7146_v47 = vadd.f32 %v1890_v29, %v1848_v41  ;;  %v1942_v48 = vsel %vm1921_vm10, %v1938_v45, 0.0 }
 0xb65   :  { %v1931_v42 = vsel %vm1921_vm10, %v7136_v40, 0.0  ;;  %v1941_v43 = vmul.f32 %v7136_v40, %v7136_v40 }
 0xb66   :  { %1932 = vadd.xlane.f32.xlu1 %v1931_v42  ;;  %v1928_v49 = vsel %vm1921_vm10, %v7146_v47, 0.0  ;;  %v1940_v50 = vmul.f32 %v7146_v47, %v7146_v47 }
 0xb67   :  { %1946 = vadd.xlane.f32.xlu0 %v1945_v44  ;;  %v1951_v46 = vsel %vm1921_vm10, %v1941_v43, 0.0 }
 0xb68   :  { %v1948_v51 = vsel %vm1921_vm10, %v1940_v50, 0.0 }
 0xb6a   :  { %1952 = vadd.xlane.f32.xlu1 %v1951_v46 }
 0xb6b   :  { %1943 = vadd.xlane.f32.xlu0 %v1942_v48 }
 0xb6f   :  { %1929 = vadd.xlane.f32.xlu0 %v1928_v49 }
 0xb73   :  { %1949 = vadd.xlane.f32.xlu0 %v1948_v51 }
 0xb7b   :  { %1991 = vperm.xlu1 %6770, %v7110_v7  }
 0xb7f   :  { %6771 = vset.pattern.permute.xlu1 %v6866_v36 }
 0xb80   :  { %2007 = vperm.xlu1 %6771, %v7107_v6  }
 0xb84   :  { %2011 = vperm.xlu1 %6771, %v7110_v7  }
 0xb88   :  { %6772 = vset.pattern.permute.xlu1 %v6865_v23 }
 0xb89   :  { %1995 = vperm.xlu1 %6772, %v7113_v8   ;;  %1987 = vperm.xlu0 %6769, %v7107_v6  }
 0xb8d   :  { %1999 = vperm.xlu1 %6772, %v7116_v9   ;;  %6775 = vset.pattern.permute.xlu0 %v6868_v4 }
 0xb8e   :  { %2231 = vperm.xlu0 %6775, %v7110_v7  }
 0xb91   :  { %6773 = vset.pattern.permute.xlu1 %v6866_v36 }
 0xb92   :  { %2015 = vperm.xlu1 %6773, %v7113_v8   ;;  %6777 = vset.pattern.permute.xlu0 %v6871_v12 }
 0xb93   :  { %2409 = vperm.xlu0 %6777, %v7110_v7  }
 0xb96   :  { %2019 = vperm.xlu1 %6773, %v7116_v9  }
 0xb97   :  { %6785 = vset.pattern.permute.xlu0 %v6870_v11 }
 0xb9a   :  { %6774 = vset.pattern.permute.xlu1 %v6868_v4 }
 0xb9b   :  { %2227 = vperm.xlu1 %6774, %v7107_v6  }
 0xb9f   :  { %2235 = vperm.xlu1 %6774, %v7113_v8  }
 0xba3   :  { %2239 = vperm.xlu1 %6774, %v7116_v9  }
 0xba7   :  { %6776 = vset.pattern.permute.xlu1 %v6871_v12 }
 0xba8   :  { %2405 = vperm.xlu1 %6776, %v7107_v6  }
 0xbac   :  { %6778 = vset.pattern.permute.xlu1 %v6870_v11 }
 0xbad   :  { %1902 = vperm.xlu1 %6778, %v7107_v6  }
 0xbb1   :  { %6779 = vset.pattern.permute.xlu1 %v6872_v20 }
 0xbb2   :  { %2425 = vperm.xlu1 %6779, %v7107_v6  }
 0xbb6   :  { %6780 = vset.pattern.permute.xlu1 %v6870_v11 }
 0xbb7   :  { %1906 = vperm.xlu1 %6780, %v7110_v7  }
 0xbbb   :  { %6781 = vset.pattern.permute.xlu1 %v6872_v20 }
 0xbbc   :  { %2429 = vperm.xlu1 %6781, %v7110_v7  }
 0xbc0   :  { %6782 = vset.pattern.permute.xlu1 %v6871_v12 }
 0xbc1   :  { %2413 = vperm.xlu1 %6782, %v7113_v8  }
 0xbc5   :  { %2417 = vperm.xlu1 %6782, %v7116_v9  }
 0xbc9   :  { %6783 = vset.pattern.permute.xlu1 %v6870_v11 }
 0xbca   :  { %1910 = vperm.xlu1 %6783, %v7113_v8  }
 0xbce   :  { %6784 = vset.pattern.permute.xlu1 %v6872_v20 }
 0xbcf   :  { %2433 = vperm.xlu1 %6784, %v7113_v8  }
 0xbef   :  { %v1927_v54 = vpop.xlane.xlu1 %1926 }
 0xbf0   :  { %v1924_v55 = vpop.xlane.xlu0 %1923  ;;  %v1935_v56 = vmul.f32 0.25, %v1927_v54 }
 0xbf1   :  { %v1934_v61 = vmul.f32 0.25, %v1924_v55 }
 0xbf2   :  { %v1959_v60 = vmul.f32 %v1935_v56, %v1935_v56  ;;  %v1971_v33 = vsub.f32 %v7126_v30, %v1935_v56 }
 0xbf3   :  { %v1933_v57 = vpop.xlane.xlu1 %1932  ;;  %v1958_v6 = vmul.f32 %v1934_v61, %v1934_v61  ;;  %v1970_v41 = vsub.f32 %v7128_v32, %v1934_v61 }
 0xbf4   :  { %v1937_v58 = vmul.f32 0.25, %v1933_v57  ;;  %v1947_v59 = vpop.xlane.xlu0 %1946 }
 0xbf5   :  { %v1955_v62 = vmul.f32 0.25, %v1947_v59 }
 0xbf6   :  { %v1961_v3 = vmul.f32 %v1937_v58, %v1937_v58  ;;  %v1973_v49 = vsub.f32 %v7136_v40, %v1937_v58 }
 0xbf7   :  { %v1963_v63 = vsub.f32 %v1955_v62, %v1959_v60  ;;  %v1953_v2 = vpop.xlane.xlu1 %1952 }
 0xbf8   :  { %v1957_v5 = vmul.f32 0.25, %v1953_v2  ;;  %v1944_v11 = vpop.xlane.xlu0 %1943 }
 0xbf9   :  { %v1967_v7 = vmax.f32 %v1963_v63, 0.0  ;;  %v1954_v10 = vmul.f32 0.25, %v1944_v11  ;;  %v1746_v11 = vld [vmem:[%s7100_s23 + $0x30] sm:$0xff] }
 0xbfa   :  { %v1965_v13 = vsub.f32 %v1957_v5, %v1961_v3  ;;  %v1744_v5 = vld [vmem:[%s7100_s23 + $0x20] sm:$0xff] }
 0xbfb   :  { %v1975_v14 = vadd.f32 1e-05, %v1967_v7  ;;  %v1962_v8 = vsub.f32 %v1954_v10, %v1958_v6  ;;  %v1992_v15 = vpop.permute.xlu1 %1991  ;;  %6129 = vmatprep.mubr.msk.f32.mxu1 %vm1362_vm9, %v1744_v5  ;;  %v1747_v6 = vld [vmem:[%s7100_s23 + $0x38] sm:$0xff]  ;;  %v2222_v7 = vld [vmem:[%s7222_s5] sm:$0xff] }
 0xbfc   :  { %v1969_v16 = vmax.f32 %v1965_v13, 0.0  ;;  %v1930_v17 = vpop.xlane.xlu0 %1929 }
 0xbfd   :  { %6820 = vrsqrt.f32 %v1975_v14  ;;  %v1966_v18 = vmax.f32 %v1962_v8, 0.0  ;;  %v1936_v19 = vmul.f32 0.25, %v1930_v17 }
 0xbfe   :  { %v1977_v21 = vadd.f32 1e-05, %v1969_v16 }
 0xbff   :  { %v1974_v25 = vadd.f32 1e-05, %v1966_v18  ;;  %v2008_v26 = vpop.permute.xlu1 %2007  ;;  %v1960_v28 = vmul.f32 %v1936_v19, %v1936_v19  ;;  %v1972_v55 = vsub.f32 %v7146_v47, %v1936_v19 }
 0xc00   :  { %v1950_v27 = vpop.xlane.xlu0 %1949 }
 0xc01   :  { %6822 = vrsqrt.f32 %v1974_v25  ;;  %v1956_v53 = vmul.f32 0.25, %v1950_v27  ;;  %v2223_v27 = vld [vmem:[%s7222_s5 + $0x8] sm:$0xff] }
 0xc02   :  { %6824 = vrsqrt.f32 %v1977_v21 }
 0xc03   :  { %v1964_v29 = vsub.f32 %v1956_v53, %v1960_v28  ;;  %v2012_v24 = vpop.permute.xlu1 %2011  ;;  %v2224_v28 = vld [vmem:[%s7222_s5 + $0x10] sm:$0xff]  ;;  %v2225_v53 = vld [vmem:[%s7222_s5 + $0x18] sm:$0xff]  ;;  %s5520_s5 = sld [smem:[%s7618_s0 + %s6897_s2]]  }
 0xc05   :  { %v1968_v31 = vmax.f32 %v1964_v29, 0.0 }
 0xc07   :  { %v6821_v34 = vpop.eup %6820  ;;  %v1976_v35 = vadd.f32 1e-05, %v1968_v31 }
 0xc08   :  { %v1983_v37 = vmul.f32 %v6821_v34, %v1971_v33  ;;  %v1996_v39 = vpop.permute.xlu1 %1995  ;;  %v1988_v44 = vpop.permute.xlu0 %1987 }
 0xc09   :  { %6826 = vrsqrt.f32 %v1976_v35 }
 0xc0a   :  { %v2003_v42 = vmul.f32 %v1992_v15, %v1983_v37 }
 0xc0b   :  { %v6823_v43 = vpop.eup %6822 }
 0xc0c   :  { %v2000_v45 = vpop.permute.xlu1 %1999  ;;  %v1982_v46 = vmul.f32 %v6823_v43, %v1970_v41  ;;  %v6825_v48 = vpop.eup %6824  ;;  %v2023_v50 = vadd.f32 %v2012_v24, %v2003_v42 }
 0xc0d   :  { %v1985_v52 = vmul.f32 %v6825_v48, %v1973_v49  ;;  %v2232_v34 = vpop.permute.xlu0 %2231 }
 0xc0e   :  { %v2002_v51 = vmul.f32 %v1988_v44, %v1982_v46  ;;  %v2027_v56 = vmax.f32 %v2023_v50, 0.0 }
 0xc0f   :  { %v2005_v32 = vmul.f32 %v2000_v45, %v1985_v52 }
 0xc10   :  { %v2022_v54 = vadd.f32 %v2008_v26, %v2002_v51 }
 0xc11   :  { %v2016_v30 = vpop.permute.xlu1 %2015 }
 0xc12   :  { %v2026_v57 = vmax.f32 %v2022_v54, 0.0 }
 0xc13   :  { %v6827_v59 = vpop.eup %6826 }
 0xc14   :  { %v1984_v60 = vmul.f32 %v6827_v59, %v1972_v55  ;;  %6137 = vmatprep.mubr.msk.f32.mxu0 %vm1921_vm10, %v2026_v57  ;;  %v6555_v61 = vpack.c.bf16 %v2027_v56, %v2026_v57 }
 0xc15   :  { %6138 = vmatmul.mubr.msk.f32.vlgmr.msra.gmra.mrb[20].mxu0 %vm1921_vm10, %v2027_v56  ;;  %v2020_v62 = vpop.permute.xlu1 %2019 }
 0xc16   :  { %v2004_v40 = vmul.f32 %v1996_v39, %v1984_v60  ;;  %v2025_v58 = vadd.f32 %v2020_v62, %v2005_v32  ;;  %6144 = vmatpush3.msk.msra.mxu0 %vm2043_vm11, %v7177_v38  ;;  %v1745_v38 = vld [vmem:[%s7100_s23 + $0x28] sm:$0xff]  ;;  %v2452_v62 = vld [vmem:[%s5511_s9] sm:$0xf]  ;;  %s7382_s23 = sld [smem:[%s7618_s0 + %s6894_s20]]  }
 0xc17   :  { %6130 = vmatmul.mubr.msk.f32.gmra.mrb[20].mxu1 %vm1362_vm9, %v1745_v38  ;;  %6181 = vmatprep.subr.msk.mxu0 %vm2043_vm11, %v2452_v62 }
 0xc18   :  { %v2024_v47 = vadd.f32 %v2016_v30, %v2004_v40  ;;  %v2029_v2 = vmax.f32 %v2025_v58, 0.0  ;;  %6132 = vmatprep.mubr.msk.f32.mxu1 %vm1362_vm9, %v1746_v11  ;;  %v7280_v40 = vld [vmem:[%s5511_s9 + $0x4] sm:$0xf]  ;;  %s7470_s9 = sld [smem:[%s7618_s0 + %s6898_s6]]  }
 0xc1a   :  { %v2028_v63 = vmax.f32 %v2024_v47, 0.0  ;;  %v2228_v35 = vpop.permute.xlu1 %2227 }
 0xc1b   :  { %6133 = vmatmul.mubr.msk.f32.gmra.mrb[22].mxu1 %vm1362_vm9, %v1747_v6  ;;  %v2410_v6 = vpop.permute.xlu0 %2409 }
 0xc1c   :  { %6140 = vmatprep.mubr.msk.f32.mxu0 %vm1921_vm10, %v2028_v63  ;;  %v6559_v3 = vpack.c.bf16 %v2029_v2, %v2028_v63  ;;  %6175 = vmatprep.mubr.msk.f32.mxu1 %vm2242_vm12, %v2222_v7 }
 0xc1d   :  { %6141 = vmatmul.mubr.msk.f32.gmra.mrb[22].mxu0 %vm1921_vm10, %v2029_v2 }
 0xc1e   :  { %6145 = vmatprep.mubr.msk.f32.mxu0 %vm1921_vm10, %v2026_v57  ;;  %v2236_v48 = vpop.permute.xlu1 %2235 }
 0xc21   :  { %6146 = vmatmul.mubr.msk.f32.vlgmr.msra.gmra.mrb[24].mxu0 %vm1921_vm10, %v2027_v56 }
 0xc22   :  { %6148 = vmatprep.mubr.msk.f32.mxu0 %vm1921_vm10, %v2028_v63  ;;  %v2240_v55 = vpop.permute.xlu1 %2239  ;;  %6182 = vmatpush3.msk.msra.mxu0 %vm2043_vm11, %v2452_v62 }
 0xc23   :  { %6189 = vmatprep.subr.msk.mxu0 %vm2043_vm11, %v7280_v40 }
 0xc25   :  { %6149 = vmatmul.mubr.msk.f32.gmra.mrb[26].mxu0 %vm1921_vm10, %v2029_v2 }
 0xc27   :  { %v2406_v58 = vpop.permute.xlu1 %2405 }
 0xc2c   :  { %v1903_v47 = vpop.permute.xlu1 %1902 }
 0xce8   :  { %v6139_v10 = vpop.f32.mrb[20].mxu0 }
 0xce9   :  { %v2113_v13 = vpop.f32.mrb[21].mxu0 }
 0xcea   :  { %v6547_v14 = vpack.c.bf16 %v6139_v10, %v2113_v13  ;;  %v7235_v29 = vpop.f32.mrb[20].mxu1 }
 0xceb   :  { %v7237_v24 = vpop.f32.mrb[21].mxu1 }
 0xcec   :  { %6548 = vmatprep.subr.bf16.mxu1 %v6547_v14 }
 0xced   :  { %6550 = vmatpush3.bf16.msra.mxu1 %v6547_v14 }
 0xcee   :  { %v7239_v31 = vpop.f32.mrb[22].mxu1 }
 0xcef   :  { %v7241_v33 = vpop.f32.mrb[23].mxu1 }
 0xcf0   :  { %v6142_v8 = vpop.f32.mrb[22].mxu0 }
 0xcf1   :  { %v2123_v15 = vpop.f32.mrb[23].mxu0 }
 0xcf2   :  { %v6551_v16 = vpack.c.bf16 %v6142_v8, %v2123_v15 }
 0xcf4   :  { %v6147_v17 = vpop.f32.mrb[24].mxu0  ;;  %6552 = vmatprep.subr.bf16.mxu1 %v6551_v16 }
 0xcf5   :  { %v2203_v18 = vpop.f32.mrb[25].mxu0  ;;  %6554 = vmatpush3.bf16.msra.mxu1 %v6551_v16 }
 0xcf6   :  { %v6563_v19 = vpack.c.bf16 %v6147_v17, %v2203_v18  ;;  %6556 = vmatprep.subr.bf16.mxu1 %v6555_v61 }
 0xcf8   :  { %v6150_v21 = vpop.f32.mrb[26].mxu0 }
 0xcf9   :  { %v2213_v25 = vpop.f32.mrb[27].mxu0  ;;  %6558 = vmatpush3.bf16.msra.mxu1 %v6555_v61 }
 0xcfa   :  { %v6567_v26 = vpack.c.bf16 %v6150_v21, %v2213_v25  ;;  %6560 = vmatprep.subr.bf16.mxu1 %v6559_v3 }
 0xcfd   :  { %6562 = vmatpush3.bf16.msra.mxu1 %v6559_v3 }
 0xcfe   :  { %6564 = vmatprep.subr.bf16.mxu1 %v6563_v19 }
 0xd01   :  { %6566 = vmatpush3.bf16.msra.mxu1 %v6563_v19 }
 0xd02   :  { %6568 = vmatprep.subr.bf16.mxu1 %v6567_v26 }
 0xd05   :  { %6570 = vmatpush3.bf16.msra.mxu1 %v6567_v26 }
 0xd08   :  { %6176 = vmatmul.mubr.msk.f32.vlgmr.msra.gmra.mrb[24].mxu1 %vm2242_vm12, %v2223_v27 }
 0xd09   :  { %6178 = vmatprep.mubr.msk.f32.mxu1 %vm2242_vm12, %v2224_v28 }
 0xd0c   :  { %6179 = vmatmul.mubr.msk.f32.gmra.mrb[26].mxu1 %vm2242_vm12, %v2225_v53 }
 0xddb   :  { %v6177_v37 = vpop.f32.mrb[24].mxu1 }
 0xddc   :  { %v7243_v39 = vadd.f32 %v6177_v37, %v2232_v34  ;;  %v2321_v41 = vpop.f32.mrb[25].mxu1 }
 0xddd   :  { %v7245_v42 = vadd.f32 %v2321_v41, %v2228_v35 }
 0xdde   :  { %v2343_v43 = vsel %vm1921_vm10, %v7243_v39, 0.0  ;;  %v2357_v46 = vmul.f32 %v7243_v39, %v7243_v39 }
 0xddf   :  { %2344 = vadd.xlane.f32.xlu1 %v2343_v43  ;;  %v6180_v44 = vpop.f32.mrb[26].mxu1  ;;  %v2340_v45 = vsel %vm1921_vm10, %v7245_v42, 0.0  ;;  %v2356_v54 = vmul.f32 %v7245_v42, %v7245_v42 }
 0xde0   :  { %v2331_v49 = vpop.f32.mrb[27].mxu1  ;;  %2341 = vadd.xlane.f32.xlu0 %v2340_v45  ;;  %v2363_v51 = vsel %vm1921_vm10, %v2357_v46, 0.0  ;;  %v7262_v56 = vadd.f32 %v6180_v44, %v2240_v55 }
 0xde1   :  { %v7253_v50 = vadd.f32 %v2331_v49, %v2236_v48  ;;  %v2360_v57 = vsel %vm1921_vm10, %v2356_v54, 0.0 }
 0xde2   :  { %v2349_v60 = vsel %vm1921_vm10, %v7262_v56, 0.0  ;;  %v2359_v32 = vmul.f32 %v7262_v56, %v7262_v56 }
 0xde3   :  { %v2346_v52 = vsel %vm1921_vm10, %v7253_v50, 0.0  ;;  %v2358_v30 = vmul.f32 %v7253_v50, %v7253_v50 }
 0xde4   :  { %2364 = vadd.xlane.f32.xlu0 %v2363_v51  ;;  %2347 = vadd.xlane.f32.xlu1 %v2346_v52  ;;  %v2369_v61 = vsel %vm1921_vm10, %v2359_v32, 0.0 }
 0xde5   :  { %v2366_v59 = vsel %vm1921_vm10, %v2358_v30, 0.0 }
 0xde8   :  { %2361 = vadd.xlane.f32.xlu0 %v2360_v57  ;;  %2367 = vadd.xlane.f32.xlu1 %v2366_v59 }
 0xdec   :  { %2350 = vadd.xlane.f32.xlu0 %v2349_v60 }
 0xdf0   :  { %2370 = vadd.xlane.f32.xlu0 %v2369_v61 }
 0xdf9   :  { %2437 = vperm.xlu1 %6784, %v7116_v9  }
 0xdfd   :  { %6786 = vset.pattern.permute.xlu1 %v6863_v22 }
 0xe06   :  { %1914 = vperm.xlu0 %6785, %v7116_v9   ;;  %v2426_v9 = vpop.permute.xlu1 %2425 }
 0xe0a   :  { %6787 = vset.pattern.permute.xlu0 %v6863_v22  ;;  %v1907_v63 = vpop.permute.xlu1 %1906 }
 0xe0e   :  { %v2430_v2 = vpop.permute.xlu1 %2429 }
 0xe12   :  { %v2414_v3 = vpop.permute.xlu1 %2413 }
 0xe16   :  { %v7284_v5 = vpop.permute.xlu1 %2417 }
 0xe1a   :  { %v1911_v38 = vpop.permute.xlu1 %1910 }
 0xe1e   :  { %v2434_v11 = vpop.permute.xlu1 %2433 }
 0xe6c   :  { %v2345_v7 = vpop.xlane.xlu1 %2344 }
 0xe6d   :  { %v2342_v10 = vpop.xlane.xlu0 %2341  ;;  %v2353_v13 = vmul.f32 0.25, %v2345_v7 }
 0xe6e   :  { %v2352_v14 = vmul.f32 0.25, %v2342_v10 }
 0xe6f   :  { %v2377_v16 = vmul.f32 %v2353_v13, %v2353_v13  ;;  %v2389_v57 = vsub.f32 %v7243_v39, %v2353_v13  ;;  %v1917_v39 = vadd.f32 %v1903_v47, %v7237_v24 }
 0xe70   :  { %v2376_v21 = vmul.f32 %v2352_v14, %v2352_v14  ;;  %v2388_v61 = vsub.f32 %v7245_v42, %v2352_v14 }
 0xe71   :  { %v2365_v8 = vpop.xlane.xlu0 %2364  ;;  %v2348_v15 = vpop.xlane.xlu1 %2347 }
 0xe72   :  { %v2373_v17 = vmul.f32 0.25, %v2365_v8  ;;  %v2354_v18 = vmul.f32 0.25, %v2348_v15 }
 0xe74   :  { %v2381_v19 = vsub.f32 %v2373_v17, %v2377_v16  ;;  %v2378_v28 = vmul.f32 %v2354_v18, %v2354_v18  ;;  %v2390_v10 = vsub.f32 %v7253_v50, %v2354_v18 }
 0xe75   :  { %v2362_v25 = vpop.xlane.xlu0 %2361  ;;  %v2368_v26 = vpop.xlane.xlu1 %2367 }
 0xe76   :  { %v2385_v27 = vmax.f32 %v2381_v19, 0.0  ;;  %v2372_v53 = vmul.f32 0.25, %v2362_v25  ;;  %v2374_v34 = vmul.f32 0.25, %v2368_v26  ;;  %v1919_v26 = vadd.f32 %v1911_v38, %v7241_v33  ;;  %v2650_v38 = vld [vmem:[%s5513_s17 + $0x18] sm:$0xff] }
 0xe78   :  { %v2393_v35 = vadd.f32 1e-05, %v2385_v27  ;;  %v2380_v37 = vsub.f32 %v2372_v53, %v2376_v21  ;;  %v2382_v41 = vsub.f32 %v2374_v34, %v2378_v28  ;;  %v1918_v21 = vadd.f32 %v7235_v29, %v1907_v63  ;;  %v2648_v63 = vld [vmem:[%s5513_s17 + $0x8] sm:$0xff] }
 0xe79   :  { %v2351_v43 = vpop.xlane.xlu0 %2350  ;;  %v2438_v24 = vpop.permute.xlu1 %2437  ;;  %2658 = vperm.xlu0 %6787, %v2648_v63  }
 0xe7a   :  { %6828 = vrsqrt.f32 %v2393_v35  ;;  %v2384_v44 = vmax.f32 %v2380_v37, 0.0  ;;  %v2386_v45 = vmax.f32 %v2382_v41, 0.0  ;;  %v2355_v46 = vmul.f32 0.25, %v2351_v43  ;;  %v2775_v35 = vld [vmem:[%s5515_s21] sm:$0xff]  ;;  %v2891_v37 = vld [vmem:[%s5517_s25 + $0x30] sm:$0xff]  ;;  %v2890_v41 = vld [vmem:[%s5517_s25 + $0x28] sm:$0xff] }
 0xe7b   :  { %v2885_v43 = vld [vmem:[%s5517_s25] sm:$0xff] }
 0xe7c   :  { %v2392_v48 = vadd.f32 1e-05, %v2384_v44  ;;  %v2394_v49 = vadd.f32 1e-05, %v2386_v45  ;;  %v2379_v52 = vmul.f32 %v2355_v46, %v2355_v46  ;;  %v2391_v42 = vsub.f32 %v7262_v56, %v2355_v46  ;;  %v2892_v44 = vld [vmem:[%s5517_s25 + $0x38] sm:$0xff]  ;;  %v2887_v45 = vld [vmem:[%s5517_s25 + $0x10] sm:$0xff] }
 0xe7d   :  { %v2371_v51 = vpop.xlane.xlu0 %2370  ;;  %v2886_v46 = vld [vmem:[%s5517_s25 + $0x8] sm:$0xff] }
 0xe7e   :  { %6830 = vrsqrt.f32 %v2392_v48  ;;  %v2375_v54 = vmul.f32 0.25, %v2371_v51  ;;  %v7324_v48 = vld [vmem:[%s5523_s29] sm:$0xff]  ;;  %v7327_v51 = vld [vmem:[%s5523_s29 + $0x8] sm:$0xff]  ;;  %s5531_s29 = sld [smem:[%s7618_s0 + %s6903_s26]]  }
 0xe7f   :  { %6832 = vrsqrt.f32 %v2394_v49  ;;  %v2888_v49 = vld [vmem:[%s5517_s25 + $0x18] sm:$0xff] }
 0xe80   :  { %v2383_v30 = vsub.f32 %v2375_v54, %v2379_v52 }
 0xe82   :  { %v2387_v55 = vmax.f32 %v2383_v30, 0.0 }
 0xe84   :  { %v6829_v59 = vpop.eup %6828  ;;  %v2395_v60 = vadd.f32 1e-05, %v2387_v55 }
 0xe85   :  { %v2401_v32 = vmul.f32 %v6829_v59, %v2389_v57 }
 0xe86   :  { %6834 = vrsqrt.f32 %v2395_v60 }
 0xe87   :  { %v2421_v62 = vmul.f32 %v2410_v6, %v2401_v32 }
 0xe88   :  { %v6831_v7 = vpop.eup %6830 }
 0xe89   :  { %v6833_v8 = vpop.eup %6832  ;;  %v2400_v15 = vmul.f32 %v6831_v7, %v2388_v61  ;;  %v2441_v16 = vadd.f32 %v2430_v2, %v2421_v62  ;;  %v1915_v2 = vpop.permute.xlu0 %1914 }
 0xe8a   :  { %v2402_v17 = vmul.f32 %v6833_v8, %v2390_v10  ;;  %v1920_v33 = vadd.f32 %v7239_v31, %v1915_v2  ;;  %v2643_v31 = vld [vmem:[%s7308_s13] sm:$0xff]  ;;  %v2644_v8 = vld [vmem:[%s7308_s13 + $0x8] sm:$0xff] }
 0xe8b   :  { %v2420_v19 = vmul.f32 %v2406_v58, %v2400_v15  ;;  %v2445_v27 = vadd.f32 %v2441_v16, %v1918_v21  ;;  %v2645_v15 = vld [vmem:[%s7308_s13 + $0x10] sm:$0xff]  ;;  %v2646_v16 = vld [vmem:[%s7308_s13 + $0x18] sm:$0xff]  ;;  %s5524_s13 = sld [smem:[%s7618_s0 + %s6899_s10]]  }
 0xe8c   :  { %v2422_v25 = vmul.f32 %v2414_v3, %v2402_v17  ;;  %v2649_v3 = vld [vmem:[%s5513_s17 + $0x10] sm:$0xff]  ;;  %v2773_v17 = vld [vmem:[%s5514_s3] sm:$0xff] }
 0xe8d   :  { %v2440_v13 = vadd.f32 %v2426_v9, %v2420_v19  ;;  %v2449_v34 = vmax.f32 %v2445_v27, 0.0  ;;  %6227 = vmatprep.mubr.msk.f32.mxu1 %vm176_vm1, %v2773_v17 }
 0xe8e   :  { %v2442_v28 = vadd.f32 %v2434_v11, %v2422_v25  ;;  %v2889_v11 = vld [vmem:[%s5517_s25 + $0x20] sm:$0xff]  ;;  %s5525_s25 = sld [smem:[%s7618_s0 + %s6902_s22]]  }
 0xe8f   :  { %v2444_v6 = vadd.f32 %v2440_v13, %v1917_v39 }
 0xe90   :  { %v6835_v14 = vpop.eup %6834  ;;  %v2446_v50 = vadd.f32 %v2442_v28, %v1919_v26 }
 0xe91   :  { %v2403_v18 = vmul.f32 %v6835_v14, %v2391_v42  ;;  %v2448_v53 = vmax.f32 %v2444_v6, 0.0 }
 0xe92   :  { %v2450_v29 = vmax.f32 %v2446_v50, 0.0 }
 0xe93   :  { %v2423_v58 = vmul.f32 %v7284_v5, %v2403_v18  ;;  %6183 = vmatprep.mubr.msk.f32.mxu0 %vm1921_vm10, %v2448_v53  ;;  %v2776_v5 = vld [vmem:[%s5515_s21 + $0x8] sm:$0xff]  ;;  %s5527_s21 = sld [smem:[%s7618_s0 + %s6901_s18]]  }
 0xe94   :  { %6184 = vmatmul.mubr.msk.f32.vlgmr.msra.gmra.mrb[28].mxu0 %vm1921_vm10, %v2449_v34  ;;  %2784 = vperm.xlu0 %6787, %v2776_v5  }
 0xe95   :  { %v2443_v47 = vadd.f32 %v2438_v24, %v2423_v58  ;;  %6186 = vmatprep.mubr.msk.f32.mxu0 %vm1921_vm10, %v2450_v29  ;;  %6190 = vmatpush3.msk.msra.mxu0 %vm2043_vm11, %v7280_v40  ;;  %v2647_v40 = vld [vmem:[%s5513_s17] sm:$0xff]  ;;  %v2774_v24 = vld [vmem:[%s5514_s3 + $0x8] sm:$0xff]  ;;  %s5528_s17 = sld [smem:[%s7618_s0 + %s6900_s14]]  }
 0xe96   :  { %2653 = vperm.xlu1 %6786, %v2647_v40   ;;  %s5533_s3 = sld [smem:[%s7618_s0 + %s6904_s30]]  }
 0xe97   :  { %v2447_v56 = vadd.f32 %v2443_v47, %v1920_v33  ;;  %v2877_v33 = vld [vmem:[%s7346_s7] sm:$0xff] }
 0xe98   :  { %2915 = vperm.xlu0 %6787, %v2889_v11  }
 0xe99   :  { %v2451_v9 = vmax.f32 %v2447_v56, 0.0 }
 0xe9a   :  { %2663 = vperm.xlu1 %6786, %v2649_v3  }
 0xe9b   :  { %6187 = vmatmul.mubr.msk.f32.gmra.mrb[30].mxu0 %vm1921_vm10, %v2451_v9 }
 0xe9c   :  { %6191 = vmatprep.mubr.msk.f32.mxu0 %vm1921_vm10, %v2448_v53  ;;  %2925 = vperm.xlu0 %6787, %v2891_v37  }
 0xe9e   :  { %2668 = vperm.xlu1 %6786, %v2650_v38   ;;  %v170_v38 = vld [vmem:[%s5495_s15] sm:$0xff]  ;;  %s5530_s15 = sld [smem:[%s7618_s0 + %s6907_s12]]  }
 0xe9f   :  { %6192 = vmatmul.mubr.msk.f32.vlgmr.msra.gmra.mrb[32].mxu0 %vm1921_vm10, %v2449_v34 }
 0xea0   :  { %6194 = vmatprep.mubr.msk.f32.mxu0 %vm1921_vm10, %v2450_v29  ;;  %2895 = vperm.xlu0 %6787, %v2885_v43   ;;  %v2879_v43 = vld [vmem:[%s7346_s7 + $0x10] sm:$0xff] }
 0xea2   :  { %2779 = vperm.xlu1 %6786, %v2775_v35  }
 0xea3   :  { %6195 = vmatmul.mubr.msk.f32.gmra.mrb[34].mxu0 %vm1921_vm10, %v2451_v9 }
 0xea4   :  { %6213 = vmatprep.mubr.msk.f32.mxu0 %vm2671_vm13, %v2643_v31  ;;  %2905 = vperm.xlu0 %6787, %v2887_v45   ;;  %v2881_v45 = vld [vmem:[%s7346_s7 + $0x20] sm:$0xff] }
 0xea6   :  { %2920 = vperm.xlu1 %6786, %v2890_v41   ;;  %v2878_v41 = vld [vmem:[%s7346_s7 + $0x8] sm:$0xff] }
 0xea8   :  { %3729 = vperm.xlu0 %6787, %v7324_v48  }
 0xeaa   :  { %2930 = vperm.xlu1 %6786, %v2892_v44   ;;  %v2880_v44 = vld [vmem:[%s7346_s7 + $0x18] sm:$0xff] }
 0xeac   :  { %6788 = vset.pattern.permute.xlu0 %v6865_v23 }
 0xeae   :  { %2900 = vperm.xlu1 %6786, %v2886_v46   ;;  %v2882_v46 = vld [vmem:[%s7346_s7 + $0x28] sm:$0xff] }
 0xeb2   :  { %2910 = vperm.xlu1 %6786, %v2888_v49   ;;  %v2883_v49 = vld [vmem:[%s7346_s7 + $0x30] sm:$0xff] }
 0xeb6   :  { %3734 = vperm.xlu1 %6786, %v7327_v51  }
 0xeba   :  { %6789 = vset.pattern.permute.xlu1 %v6865_v23 }
 0xef8   :  { %v2659_v25 = vpop.permute.xlu0 %2658 }
 0xf13   :  { %v2785_v47 = vpop.permute.xlu0 %2784 }
 0xf15   :  { %v2654_v19 = vpop.permute.xlu1 %2653 }
 0xf19   :  { %v2664_v21 = vpop.permute.xlu1 %2663 }
 0xf1d   :  { %v2669_v42 = vpop.permute.xlu1 %2668 }
 0xf21   :  { %v2780_v9 = vpop.permute.xlu1 %2779 }
 0xf67   :  { %v6185_v52 = vpop.f32.mrb[28].mxu0 }
 0xf68   :  { %v2534_v54 = vpop.f32.mrb[29].mxu0 }
 0xf69   :  { %v6571_v30 = vpack.c.bf16 %v6185_v52, %v2534_v54  ;;  %v2884_v52 = vld [vmem:[%s7346_s7 + $0x38] sm:$0xff]  ;;  %v5629_v54 = vld [vmem:[%s5518_s19 + $0x2] sm:$0x3]  ;;  %s5529_s7 = sld [smem:[%s7618_s0 + %s6905_s4]]  }
 0xf6b   :  { %6572 = vmatprep.subr.bf16.mxu0 %v6571_v30 }
 0xf6c   :  { %6574 = vmatpush3.bf16.msra.mxu0 %v6571_v30  ;;  %v3062_v30 = vld [vmem:[%s5518_s19] sm:$0x3]  ;;  %s5535_s19 = sld [smem:[%s7618_s0 + %s6908_s16]]  }
 0xf6e   :  { %v6188_v55 = vpop.f32.mrb[30].mxu0 }
 0xf6f   :  { %v2544_v57 = vpop.f32.mrb[31].mxu0 }
 0xf70   :  { %v6575_v59 = vpack.c.bf16 %v6188_v55, %v2544_v57  ;;  %v3267_v55 = vld [vmem:[%s7382_s23] sm:$0xf] }
 0xf72   :  { %v6193_v60 = vpop.f32.mrb[32].mxu0  ;;  %6576 = vmatprep.subr.bf16.mxu0 %v6575_v59 }
 0xf73   :  { %v2624_v32 = vpop.f32.mrb[33].mxu0  ;;  %6578 = vmatpush3.bf16.msra.mxu0 %v6575_v59  ;;  %v2916_v59 = vpop.permute.xlu0 %2915 }
 0xf74   :  { %v6579_v61 = vpack.c.bf16 %v6193_v60, %v2624_v32  ;;  %v2921_v32 = vpop.permute.xlu1 %2920 }
 0xf76   :  { %v6196_v62 = vpop.f32.mrb[34].mxu0  ;;  %6580 = vmatprep.subr.bf16.mxu0 %v6579_v61 }
 0xf77   :  { %v2634_v7 = vpop.f32.mrb[35].mxu0  ;;  %6582 = vmatpush3.bf16.msra.mxu0 %v6579_v61 }
 0xf78   :  { %v6583_v10 = vpack.c.bf16 %v6196_v62, %v2634_v7  ;;  %v2926_v7 = vpop.permute.xlu0 %2925 }
 0xf7a   :  { %6584 = vmatprep.subr.bf16.mxu0 %v6583_v10 }
 0xf7b   :  { %6586 = vmatpush3.bf16.msra.mxu0 %v6583_v10 }
 0xf7c   :  { %6244 = vmatprep.subr.msk.mxu0 %vm408_vm4, %v5629_v54 }
 0xf7e   :  { %6214 = vmatmul.mubr.msk.f32.vlgmr.msra.gmra.mrb[36].mxu0 %vm2671_vm13, %v2644_v8 }
 0xf7f   :  { %6216 = vmatprep.mubr.msk.f32.mxu0 %vm2671_vm13, %v2645_v15  ;;  %6245 = vmatpush3.msk.msra.mxu0 %vm408_vm4, %v5629_v54  ;;  %v2931_v15 = vpop.permute.xlu1 %2930 }
 0xf80   :  { %6252 = vmatprep.subr.msk.mxu0 %vm408_vm4, %v3062_v30 }
 0xf82   :  { %6217 = vmatmul.mubr.msk.f32.gmra.mrb[38].mxu0 %vm2671_vm13, %v2646_v16 }
0x1051   :  { %v6215_v39 = vpop.f32.mrb[36].mxu0 }
0x1052   :  { %v2756_v13 = vadd.f32 %v6215_v39, %v2659_v25  ;;  %v2750_v26 = vpop.f32.mrb[37].mxu0 }
0x1053   :  { %v2751_v27 = vadd.f32 %v2750_v26, %v2654_v19  ;;  %v2901_v26 = vpop.permute.xlu1 %2900 }
0x1054   :  { %v2770_v28 = vmax.f32 %v2756_v13, 0.0 }
0x1055   :  { %v2769_v6 = vmax.f32 %v2751_v27, 0.0  ;;  %v6218_v14 = vpop.f32.mrb[38].mxu0 }
0x1056   :  { %v2766_v50 = vadd.f32 %v6218_v14, %v2669_v42  ;;  %v2760_v18 = vpop.f32.mrb[39].mxu0 }
0x1057   :  { %v6587_v53 = vpack.c.bf16 %v2770_v28, %v2769_v6  ;;  %v2761_v2 = vadd.f32 %v2760_v18, %v2664_v21  ;;  %v2896_v21 = vpop.permute.xlu0 %2895  ;;  %v2911_v14 = vpop.permute.xlu1 %2910  ;;  %v5645_v18 = vld [vmem:[%s7382_s23 + $0x4] sm:$0xf] }
0x1058   :  { %v2772_v34 = vmax.f32 %v2766_v50, 0.0 }
0x1059   :  { %v2771_v58 = vmax.f32 %v2761_v2, 0.0  ;;  %6588 = vmatprep.subr.bf16.mxu1 %v6587_v53  ;;  %v5657_v2 = vld [vmem:[%s7382_s23 + $0xc] sm:$0xf] }
0x105a   :  { %6590 = vmatpush3.bf16.msra.mxu1 %v6587_v53  ;;  %v5651_v53 = vld [vmem:[%s7382_s23 + $0x8] sm:$0xf] }
0x105b   :  { %v6591_v29 = vpack.c.bf16 %v2772_v34, %v2771_v58  ;;  %v2906_v28 = vpop.permute.xlu0 %2905 }
0x105d   :  { %6592 = vmatprep.subr.bf16.mxu1 %v6591_v29 }
0x105e   :  { %6594 = vmatpush3.bf16.msra.mxu1 %v6591_v29 }
0x1061   :  { %6228 = vmatmul.mubr.msk.f32.vlgmr.msra.gmra.mrb[28].mxu1 %vm176_vm1, %v2774_v24 }
0x1062   :  { %6232 = vmatprep.mubr.msk.f32.mxu1 %vm1138_vm8, %v2877_v33  ;;  %v3638_v33 = vld [vmem:[%s7424_s27] sm:$0xff] }
0x1134   :  { %v6229_v56 = vpop.f32.mrb[28].mxu1 }
0x1135   :  { %v2865_v31 = vadd.f32 %v6229_v56, %v2785_v47  ;;  %v2859_v40 = vpop.f32.mrb[29].mxu1 }
0x1136   :  { %v2860_v63 = vadd.f32 %v2859_v40, %v2780_v9 }
0x1137   :  { %v2868_v3 = vmul.f32 0.5, %v2865_v31  ;;  %2875 = vst.msk [vmem:[%s5534_s11 + $0x8] sm:$0xff] %vm2873_vm14, %v2865_v31 }
0x1138   :  { %2874 = vst.msk [vmem:[%s5534_s11] sm:$0xff] %vm2873_vm14, %v2860_v63 }
0x1139   :  { %v2869_v5 = vmul.f32 1.442695, %v2868_v3 }
0x113b   :  { %6836 = vpow2.f32 %v2869_v5 }
0x1145   :  { %v6837_v11 = vpop.eup %6836 }
0x1146   :  { %v2871_v35 = vmul.f32 %v6837_v11, %v170_v38 }
0x1148   :  { %v2872_v37 = vadd.f32 %v2871_v35, %v2860_v63 }
0x114a   :  { %2876 = vst.msk [vmem:[%s5534_s11 + $0x10] sm:$0xff] %vm2873_vm14, %v2872_v37  ;;  %6230 = vmatprep.subr.mxu1 %v2872_v37  ;;  %s5532_s11 = sld [smem:[%s7618_s0 + %s6906_s8]]  }
0x114b   :  { %6231 = vmatpush3.msra.mxu1 %v2872_v37 }
0x114c   :  { %6233 = vmatmul.mubr.msk.f32.vlgmr.msra.gmra.mrb[30].mxu1 %vm1138_vm8, %v2878_v41  ;;  %6260 = vmatprep.subr.msk.mxu1 %vm2043_vm11, %v3267_v55 }
0x114d   :  { %6235 = vmatprep.mubr.msk.f32.mxu1 %vm1138_vm8, %v2879_v43  ;;  %6261 = vmatpush3.msk.msra.mxu1 %vm2043_vm11, %v3267_v55 }
0x114e   :  { %6276 = vmatprep.subr.msk.mxu1 %vm2043_vm11, %v5651_v53 }
0x1150   :  { %6236 = vmatmul.mubr.msk.f32.gmra.mrb[32].mxu1 %vm1138_vm8, %v2880_v44 }
0x1151   :  { %6238 = vmatprep.mubr.msk.f32.mxu1 %vm1138_vm8, %v2881_v45 }
0x1154   :  { %6239 = vmatmul.mubr.msk.f32.gmra.mrb[34].mxu1 %vm1138_vm8, %v2882_v46 }
0x1155   :  { %6241 = vmatprep.mubr.msk.f32.mxu1 %vm1138_vm8, %v2883_v49 }
0x1158   :  { %6242 = vmatmul.mubr.msk.f32.gmra.mrb[36].mxu1 %vm1138_vm8, %v2884_v52 }
0x121f   :  { %v6234_v57 = vpop.f32.mrb[30].mxu1 }
0x1220   :  { %v3023_v60 = vpop.f32.mrb[31].mxu1  ;;  %v3029_v42 = vadd.f32 %v6234_v57, %v2901_v26 }
0x1221   :  { %v3024_v27 = vadd.f32 %v3023_v60, %v2896_v21  ;;  %v3639_v60 = vld [vmem:[%s7424_s27 + $0x8] sm:$0xff] }
0x1223   :  { %v6237_v61 = vpop.f32.mrb[32].mxu1 }
0x1224   :  { %v3033_v62 = vpop.f32.mrb[33].mxu1  ;;  %v3039_v50 = vadd.f32 %v6237_v61, %v2911_v14 }
0x1225   :  { %v3034_v6 = vadd.f32 %v3033_v62, %v2906_v28  ;;  %v3730_v62 = vpop.permute.xlu0 %3729 }
0x1227   :  { %v6240_v10 = vpop.f32.mrb[34].mxu1 }
0x1228   :  { %v3043_v8 = vpop.f32.mrb[35].mxu1  ;;  %v3049_v17 = vadd.f32 %v6240_v10, %v2921_v32  ;;  %v3735_v32 = vpop.permute.xlu1 %3734 }
0x1229   :  { %v3044_v16 = vadd.f32 %v3043_v8, %v2916_v59 }
0x122b   :  { %v6243_v19 = vpop.f32.mrb[36].mxu1  ;;  %6246 = vmatprep.mubr.msk.f32.mxu0 %vm2873_vm14, %v3044_v16 }
0x122c   :  { %v3053_v25 = vpop.f32.mrb[37].mxu1  ;;  %6247 = vmatmul.mubr.msk.f32.vlgmr.msra.gmra.mrb[40].mxu0 %vm2873_vm14, %v3049_v17  ;;  %v3059_v13 = vadd.f32 %v6243_v19, %v2931_v15 }
0x122d   :  { %v3054_v39 = vadd.f32 %v3053_v25, %v2926_v7  ;;  %6253 = vmatpush3.msk.msra.mxu0 %vm408_vm4, %v3062_v30 }
0x122e   :  { %6268 = vmatprep.subr.msk.mxu0 %vm2043_vm11, %v5645_v18 }
0x122f   :  { %6249 = vmatprep.mubr.msk.f32.mxu0 %vm2873_vm14, %v3054_v39  ;;  %v3793_v39 = vld [vmem:[%s5522_s1] sm:$0xff] }
0x1230   :  { %6250 = vmatmul.mubr.msk.f32.gmra.mrb[42].mxu0 %vm2873_vm14, %v3059_v13  ;;  %v5665_v13 = vld [vmem:[%s5522_s1 + $0x10] sm:$0xff] }
0x1231   :  { %6254 = vmatprep.mubr.msk.f32.mxu0 %vm2873_vm14, %v3024_v27 }
0x1234   :  { %6255 = vmatmul.mubr.msk.f32.vlgmr.msra.gmra.mrb[40].mxu0 %vm2873_vm14, %v3029_v42 }
0x1235   :  { %6257 = vmatprep.mubr.msk.f32.mxu0 %vm2873_vm14, %v3034_v6  ;;  %6269 = vmatpush3.msk.msra.mxu0 %vm2043_vm11, %v5645_v18 }
0x1236   :  { %6284 = vmatprep.subr.msk.mxu0 %vm2043_vm11, %v5657_v2 }
0x1238   :  { %6258 = vmatmul.mubr.msk.f32.gmra.mrb[42].mxu0 %vm2873_vm14, %v3039_v50 }
0x1307   :  { %v6256_v34 = vpop.f32.mrb[40].mxu0 }
0x1308   :  { %v3246_v58 = vpop.f32.mrb[41].mxu0 }
0x1309   :  { %6262 = vmatprep.mubr.msk.f32.mxu1 %vm1921_vm10, %v3246_v58  ;;  %6270 = vmatprep.mubr.msk.f32.mxu0 %vm1921_vm10, %v3246_v58 }
0x130a   :  { %6263 = vmatmul.mubr.msk.f32.vlgmr.msra.gmra.mrb[38].mxu1 %vm1921_vm10, %v6256_v34  ;;  %6271 = vmatmul.mubr.msk.f32.vlgmr.msra.gmra.mrb[44].mxu0 %vm1921_vm10, %v6256_v34 }
0x130b   :  { %v6259_v29 = vpop.f32.mrb[42].mxu0  ;;  %6277 = vmatpush3.msk.msra.mxu1 %vm2043_vm11, %v5651_v53  ;;  %6285 = vmatpush3.msk.msra.mxu0 %vm2043_vm11, %v5657_v2 }
0x130c   :  { %v3256_v24 = vpop.f32.mrb[43].mxu0  ;;  %6330 = vmatprep.subr.mxu0 %v3793_v39 }
0x130d   :  { %6265 = vmatprep.mubr.msk.f32.mxu1 %vm1921_vm10, %v3256_v24  ;;  %6273 = vmatprep.mubr.msk.f32.mxu0 %vm1921_vm10, %v3256_v24 }
0x130e   :  { %6266 = vmatmul.mubr.msk.f32.gmra.mrb[40].mxu1 %vm1921_vm10, %v6259_v29  ;;  %6274 = vmatmul.mubr.msk.f32.gmra.mrb[46].mxu0 %vm1921_vm10, %v6259_v29 }
0x130f   :  { %6278 = vmatprep.mubr.msk.f32.mxu1 %vm1921_vm10, %v3246_v58  ;;  %6286 = vmatprep.mubr.msk.f32.mxu0 %vm1921_vm10, %v3246_v58 }
0x1312   :  { %6279 = vmatmul.mubr.msk.f32.vlgmr.msra.gmra.mrb[42].mxu1 %vm1921_vm10, %v6256_v34  ;;  %6287 = vmatmul.mubr.msk.f32.vlgmr.msra.gmra.mrb[48].mxu0 %vm1921_vm10, %v6256_v34 }
0x1313   :  { %6281 = vmatprep.mubr.msk.f32.mxu1 %vm1921_vm10, %v3256_v24  ;;  %6289 = vmatprep.mubr.msk.f32.mxu0 %vm1921_vm10, %v3256_v24 }
0x1314   :  { %6331 = vmatpush3.msra.mxu0 %v3793_v39 }
0x1315   :  { %6335 = vmatprep.subr.mxu0 %v5665_v13 }
0x1316   :  { %6282 = vmatmul.mubr.msk.f32.gmra.mrb[44].mxu1 %vm1921_vm10, %v6259_v29  ;;  %6290 = vmatmul.mubr.msk.f32.gmra.mrb[50].mxu0 %vm1921_vm10, %v6259_v29 }
0x1317   :  { %6324 = vmatprep.mubr.f32.mxu1 %v3638_v33 }
0x13dd   :  { %v6264_v47 = vpop.f32.mrb[38].mxu1  ;;  %v6272_v56 = vpop.f32.mrb[44].mxu0 }
0x13de   :  { %v3349_v9 = vpop.f32.mrb[39].mxu1  ;;  %v3439_v31 = vpop.f32.mrb[45].mxu0 }
0x13df   :  { %v6595_v40 = vpack.c.bf16 %v6264_v47, %v3349_v9  ;;  %v6603_v63 = vpack.c.bf16 %v6272_v56, %v3439_v31 }
0x13e1   :  { %v6267_v3 = vpop.f32.mrb[40].mxu1  ;;  %v6275_v5 = vpop.f32.mrb[46].mxu0  ;;  %6596 = vmatprep.subr.bf16.mxu1 %v6595_v40 }
0x13e2   :  { %v3359_v38 = vpop.f32.mrb[41].mxu1  ;;  %v3449_v11 = vpop.f32.mrb[47].mxu0  ;;  %6598 = vmatpush3.bf16.msra.mxu1 %v6595_v40 }
0x13e3   :  { %v6599_v35 = vpack.c.bf16 %v6267_v3, %v3359_v38  ;;  %v6607_v37 = vpack.c.bf16 %v6275_v5, %v3449_v11 }
0x13e5   :  { %v6280_v41 = vpop.f32.mrb[42].mxu1  ;;  %v6288_v43 = vpop.f32.mrb[48].mxu0  ;;  %6600 = vmatprep.subr.bf16.mxu1 %v6599_v35 }
0x13e6   :  { %v3529_v44 = vpop.f32.mrb[43].mxu1  ;;  %v3619_v45 = vpop.f32.mrb[49].mxu0  ;;  %6602 = vmatpush3.bf16.msra.mxu1 %v6599_v35 }
0x13e7   :  { %v6611_v46 = vpack.c.bf16 %v6280_v41, %v3529_v44  ;;  %v6619_v49 = vpack.c.bf16 %v6288_v43, %v3619_v45  ;;  %6604 = vmatprep.subr.bf16.mxu1 %v6603_v63 }
0x13e9   :  { %v6283_v52 = vpop.f32.mrb[44].mxu1  ;;  %v6291_v54 = vpop.f32.mrb[50].mxu0 }
0x13ea   :  { %v3539_v30 = vpop.f32.mrb[45].mxu1  ;;  %v3629_v55 = vpop.f32.mrb[51].mxu0  ;;  %6606 = vmatpush3.bf16.msra.mxu1 %v6603_v63 }
0x13eb   :  { %v6615_v57 = vpack.c.bf16 %v6283_v52, %v3539_v30  ;;  %v6623_v59 = vpack.c.bf16 %v6291_v54, %v3629_v55  ;;  %6608 = vmatprep.subr.bf16.mxu1 %v6607_v37  ;;  %v3952_v52 = vld [vmem:[%s5520_s5] sm:$0xff]  ;;  %v3640_v54 = vld [vmem:[%s7424_s27 + $0x10] sm:$0xff]  ;;  %v3641_v30 = vld [vmem:[%s7424_s27 + $0x18] sm:$0xff] }
0x13ee   :  { %6610 = vmatpush3.bf16.msra.mxu1 %v6607_v37 }
0x13ef   :  { %6612 = vmatprep.subr.bf16.mxu1 %v6611_v46 }
0x13f2   :  { %6614 = vmatpush3.bf16.msra.mxu1 %v6611_v46 }
0x13f3   :  { %6616 = vmatprep.subr.bf16.mxu1 %v6615_v57 }
0x13f6   :  { %6618 = vmatpush3.bf16.msra.mxu1 %v6615_v57 }
0x13f7   :  { %6620 = vmatprep.subr.bf16.mxu1 %v6619_v49 }
0x13fa   :  { %6622 = vmatpush3.bf16.msra.mxu1 %v6619_v49 }
0x13fb   :  { %6624 = vmatprep.subr.bf16.mxu1 %v6623_v59 }
0x13fe   :  { %6626 = vmatpush3.bf16.msra.mxu1 %v6623_v59 }
0x1401   :  { %6325 = vmatmul.mubr.f32.vlgmr.msra.gmra.mrb[46].mxu1 %v3639_v60 }
0x1402   :  { %6327 = vmatprep.mubr.f32.mxu1 %v3640_v54 }
0x1405   :  { %6328 = vmatmul.mubr.f32.gmra.mrb[48].mxu1 %v3641_v30 }
0x14d4   :  { %v6326_v61 = vpop.f32.mrb[46].mxu1 }
0x14d5   :  { %v3738_v7 = vadd.f32 %v6326_v61, %v3735_v32  ;;  %v3708_v10 = vpop.f32.mrb[47].mxu1 }
0x14d6   :  { %v3737_v8 = vadd.f32 %v3730_v62, %v3708_v10  ;;  %v3953_v62 = vld [vmem:[%s5520_s5 + $0x8] sm:$0xff] }
0x14d7   :  { %v3742_v15 = vsel %vm1138_vm8, %v3738_v7, 0.0  ;;  %v3748_v17 = vmul.f32 %v3738_v7, %v3738_v7 }
0x14d8   :  { %3743 = vadd.xlane.f32.xlu1 %v3742_v15  ;;  %v3739_v16 = vsel %vm1138_vm8, %v3737_v8, 0.0  ;;  %v3747_v21 = vmul.f32 %v3737_v8, %v3737_v8 }
0x14d9   :  { %3740 = vadd.xlane.f32.xlu0 %v3739_v16  ;;  %v3752_v19 = vsel %vm1138_vm8, %v3748_v17, 0.0 }
0x14da   :  { %v3749_v25 = vsel %vm1138_vm8, %v3747_v21, 0.0 }
0x14dd   :  { %3753 = vadd.xlane.f32.xlu0 %v3752_v19 }
0x14e1   :  { %3750 = vadd.xlane.f32.xlu0 %v3749_v25 }
0x14e9   :  { %3776 = vperm.xlu1 %6789, %v7327_v51  }
0x14ed   :  { %6790 = vset.pattern.permute.xlu1 %v6866_v36 }
0x14ee   :  { %3782 = vperm.xlu1 %6790, %v7324_v48  }
0x14f2   :  { %3786 = vperm.xlu1 %6790, %v7327_v51  }
0x14f6   :  { %6791 = vset.pattern.permute.xlu1 %v6868_v4 }
0x14f7   :  { %3772 = vperm.xlu0 %6788, %v7324_v48   ;;  %3955 = vperm.xlu1 %6791, %v7324_v48  }
0x14fb   :  { %3959 = vperm.xlu1 %6791, %v7327_v51   ;;  %6792 = vset.pattern.permute.xlu0 %v6871_v12 }
0x14ff   :  { %6793 = vset.pattern.permute.xlu1 %v6871_v12 }
0x1500   :  { %4080 = vperm.xlu1 %6793, %v7327_v51  }
0x1504   :  { %6794 = vset.pattern.permute.xlu1 %v6872_v20 }
0x1505   :  { %4086 = vperm.xlu1 %6794, %v7324_v48  }
0x1565   :  { %v3744_v26 = vpop.xlane.xlu1 %3743 }
0x1566   :  { %v3741_v27 = vpop.xlane.xlu0 %3740  ;;  %v3746_v28 = vmul.f32 0.125, %v3744_v26 }
0x1567   :  { %v3745_v14 = vmul.f32 0.125, %v3741_v27  ;;  %v6329_v27 = vpop.f32.mrb[48].mxu1 }
0x1568   :  { %v3758_v6 = vmul.f32 %v3746_v28, %v3746_v28  ;;  %v3764_v31 = vsub.f32 %v3738_v7, %v3746_v28  ;;  %v3718_v28 = vpop.f32.mrb[49].mxu1 }
0x1569   :  { %v3757_v2 = vmul.f32 %v3745_v14, %v3745_v14  ;;  %v3777_v56 = vpop.permute.xlu1 %3776  ;;  %v3763_v3 = vsub.f32 %v3737_v8, %v3745_v14 }
0x156a   :  { %v3754_v42 = vpop.xlane.xlu0 %3753 }
0x156b   :  { %v3756_v50 = vmul.f32 0.125, %v3754_v42  ;;  %v4100_v42 = vld [vmem:[%s7470_s9] sm:$0xff] }
0x156d   :  { %v3760_v18 = vsub.f32 %v3756_v50, %v3758_v6  ;;  %v3783_v9 = vpop.permute.xlu1 %3782  ;;  %v5675_v6 = vld [vmem:[%s7470_s9 + $0x10] sm:$0xff] }
0x156e   :  { %v3751_v53 = vpop.xlane.xlu0 %3750  ;;  %6365 = vmatprep.subr.mxu1 %v5675_v6 }
0x156f   :  { %v3762_v34 = vmax.f32 %v3760_v18, 0.0  ;;  %v3755_v58 = vmul.f32 0.125, %v3751_v53  ;;  %6366 = vmatpush3.msra.mxu1 %v5675_v6 }
0x1571   :  { %v3766_v29 = vadd.f32 1e-05, %v3762_v34  ;;  %v3759_v24 = vsub.f32 %v3755_v58, %v3757_v2  ;;  %v3787_v11 = vpop.permute.xlu1 %3786 }
0x1573   :  { %6838 = vrsqrt.f32 %v3766_v29  ;;  %v3761_v33 = vmax.f32 %v3759_v24, 0.0 }
0x1575   :  { %v3765_v47 = vadd.f32 1e-05, %v3761_v33 }
0x1576   :  { %v3773_v35 = vpop.permute.xlu0 %3772  ;;  %v3956_v7 = vpop.permute.xlu1 %3955 }
0x1577   :  { %6840 = vrsqrt.f32 %v3765_v47 }
0x157a   :  { %v3960_v10 = vpop.permute.xlu1 %3959 }
0x157d   :  { %v6839_v40 = vpop.eup %6838 }
0x157e   :  { %v3770_v63 = vmul.f32 %v6839_v40, %v3764_v31 }
0x1580   :  { %v3780_v5 = vmul.f32 %v3777_v56, %v3770_v63 }
0x1581   :  { %v6841_v38 = vpop.eup %6840 }
0x1582   :  { %v3769_v37 = vmul.f32 %v6841_v38, %v3763_v3  ;;  %v3790_v41 = vadd.f32 %v3787_v11, %v3780_v5 }
0x1584   :  { %v3779_v43 = vmul.f32 %v3773_v35, %v3769_v37  ;;  %v3792_v45 = vmax.f32 %v3790_v41, 0.0 }
0x1586   :  { %v3789_v44 = vadd.f32 %v3783_v9, %v3779_v43 }
0x1588   :  { %v3791_v46 = vmax.f32 %v3789_v44, 0.0 }
0x158a   :  { %6332 = vmatprep.mubr.msk.f32.mxu0 %vm1138_vm8, %v3791_v46  ;;  %v6631_v49 = vpack.c.bf16 %v3792_v45, %v3791_v46 }
0x158b   :  { %6333 = vmatmul.mubr.msk.f32.vlgmr.msra.gmra.mrb[52].mxu0 %vm1138_vm8, %v3792_v45 }
0x158c   :  { %6337 = vmatprep.mubr.msk.f32.mxu0 %vm1138_vm8, %v3791_v46  ;;  %6336 = vmatpush3.msra.mxu0 %v5665_v13 }
0x158f   :  { %6338 = vmatmul.mubr.msk.f32.vlgmr.msra.gmra.mrb[54].mxu0 %vm1138_vm8, %v3792_v45 }
0x1590   :  { %6352 = vmatprep.mubr.msk.f32.mxu0 %vm1362_vm9, %v3952_v52 }
0x165e   :  { %v6334_v55 = vpop.f32.mrb[52].mxu0 }
0x165f   :  { %v3866_v57 = vpop.f32.mrb[53].mxu0 }
0x1660   :  { %v6627_v59 = vpack.c.bf16 %v6334_v55, %v3866_v57 }
0x1662   :  { %v6339_v60 = vpop.f32.mrb[54].mxu0  ;;  %6628 = vmatprep.subr.bf16.mxu0 %v6627_v59 }
0x1663   :  { %v3943_v32 = vpop.f32.mrb[55].mxu0  ;;  %6630 = vmatpush3.bf16.msra.mxu0 %v6627_v59  ;;  %v5678_v59 = vld [vmem:[%s7470_s9 + $0x18] sm:$0xff] }
0x1664   :  { %v6635_v61 = vpack.c.bf16 %v6339_v60, %v3943_v32  ;;  %6632 = vmatprep.subr.bf16.mxu0 %v6631_v49  ;;  %v4413_v60 = vld [vmem:[%s5524_s13] sm:$0xff] }
0x1665   :  { %v7494_v32 = vld [vmem:[%s5528_s17] sm:$0xff] }
0x1667   :  { %6634 = vmatpush3.bf16.msra.mxu0 %v6631_v49 }
0x1668   :  { %6636 = vmatprep.subr.bf16.mxu0 %v6635_v61 }
0x166b   :  { %6638 = vmatpush3.bf16.msra.mxu0 %v6635_v61 }
0x166c   :  { %6355 = vmatprep.subr.mxu0 %v4100_v42 }
0x166e   :  { %6353 = vmatmul.mubr.msk.f32.vlgmr.msra.gmra.mrb[56].mxu0 %vm1362_vm9, %v3953_v62 }
0x166f   :  { %6356 = vmatpush3.msra.mxu0 %v4100_v42 }
0x1741   :  { %v6354_v8 = vpop.f32.mrb[56].mxu0 }
0x1742   :  { %v4040_v15 = vadd.f32 %v6354_v8, %v3960_v10  ;;  %v4034_v16 = vpop.f32.mrb[57].mxu0 }
0x1743   :  { %v4035_v17 = vadd.f32 %v4034_v16, %v3956_v7 }
0x1744   :  { %v4046_v19 = vsel %vm1138_vm8, %v4040_v15, 0.0  ;;  %v4052_v25 = vmul.f32 %v4040_v15, %v4040_v15 }
0x1745   :  { %4047 = vadd.xlane.f32.xlu0 %v4046_v19  ;;  %v4043_v21 = vsel %vm1138_vm8, %v4035_v17, 0.0  ;;  %v4051_v13 = vmul.f32 %v4035_v17, %v4035_v17 }
0x1746   :  { %4044 = vadd.xlane.f32.xlu1 %v4043_v21  ;;  %v4056_v39 = vsel %vm1138_vm8, %v4052_v25, 0.0 }
0x1747   :  { %v4053_v26 = vsel %vm1138_vm8, %v4051_v13, 0.0  ;;  %v4414_v13 = vld [vmem:[%s5524_s13 + $0x8] sm:$0xff] }
0x174a   :  { %4057 = vadd.xlane.f32.xlu1 %v4056_v39 }
0x174e   :  { %4054 = vadd.xlane.f32.xlu1 %v4053_v26 }
0x175b   :  { %4076 = vperm.xlu0 %6792, %v7324_v48   ;;  %v5672_v48 = vld [vmem:[%s7470_s9 + $0x8] sm:$0xff] }
0x175c   :  { %6360 = vmatprep.subr.mxu0 %v5672_v48 }
0x175f   :  { %4090 = vperm.xlu1 %6794, %v7327_v51   ;;  %6797 = vset.pattern.permute.xlu0 %v6866_v36  ;;  %v4081_v51 = vpop.permute.xlu1 %4080 }
0x1763   :  { %6795 = vset.pattern.permute.xlu1 %v6863_v22  ;;  %v4087_v14 = vpop.permute.xlu1 %4086 }
0x1764   :  { %4498 = vperm.xlu1 %6795, %v7494_v32  }
0x1768   :  { %6796 = vset.pattern.permute.xlu1 %v6865_v23 }
0x17d2   :  { %v4048_v50 = vpop.xlane.xlu0 %4047 }
0x17d3   :  { %v4045_v18 = vpop.xlane.xlu1 %4044  ;;  %v4050_v53 = vmul.f32 0.125, %v4048_v50  ;;  %v4530_v50 = vld [vmem:[%s5527_s21 + $0x8] sm:$0xff] }
0x17d4   :  { %v4049_v58 = vmul.f32 0.125, %v4045_v18 }
0x17d5   :  { %v4062_v34 = vmul.f32 %v4050_v53, %v4050_v53  ;;  %v4068_v5 = vsub.f32 %v4040_v15, %v4050_v53 }
0x17d6   :  { %v4061_v47 = vmul.f32 %v4049_v58, %v4049_v58  ;;  %v4067_v35 = vsub.f32 %v4035_v17, %v4049_v58 }
0x17d7   :  { %v4058_v2 = vpop.xlane.xlu1 %4057 }
0x17d8   :  { %v4060_v29 = vmul.f32 0.125, %v4058_v2 }
0x17da   :  { %v4064_v24 = vsub.f32 %v4060_v29, %v4062_v34  ;;  %v4077_v43 = vpop.permute.xlu0 %4076 }
0x17db   :  { %v4055_v33 = vpop.xlane.xlu1 %4054 }
0x17dc   :  { %v4066_v56 = vmax.f32 %v4064_v24, 0.0  ;;  %v4059_v9 = vmul.f32 0.125, %v4055_v33 }
0x17de   :  { %v4070_v31 = vadd.f32 1e-05, %v4066_v56  ;;  %v4063_v40 = vsub.f32 %v4059_v9, %v4061_v47 }
0x17df   :  { %v4091_v44 = vpop.permute.xlu1 %4090 }
0x17e0   :  { %6842 = vrsqrt.f32 %v4070_v31  ;;  %v4065_v63 = vmax.f32 %v4063_v40, 0.0 }
0x17e2   :  { %v4069_v3 = vadd.f32 1e-05, %v4065_v63 }
0x17e3   :  { %v4499_v26 = vpop.permute.xlu1 %4498 }
0x17e4   :  { %6844 = vrsqrt.f32 %v4069_v3  ;;  %v5684_v3 = vld [vmem:[%s5527_s21 + $0x20] sm:$0xff] }
0x17ea   :  { %v6843_v38 = vpop.eup %6842 }
0x17eb   :  { %v4074_v11 = vmul.f32 %v6843_v38, %v4068_v5  ;;  %v5685_v5 = vld [vmem:[%s5527_s21 + $0x28] sm:$0xff] }
0x17ed   :  { %v4084_v37 = vmul.f32 %v4081_v51, %v4074_v11  ;;  %v6659_v11 = vpack.c.bf16 %v5685_v5, %v5684_v3  ;;  %v5157_v3 = vlaneseq }
0x17ee   :  { %v6845_v41 = vpop.eup %6844 }
0x17ef   :  { %v4073_v45 = vmul.f32 %v6845_v41, %v4067_v35  ;;  %v4094_v46 = vadd.f32 %v4091_v44, %v4084_v37  ;;  %v5158_v5 = vshrl.u32 %v5157_v3, 7 }
0x17f1   :  { %v4083_v49 = vmul.f32 %v4077_v43, %v4073_v45  ;;  %v4096_v54 = vadd.f32 %v6329_v27, %v4094_v46  ;;  %v4677_v46 = vld [vmem:[%s5525_s25] sm:$0xff] }
0x17f3   :  { %v4093_v52 = vadd.f32 %v4087_v14, %v4083_v49  ;;  %v4098_v57 = vmax.f32 %v4096_v54, 0.0  ;;  %v4529_v14 = vld [vmem:[%s5527_s21] sm:$0xff] }
0x17f4   :  { %v6656_v18 = vpack.c.bf16 %v4530_v50, %v4529_v14  ;;  %v5693_v14 = vld [vmem:[%s5531_s29 + $0x28] sm:$0xff]  ;;  %v5695_v50 = vld [vmem:[%s5531_s29 + $0x30] sm:$0xff] }
0x17f5   :  { %v4095_v30 = vadd.f32 %v4093_v52, %v3718_v28 }
0x17f7   :  { %v4097_v55 = vmax.f32 %v4095_v30, 0.0 }
0x17f9   :  { %6357 = vmatprep.mubr.msk.f32.mxu0 %vm1138_vm8, %v4097_v55  ;;  %6367 = vmatprep.mubr.msk.f32.mxu1 %vm1138_vm8, %v4097_v55 }
0x17fa   :  { %6358 = vmatmul.mubr.msk.f32.vlgmr.msra.gmra.mrb[58].mxu0 %vm1138_vm8, %v4098_v57  ;;  %6368 = vmatmul.mubr.msk.f32.vlgmr.msra.gmra.mrb[50].mxu1 %vm1138_vm8, %v4098_v57 }
0x17fb   :  { %6362 = vmatprep.mubr.msk.f32.mxu0 %vm1138_vm8, %v4097_v55  ;;  %6361 = vmatpush3.msra.mxu0 %v5672_v48 }
0x17fc   :  { %6370 = vmatprep.subr.mxu0 %v5678_v59  ;;  %6391 = vmatprep.mubr.msk.f32.mxu1 %vm2671_vm13, %v4413_v60  ;;  %v4784_v60 = vld [vmem:[%s5531_s29] sm:$0xff] }
0x17fe   :  { %6363 = vmatmul.mubr.msk.f32.vlgmr.msra.gmra.mrb[60].mxu0 %vm1138_vm8, %v4098_v57 }
0x17ff   :  { %6372 = vmatprep.mubr.msk.f32.mxu0 %vm1138_vm8, %v4097_v55  ;;  %6371 = vmatpush3.msra.mxu0 %v5678_v59 }
0x1800   :  { %6655 = vmatprep.subr.bf16.mxu0 %v6858_v0 }
0x1802   :  { %6373 = vmatmul.mubr.msk.f32.vlgmr.msra.gmra.mrb[62].mxu0 %vm1138_vm8, %v4098_v57 }
0x1803   :  { %6398 = vmatprep.mubr.msk.f32.mxu0 %vm6860_vm0, %v6861_v1  ;;  %6657 = vmatpush3.bf16.msra.mxu0 %v6656_v18  ;;  %v5696_v18 = vld [vmem:[%s5531_s29 + $0x38] sm:$0xff] }
0x1804   :  { %6658 = vmatprep.subr.bf16.mxu0 %v6858_v0 }
0x18cd   :  { %v6359_v61 = vpop.f32.mrb[58].mxu0  ;;  %v6369_v62 = vpop.f32.mrb[50].mxu1 }
0x18ce   :  { %v4173_v7 = vpop.f32.mrb[59].mxu0  ;;  %v4327_v10 = vpop.f32.mrb[51].mxu1 }
0x18cf   :  { %v6639_v8 = vpack.c.bf16 %v6359_v61, %v4173_v7  ;;  %v6647_v15 = vpack.c.bf16 %v6369_v62, %v4327_v10  ;;  %v4785_v61 = vld [vmem:[%s5531_s29 + $0x8] sm:$0xff]  ;;  %v5689_v62 = vld [vmem:[%s5531_s29 + $0x10] sm:$0xff]  ;;  %v5690_v10 = vld [vmem:[%s5531_s29 + $0x18] sm:$0xff] }
0x18d0   :  { %v6665_v7 = vpack.c.bf16 %v4785_v61, %v4784_v60  ;;  %v5201_v60 = vld [vmem:[%s5532_s11 + $0x18] sm:$0xff]  ;;  %v5702_v61 = vld [vmem:[%s5532_s11 + $0x50] sm:$0xff] }
0x18d1   :  { %v6364_v16 = vpop.f32.mrb[60].mxu0  ;;  %6640 = vmatprep.subr.bf16.mxu1 %v6639_v8 }
0x18d2   :  { %v4250_v17 = vpop.f32.mrb[61].mxu0  ;;  %6642 = vmatpush3.bf16.msra.mxu1 %v6639_v8  ;;  %v6668_v8 = vpack.c.bf16 %v5690_v10, %v5689_v62  ;;  %v5703_v62 = vld [vmem:[%s5532_s11 + $0x58] sm:$0xff] }
0x18d3   :  { %v6643_v19 = vpack.c.bf16 %v6364_v16, %v4250_v17 }
0x18d5   :  { %v6374_v21 = vpop.f32.mrb[62].mxu0  ;;  %6644 = vmatprep.subr.bf16.mxu1 %v6643_v19 }
0x18d6   :  { %v4404_v25 = vpop.f32.mrb[63].mxu0  ;;  %6646 = vmatpush3.bf16.msra.mxu1 %v6643_v19 }
0x18d7   :  { %v6651_v39 = vpack.c.bf16 %v6374_v21, %v4404_v25  ;;  %6648 = vmatprep.subr.bf16.mxu1 %v6647_v15 }
0x18da   :  { %6650 = vmatpush3.bf16.msra.mxu1 %v6647_v15 }
0x18db   :  { %6652 = vmatprep.subr.bf16.mxu1 %v6651_v39 }
0x18de   :  { %6654 = vmatpush3.bf16.msra.mxu1 %v6651_v39 }
0x18df   :  { %6664 = vmatprep.subr.bf16.mxu1 %v6858_v0 }
0x18e1   :  { %6392 = vmatmul.mubr.msk.f32.vlgmr.msra.gmra.mrb[52].mxu1 %vm2671_vm13, %v4414_v13 }
0x18e2   :  { %6421 = vmatprep.mubr.msk.f32.mxu1 %vm6860_vm0, %v6861_v1  ;;  %6666 = vmatpush3.bf16.msra.mxu1 %v6665_v7  ;;  %v6692_v7 = vpack.c.bf16 %v5703_v62, %v5702_v61 }
0x18e3   :  { %6670 = vmatprep.subr.bf16.mxu1 %v6858_v0 }
0x19b4   :  { %v7502_v27 = vpop.f32.mrb[52].mxu1 }
0x19b5   :  { %v4487_v28 = vpop.f32.mrb[53].mxu1 }
0x19b6   :  { %v4501_v42 = vadd.f32 %v4499_v26, %v4487_v28 }
0x19b8   :  { %v4502_v6 = vsel %vm509_vm6, %v4501_v42, 0.0  ;;  %v4506_v48 = vmul.f32 %v4501_v42, %v4501_v42 }
0x19b9   :  { %4503 = vadd.xlane.f32.xlu1 %v4502_v6 }
0x19ba   :  { %v4507_v51 = vsel %vm509_vm6, %v4506_v48, 0.0  ;;  %v5692_v48 = vld [vmem:[%s5531_s29 + $0x20] sm:$0xff] }
0x19bb   :  { %4508 = vadd.xlane.f32.xlu0 %v4507_v51 }
0x19ca   :  { %4519 = vperm.xlu1 %6796, %v7494_v32  }
0x19ce   :  { %6798 = vset.pattern.permute.xlu1 %v6868_v4 }
0x19cf   :  { %4679 = vperm.xlu1 %6798, %v7494_v32  }
0x19d1   :  { %4524 = vperm.xlu0 %6797, %v7494_v32  }
0x19d3   :  { %6799 = vset.pattern.permute.xlu1 %v6871_v12 }
0x19d5   :  { %6802 = vset.pattern.permute.xlu0 %v6865_v23 }
0x1a46   :  { %v4504_v53 = vpop.xlane.xlu1 %4503 }
0x1a47   :  { %v4505_v2 = vmul.f32 0.0625, %v4504_v53 }
0x1a48   :  { %v4509_v34 = vpop.xlane.xlu0 %4508 }
0x1a49   :  { %v4511_v58 = vmul.f32 %v4505_v2, %v4505_v2  ;;  %v4510_v29 = vmul.f32 0.0625, %v4509_v34  ;;  %v4514_v23 = vsub.f32 %v4501_v42, %v4505_v2  ;;  %v6671_v2 = vpack.c.bf16 %v5693_v14, %v5692_v48 }
0x1a4a   :  { %v4520_v9 = vpop.permute.xlu1 %4519  ;;  %v6674_v34 = vpack.c.bf16 %v5696_v18, %v5695_v50 }
0x1a4b   :  { %v4512_v24 = vsub.f32 %v4510_v29, %v4511_v58 }
0x1a4d   :  { %v4513_v33 = vmax.f32 %v4512_v24, 0.0 }
0x1a4e   :  { %v4680_v49 = vpop.permute.xlu1 %4679 }
0x1a4f   :  { %v4515_v47 = vadd.f32 1e-05, %v4513_v33 }
0x1a50   :  { %v4525_v40 = vpop.permute.xlu0 %4524 }
0x1a51   :  { %6846 = vrsqrt.f32 %v4515_v47 }
0x1a5b   :  { %v6847_v56 = vpop.eup %6846 }
0x1a5c   :  { %v4517_v31 = vmul.f32 %v6847_v56, %v4514_v23 }
0x1a5e   :  { %v4522_v63 = vmul.f32 %v4520_v9, %v4517_v31 }
0x1a60   :  { %v4527_v38 = vadd.f32 %v4525_v40, %v4522_v63 }
0x1a62   :  { %v4528_v35 = vmax.f32 %v4527_v38, 0.0  ;;  %v7572_v38 = vsub.s32 0, %v5158_v5 }
0x1a64   :  { %6399 = vmatmul.mubr.msk.f32.vlgmr.msra.gmra.mrb[64].mxu0 %vm509_vm6, %v4528_v35 }
0x1a65   :  { %6660 = vmatpush3.bf16.msra.mxu0 %v6659_v11  ;;  %6405 = vmatprep.mubr.msk.f32.mxu0 %vm6860_vm0, %v6861_v1 }
0x1a66   :  { %6661 = vmatprep.subr.bf16.mxu0 %v6858_v0 }
0x1a68   :  { %6406 = vmatmul.mubr.msk.f32.vlgmr.msra.gmra.mrb[66].mxu0 %vm509_vm6, %v4528_v35 }
0x1a69   :  { %6414 = vmatprep.mubr.msk.f32.mxu0 %vm6860_vm0, %v6861_v1 }
0x1b37   :  { %v4600_v37 = vpop.f32.mrb[64].mxu0 }
0x1b38   :  { %v6662_v41 = vpack.c.bf16 %v4528_v35, %v4600_v37  ;;  %v6400_v43 = vpop.f32.mrb[65].mxu0 }
0x1b3a   :  { %6663 = vmatpush3.bf16.msra.mxu0 %v6662_v41 }
0x1b3b   :  { %v4673_v44 = vpop.f32.mrb[66].mxu0  ;;  %6412 = vmatprep.subr.mxu0 %v6861_v1 }
0x1b3c   :  { %v6407_v45 = vpop.f32.mrb[67].mxu0 }
0x1b3e   :  { %6413 = vmatpush3.msra.mxu0 %v4673_v44 }
0x1b3f   :  { %6415 = vmatmul.mubr.msk.f32.vlgmr.msra.gmra.mrb[68].mxu0 %vm690_vm7, %v4677_v46  ;;  %6667 = vmatprep.subr.bf16.mxu0 %v6858_v0 }
0x1b40   :  { %6428 = vmatprep.mubr.msk.f32.mxu0 %vm6860_vm0, %v6861_v1  ;;  %6669 = vmatpush3.bf16.msra.mxu0 %v6668_v8 }
0x1b41   :  { %6673 = vmatprep.subr.bf16.mxu0 %v6858_v0 }
0x1c12   :  { %v4751_v52 = vpop.f32.mrb[68].mxu0 }
0x1c13   :  { %v4752_v54 = vadd.f32 %v4751_v52, %v4680_v49  ;;  %v6416_v30 = vpop.f32.mrb[69].mxu0  ;;  %v5198_v49 = vld [vmem:[%s5532_s11] sm:$0xff]  ;;  %v5199_v52 = vld [vmem:[%s5532_s11 + $0x8] sm:$0xff] }
0x1c14   :  { %v6683_v30 = vpack.c.bf16 %v5199_v52, %v5198_v49 }
0x1c15   :  { %v4755_v55 = vsel %vm509_vm6, %v4752_v54, 0.0  ;;  %v4759_v57 = vmul.f32 %v4752_v54, %v4752_v54 }
0x1c16   :  { %4756 = vadd.xlane.f32.xlu1 %v4755_v55  ;;  %v5701_v55 = vld [vmem:[%s5532_s11 + $0x48] sm:$0xff] }
0x1c17   :  { %v4760_v59 = vsel %vm509_vm6, %v4759_v57, 0.0 }
0x1c18   :  { %4761 = vadd.xlane.f32.xlu0 %v4760_v59  ;;  %v5200_v59 = vld [vmem:[%s5532_s11 + $0x10] sm:$0xff] }
0x1c27   :  { %4772 = vperm.xlu1 %6799, %v7494_v32  }
0x1c2b   :  { %6800 = vset.pattern.permute.xlu1 %v6872_v20 }
0x1c2c   :  { %4777 = vperm.xlu1 %6800, %v7494_v32  }
0x1c30   :  { %6801 = vset.pattern.permute.xlu1 %v6863_v22 }
0x1ca3   :  { %v4757_v32 = vpop.xlane.xlu1 %4756 }
0x1ca4   :  { %v4758_v15 = vmul.f32 0.0625, %v4757_v32 }
0x1ca5   :  { %v4762_v22 = vpop.xlane.xlu0 %4761 }
0x1ca6   :  { %v4764_v16 = vmul.f32 %v4758_v15, %v4758_v15  ;;  %v4763_v17 = vmul.f32 0.0625, %v4762_v22  ;;  %v4767_v13 = vsub.f32 %v4752_v54, %v4758_v15  ;;  %v5700_v54 = vld [vmem:[%s5532_s11 + $0x40] sm:$0xff] }
0x1ca7   :  { %v4773_v39 = vpop.permute.xlu1 %4772  ;;  %v6689_v57 = vpack.c.bf16 %v5701_v55, %v5700_v54 }
0x1ca8   :  { %v4765_v19 = vsub.f32 %v4763_v17, %v4764_v16 }
0x1caa   :  { %v4766_v21 = vmax.f32 %v4765_v19, 0.0 }
0x1cab   :  { %v4778_v42 = vpop.permute.xlu1 %4777 }
0x1cac   :  { %v4768_v25 = vadd.f32 1e-05, %v4766_v21 }
0x1cae   :  { %6848 = vrsqrt.f32 %v4768_v25 }
0x1cb8   :  { %v6849_v26 = vpop.eup %6848 }
0x1cb9   :  { %v4770_v28 = vmul.f32 %v6849_v26, %v4767_v13 }
0x1cbb   :  { %v4775_v6 = vmul.f32 %v4773_v39, %v4770_v28 }
0x1cbd   :  { %v4780_v51 = vadd.f32 %v4778_v42, %v4775_v6 }
0x1cbf   :  { %v4781_v53 = vadd.f32 %v7502_v27, %v4780_v51  ;;  %v7560_v27 = vld [vmem:[%s5533_s3] sm:$0x1] }
0x1cc0   :  { %5154 = vperm.xlu1 %6801, %v7560_v27  }
0x1cc1   :  { %v4782_v58 = vmax.f32 %v4781_v53, 0.0 }
0x1cc3   :  { %6422 = vmatmul.mubr.msk.f32.vlgmr.msra.gmra.mrb[54].mxu1 %vm509_vm6, %v4782_v58  ;;  %6429 = vmatmul.mubr.msk.f32.vlgmr.msra.gmra.mrb[70].mxu0 %vm509_vm6, %v4782_v58 }
0x1cc4   :  { %6672 = vmatpush3.bf16.msra.mxu1 %v6671_v2  ;;  %6675 = vmatpush3.bf16.msra.mxu0 %v6674_v34  ;;  %v5357_v34 = vld [vmem:[%s5530_s15] sm:$0x1] }
0x1cc5   :  { %6435 = vmatprep.mubr.msk.f32.mxu1 %vm6860_vm0, %v6861_v1  ;;  %6442 = vmatprep.mubr.msk.f32.mxu0 %vm6860_vm0, %v6861_v1 }
0x1cc6   :  { %6676 = vmatprep.subr.bf16.mxu1 %v6858_v0  ;;  %6682 = vmatprep.subr.bf16.mxu0 %v6858_v0 }
0x1cc7   :  { %6436 = vmatmul.mubr.msk.f32.vlgmr.msra.gmra.mrb[56].mxu1 %vm509_vm6, %v4782_v58  ;;  %6443 = vmatmul.mubr.msk.f32.vlgmr.msra.gmra.mrb[72].mxu0 %vm509_vm6, %v4782_v58 }
0x1cc8   :  { %6453 = vmatprep.mubr.msk.f32.mxu1 %vm6860_vm0, %v6861_v1  ;;  %6464 = vmatprep.mubr.msk.f32.mxu0 %vm6860_vm0, %v6861_v1 }
0x1cc9   :  { %6803 = vset.pattern.permute.xlu1 %v6866_v36  ;;  %v5078_v36 = vld [vmem:[%s5529_s7] sm:$0x3]  ;;  %6684 = vmatpush3.bf16.msra.mxu0 %v6683_v30 }
0x1cca   :  { %6685 = vmatprep.subr.bf16.mxu0 %v6858_v0 }
0x1d3f   :  { %v5155_v11 = vpop.permute.xlu1 %5154 }
0x1d40   :  { %v5160_v35 = vrot.slane %v5155_v11, %v7572_v38 }
0x1d96   :  { %v4855_v29 = vpop.f32.mrb[54].mxu1  ;;  %v4928_v24 = vpop.f32.mrb[70].mxu0 }
0x1d97   :  { %v6677_v33 = vpack.c.bf16 %v4928_v24, %v4855_v29  ;;  %v6423_v47 = vpop.f32.mrb[55].mxu1  ;;  %v6430_v23 = vpop.f32.mrb[71].mxu0 }
0x1d99   :  { %6678 = vmatpush3.bf16.msra.mxu1 %v6677_v33 }
0x1d9a   :  { %v5001_v56 = vpop.f32.mrb[56].mxu1  ;;  %v5074_v9 = vpop.f32.mrb[72].mxu0  ;;  %6679 = vmatprep.subr.bf16.mxu1 %v6858_v0 }
0x1d9b   :  { %v6680_v31 = vpack.c.bf16 %v5074_v9, %v5001_v56  ;;  %v6437_v40 = vpop.f32.mrb[57].mxu1  ;;  %v6444_v63 = vpop.f32.mrb[73].mxu0 }
0x1d9d   :  { %6681 = vmatpush3.bf16.msra.mxu1 %v6680_v31 }
0x1d9e   :  { %6688 = vmatprep.subr.bf16.mxu1 %v6858_v0 }
0x1da0   :  { %6454 = vmatmul.mubr.msk.f32.vlgmr.msra.gmra.mrb[58].mxu1 %vm176_vm1, %v5078_v36 }
0x1da1   :  { %6475 = vmatprep.mubr.msk.f32.mxu1 %vm6860_vm0, %v6861_v1  ;;  %6690 = vmatpush3.bf16.msra.mxu1 %v6689_v57 }
0x1da2   :  { %6691 = vmatprep.subr.bf16.mxu1 %v6858_v0 }
0x1da5   :  { %6693 = vmatpush3.bf16.msra.mxu1 %v6692_v7 }
0x1e73   :  { %v7575_v37 = vpop.f32.mrb[58].mxu1 }
0x1e74   :  { %v5161_v41 = vadd.f32 %v5160_v35, %v7575_v37  ;;  %v6455_v43 = vpop.f32.mrb[59].mxu1 }
0x1e76   :  { %v5163_v44 = vsel %vm5162_vm15, %v5161_v41, 0.0  ;;  %v5167_v45 = vmul.f32 %v5161_v41, %v5161_v41 }
0x1e77   :  { %5164 = vadd.xlane.f32.xlu1 %v5163_v44 }
0x1e78   :  { %v5168_v46 = vsel %vm5162_vm15, %v5167_v45, 0.0 }
0x1e79   :  { %5169 = vadd.xlane.f32.xlu0 %v5168_v46 }
0x1e88   :  { %5189 = vperm.xlu1 %6803, %v7560_v27  }
0x1e8c   :  { %6806 = vset.pattern.permute.xlu1 %v6872_v20 }
0x1e8f   :  { %5180 = vperm.xlu0 %6802, %v7560_v27  }
0x1e93   :  { %6804 = vset.pattern.permute.xlu0 %v6868_v4  ;;  %v6686_v4 = vpack.c.bf16 %v5201_v60, %v5200_v59 }
0x1e94   :  { %5359 = vperm.xlu0 %6804, %v7560_v27  }
0x1e95   :  { %6687 = vmatpush3.bf16.msra.mxu0 %v6686_v4 }
0x1e96   :  { %6478 = vmatprep.subr.mxu0 %v6861_v1 }
0x1e98   :  { %6805 = vset.pattern.permute.xlu0 %v6871_v12 }
0x1f04   :  { %v5165_v12 = vpop.xlane.xlu1 %5164 }
0x1f05   :  { %v5166_v10 = vmul.f32 0.03125, %v5165_v12 }
0x1f06   :  { %v5170_v8 = vpop.xlane.xlu0 %5169 }
0x1f07   :  { %v5172_v32 = vmul.f32 %v5166_v10, %v5166_v10  ;;  %v5171_v15 = vmul.f32 0.03125, %v5170_v8  ;;  %v5175_v25 = vsub.f32 %v5161_v41, %v5166_v10 }
0x1f08   :  { %v5190_v21 = vpop.permute.xlu1 %5189 }
0x1f09   :  { %v5173_v22 = vsub.f32 %v5171_v15, %v5172_v32  ;;  %v5195_v26 = vrot.slane %v5190_v21, %v7572_v38 }
0x1f0b   :  { %v5174_v16 = vmax.f32 %v5173_v22, 0.0 }
0x1f0d   :  { %v5176_v17 = vadd.f32 1e-05, %v5174_v16 }
0x1f0e   :  { %v5181_v19 = vpop.permute.xlu0 %5180 }
0x1f0f   :  { %6850 = vrsqrt.f32 %v5176_v17  ;;  %v5186_v0 = vrot.slane %v5181_v19, %v7572_v38 }
0x1f19   :  { %v6851_v39 = vpop.eup %6850 }
0x1f1a   :  { %v5178_v13 = vmul.f32 %v6851_v39, %v5175_v25 }
0x1f1c   :  { %v5187_v28 = vmul.f32 %v5186_v0, %v5178_v13 }
0x1f1e   :  { %v5196_v42 = vadd.f32 %v5195_v26, %v5187_v28 }
0x1f20   :  { %v5197_v6 = vmax.f32 %v5196_v42, 0.0 }
0x1f22   :  { %6465 = vmatmul.mubr.msk.f32.vlgmr.msra.gmra.mrb[74].mxu0 %vm176_vm1, %v5197_v6  ;;  %6476 = vmatmul.mubr.msk.f32.vlgmr.msra.gmra.mrb[60].mxu1 %vm176_vm1, %v5197_v6  ;;  %v5350_v48 = vrot.slane %v5197_v6, 7 }
0x1f23   :  { %6480 = vmatprep.mubr.msk.f32.mxu0 %vm6860_vm0, %v6861_v1  ;;  %v5360_v1 = vpop.permute.xlu0 %5359 }
0x1f24   :  { %v5365_v29 = vrot.slane %v5360_v1, %v7572_v38 }
0x1ff5   :  { %v5271_v51 = vpop.f32.mrb[74].mxu0  ;;  %v5346_v14 = vpop.f32.mrb[60].mxu1 }
0x1ff6   :  { %v5355_v50 = vsel %vm406_vm3, %v5271_v51, %v5350_v48  ;;  %v5353_v18 = vrot.slane %v5346_v14, 6  ;;  %v6466_v53 = vpop.f32.mrb[75].mxu0  ;;  %v6477_v2 = vpop.f32.mrb[61].mxu1 }
0x1ff8   :  { %v5356_v58 = vsel %vm408_vm4, %v5355_v50, %v5353_v18 }
0x1ff9   :  { %6479 = vmatpush3.msk.msra.mxu0 %vm419_vm5, %v5356_v58 }
0x1ffa   :  { %6481 = vmatmul.mubr.msk.f32.vlgmr.msra.gmra.mrb[76].mxu0 %vm412_vm2, %v5357_v34 }
0x20cd   :  { %v5438_v24 = vpop.f32.mrb[76].mxu0 }
0x20ce   :  { %v5439_v33 = vadd.f32 %v5438_v24, %v5365_v29  ;;  %v6482_v47 = vpop.f32.mrb[77].mxu0 }
0x20d0   :  { %v5442_v23 = vsel %vm5162_vm15, %v5439_v33, 0.0  ;;  %v5446_v56 = vmul.f32 %v5439_v33, %v5439_v33 }
0x20d1   :  { %5443 = vadd.xlane.f32.xlu1 %v5442_v23 }
0x20d2   :  { %v5447_v9 = vsel %vm5162_vm15, %v5446_v56, 0.0 }
0x20d3   :  { %5448 = vadd.xlane.f32.xlu0 %v5447_v9 }
0x20e2   :  { %5468 = vperm.xlu1 %6806, %v7560_v27  }
0x20e9   :  { %5459 = vperm.xlu0 %6805, %v7560_v27  }
0x20ed   :  { %6807 = vset.pattern.permute.xlu0 %v6872_v20  ;;  %v5477_v20 = vrot.slane %v7575_v37, 1 }
0x215e   :  { %v5444_v31 = vpop.xlane.xlu1 %5443 }
0x215f   :  { %v5445_v40 = vmul.f32 0.03125, %v5444_v31 }
0x2160   :  { %v5449_v63 = vpop.xlane.xlu0 %5448 }
0x2161   :  { %v5451_v36 = vmul.f32 %v5445_v40, %v5445_v40  ;;  %v5450_v3 = vmul.f32 0.03125, %v5449_v63  ;;  %v5454_v44 = vsub.f32 %v5439_v33, %v5445_v40 }
0x2162   :  { %v5469_v43 = vpop.permute.xlu1 %5468 }
0x2163   :  { %v5452_v5 = vsub.f32 %v5450_v3, %v5451_v36  ;;  %v5474_v27 = vrot.slane %v5469_v43, %v7572_v38 }
0x2165   :  { %v5453_v11 = vmax.f32 %v5452_v5, 0.0 }
0x2167   :  { %v5455_v35 = vadd.f32 1e-05, %v5453_v11 }
0x2168   :  { %v5460_v41 = vpop.permute.xlu0 %5459 }
0x2169   :  { %6852 = vrsqrt.f32 %v5455_v35  ;;  %v5465_v45 = vrot.slane %v5460_v41, %v7572_v38 }
0x2173   :  { %v6853_v46 = vpop.eup %6852 }
0x2174   :  { %v5457_v49 = vmul.f32 %v6853_v46, %v5454_v44 }
0x2176   :  { %v5466_v52 = vmul.f32 %v5465_v45, %v5457_v49 }
0x2178   :  { %v5475_v54 = vadd.f32 %v5474_v27, %v5466_v52 }
0x217a   :  { %v5479_v30 = vadd.f32 %v5477_v20, %v5475_v54 }
0x217c   :  { %v5707_v55 = vmul.f32 -1.442695, %v5479_v30 }
0x217e   :  { %6854 = vpow2.f32 %v5707_v55 }
0x2188   :  { %v6855_v57 = vpop.eup %6854 }
0x2189   :  { %v5483_v59 = vadd.f32 1.0, %v6855_v57 }
0x218b   :  { %6856 = vrcp.f32 %v5483_v59 }
0x2195   :  { %v6857_v60 = vpop.eup %6856 }
0x2196   :  { %5486 = vst.msk [vmem:[%s5535_s19] sm:$0x1] %vm5162_vm15, %v6857_v60 }

</bundles_post_ra>
